<compile_context>
chip_gen: v6e
topology: v6e:2x2x1
jax: 0.10.0
libtpu: 0.0.40
codegen_flags: <defaults>
</compile_context>

<pallas_src>
import jax
import jax.numpy as jnp
import numpy as np
from jax import lax
from jax.experimental import pallas as pl
from jax.experimental.pallas import tpu as pltpu

_BN_EPS = 1e-5


def _round_up(n, m):
    return (n + m - 1) // m * m


def _vmem_limit_bytes(nbytes):
    """Explicit VMEM budget with headroom; capped for v7x's 64 MiB physical VMEM/core."""
    return int(min(60 << 20, max(32 << 20, 2 * nbytes + (8 << 20))))


# ------------------------------- LSTM cell step -------------------------------
def _lstm_step(gi, h_prev_bf16, c_prev, whh_bf16):
    """One LSTM cell update (PyTorch gate order i, f, g, o).

    gi already contains x @ W_ih^T + (b_ih + b_hh); gates live at 128-aligned column
    offsets of a (Bp, 4*Hp) slab.  Matmul inputs are bf16, accumulation and all gating /
    cell-state arithmetic stay in f32.
    """
    Hp = c_prev.shape[-1]
    gh = jnp.dot(h_prev_bf16, whh_bf16, preferred_element_type=jnp.float32)
    gates = gi + gh
    i = jax.nn.sigmoid(gates[:, 0 * Hp:1 * Hp])
    f = jax.nn.sigmoid(gates[:, 1 * Hp:2 * Hp])
    g = jnp.tanh(gates[:, 2 * Hp:3 * Hp])
    o = jax.nn.sigmoid(gates[:, 3 * Hp:4 * Hp])
    c_new = f * c_prev + i * g
    h_new = o * jnp.tanh(c_new)
    return h_new, c_new


# ------------------------- middle layer: chunked kernel -------------------------
def _lstm_seq_kernel(x_ref, wih_ref, whh_ref, bias_ref, out_ref, gi_scr, h_scr, c_scr):
    """Emit the full hidden sequence (bf16) for the next layer, one time-chunk per step."""
    c_idx = pl.program_id(0)

    @pl.when(c_idx == 0)
    def _():
        h_scr[...] = jnp.zeros_like(h_scr)
        c_scr[...] = jnp.zeros_like(c_scr)

    TC, Bp, Kp = x_ref.shape
    G = wih_ref.shape[1]
    # Fused input projection for the whole chunk: one (TC*Bp, Kp)x(Kp, 4*Hp) MXU matmul.
    x_flat = x_ref[...].reshape(TC * Bp, Kp)
    gi = jnp.dot(x_flat, wih_ref[...], preferred_element_type=jnp.float32) + bias_ref[...]
    gi_scr[...] = gi.reshape(TC, Bp, G)

    def body(t, carry):
        h_new, c_new = _lstm_step(gi_scr[t], h_scr[...], c_scr[...], whh_ref[...])
        h_bf16 = h_new.astype(jnp.bfloat16)   # single cast: scratch + output + next MXU LHS
        h_scr[...] = h_bf16
        c_scr[...] = c_new
        out_ref[t] = h_bf16
        return carry

    lax.fori_loop(0, TC, body, 0, unroll=True)


def _lstm_layer_seq(seq, wih, whh, bias, TC):
    Tp, Bp, Kp = seq.shape
    G = wih.shape[1]
    Hp = G // 4
    est = (Kp * G * 2 + Hp * G * 2 + G * 4
           + 2 * TC * Bp * Kp * 2 + 2 * TC * Bp * Hp * 2
           + TC * Bp * G * 4 + Bp * Hp * 6)
    return pl.pallas_call(
        _lstm_seq_kernel,
        out_shape=jax.ShapeDtypeStruct((Tp, Bp, Hp), jnp.bfloat16),
        grid=(Tp // TC,),
        in_specs=[
            pl.BlockSpec((TC, Bp, Kp), lambda c: (c, 0, 0)),
            pl.BlockSpec(memory_space=pltpu.MemorySpace.VMEM),   # W_ih slab (resident)
            pl.BlockSpec(memory_space=pltpu.MemorySpace.VMEM),   # W_hh slab (resident)
            pl.BlockSpec(memory_space=pltpu.MemorySpace.VMEM),   # folded bias
        ],
        out_specs=pl.BlockSpec((TC, Bp, Hp), lambda c: (c, 0, 0)),
        scratch_shapes=[pltpu.VMEM((TC, Bp, G), jnp.float32),    # per-chunk gi
                        pltpu.VMEM((Bp, Hp), jnp.bfloat16),      # h carry (bf16)
                        pltpu.VMEM((Bp, Hp), jnp.float32)],      # c carry (f32)
        compiler_params=pltpu.CompilerParams(
            dimension_semantics=("arbitrary",),                  # sequential recurrence
            vmem_limit_bytes=_vmem_limit_bytes(est)),
    )(seq, wih, whh, bias)


# ------------------ last layer: chunked kernel + fused BN/ReLU/FC ------------------
def _make_head_kernel(T_valid, TC):
    padded = (T_valid % TC) != 0

    def kernel(x_ref, wih_ref, whh_ref, bias_ref, bn_scale_ref, bn_shift_ref,
               wfc_ref, bfc_ref, out_ref, gi_scr, h_scr, c_scr, hlast_scr):
        c_idx = pl.program_id(0)

        @pl.when(c_idx == 0)
        def _():
            h_scr[...] = jnp.zeros_like(h_scr)
            c_scr[...] = jnp.zeros_like(c_scr)
            hlast_scr[...] = jnp.zeros_like(hlast_scr)
            out_ref[...] = jnp.zeros_like(out_ref)    # robustness: output block init

        TCk, Bp, Kp = x_ref.shape
        G = wih_ref.shape[1]
        x_flat = x_ref[...].reshape(TCk * Bp, Kp)
        gi = jnp.dot(x_flat, wih_ref[...], preferred_element_type=jnp.float32) + bias_ref[...]
        gi_scr[...] = gi.reshape(TCk, Bp, G)

        def body(t, carry):
            h_new, c_new = _lstm_step(gi_scr[t], h_scr[...], c_scr[...], whh_ref[...])
            h_scr[...] = h_new.astype(jnp.bfloat16)
            c_scr[...] = c_new
            if padded:
                # keep the f32 h from the LAST VALID timestep (ignore time padding)
                valid = (c_idx * TC + t) < T_valid
                hlast_scr[...] = jnp.where(valid, h_new, hlast_scr[...])
            else:
                hlast_scr[...] = h_new
            return carry

        lax.fori_loop(0, TC, body, 0, unroll=True)

        @pl.when(c_idx == pl.num_programs(0) - 1)
        def _():
            # Fused eval-mode BatchNorm1d + ReLU + Linear on the last valid timestep.
            bn = hlast_scr[...] * bn_scale_ref[...] + bn_shift_ref[...]
            z = jnp.maximum(bn, 0.0).astype(jnp.bfloat16)
            out_ref[...] = (jnp.dot(z, wfc_ref[...], preferred_element_type=jnp.float32)
                            + bfc_ref[...]).astype(out_ref.dtype)

    return kernel


def _lstm_layer_head(seq, wih, whh, bias, bn_scale, bn_shift, wfc, bfc, TC, T):
    Tp, Bp, Kp = seq.shape
    G = wih.shape[1]
    Hp = G // 4
    Op = wfc.shape[1]
    est = (Kp * G * 2 + Hp * G * 2 + G * 4 + 2 * Hp * 4 + Hp * Op * 2 + Op * 4
           + 2 * TC * Bp * Kp * 2 + TC * Bp * G * 4
           + Bp * Hp * (2 + 4 + 4) + 2 * Bp * Op * 4)
    return pl.pallas_call(
        _make_head_kernel(T, TC),
        out_shape=jax.ShapeDtypeStruct((Bp, Op), jnp.float32),
        grid=(Tp // TC,),
        in_specs=[
            pl.BlockSpec((TC, Bp, Kp), lambda c: (c, 0, 0)),
            pl.BlockSpec(memory_space=pltpu.MemorySpace.VMEM),   # W_ih slab
            pl.BlockSpec(memory_space=pltpu.MemorySpace.VMEM),   # W_hh slab
            pl.BlockSpec(memory_space=pltpu.MemorySpace.VMEM),   # folded bias
            pl.BlockSpec(memory_space=pltpu.MemorySpace.VMEM),   # bn scale
            pl.BlockSpec(memory_space=pltpu.MemorySpace.VMEM),   # bn shift
            pl.BlockSpec(memory_space=pltpu.MemorySpace.VMEM),   # fc weight
            pl.BlockSpec(memory_space=pltpu.MemorySpace.VMEM),   # fc bias
        ],
        out_specs=pl.BlockSpec((Bp, Op), lambda c: (0, 0)),
        scratch_shapes=[pltpu.VMEM((TC, Bp, G), jnp.float32),    # per-chunk gi
                        pltpu.VMEM((Bp, Hp), jnp.bfloat16),      # h carry (bf16)
                        pltpu.VMEM((Bp, Hp), jnp.float32),       # c carry (f32)
                        pltpu.VMEM((Bp, Hp), jnp.float32)],      # last-valid h (f32)
        compiler_params=pltpu.CompilerParams(
            dimension_semantics=("arbitrary",),
            vmem_limit_bytes=_vmem_limit_bytes(est)),
    )(seq, wih, whh, bias, bn_scale, bn_shift, wfc, bfc)


# --------------------------- parameter preparation ---------------------------
def _prepare_kernel_params(params):
    """Pad/transpose PyTorch-layout params into lane-aligned, bf16 kernel slabs."""
    H = params["lstm_layers"][0][1].shape[1]
    O = params["fc_w"].shape[0]
    Hp = _round_up(H, 128)
    Op = _round_up(O, 128)

    layers = []
    for li, (w_ih, w_hh, b_ih, b_hh) in enumerate(params["lstm_layers"]):
        K = w_ih.shape[1]
        Kp = K if li == 0 else Hp          # layer>0 consumes the padded hidden state
        wih_p = jnp.zeros((Kp, 4 * Hp), jnp.float32)
        whh_p = jnp.zeros((Hp, 4 * Hp), jnp.float32)
        b_p = jnp.zeros((1, 4 * Hp), jnp.float32)
        b = (b_ih + b_hh).astype(jnp.float32)          # biases folded into gi
        for g in range(4):                              # PyTorch gate order: i, f, g, o
            wih_p = wih_p.at[:K, g * Hp:g * Hp + H].set(
                w_ih[g * H:(g + 1) * H, :].T.astype(jnp.float32))
            whh_p = whh_p.at[:H, g * Hp:g * Hp + H].set(
                w_hh[g * H:(g + 1) * H, :].T.astype(jnp.float32))
            b_p = b_p.at[0, g * Hp:g * Hp + H].set(b[g * H:(g + 1) * H])
        layers.append((wih_p.astype(jnp.bfloat16), whh_p.astype(jnp.bfloat16), b_p))

    scale = (params["bn_gamma"] / jnp.sqrt(params["bn_var"] + _BN_EPS)).astype(jnp.float32)
    shift = (params["bn_beta"] - params["bn_mean"] * scale).astype(jnp.float32)
    bn_scale = jnp.zeros((1, Hp), jnp.float32).at[0, :H].set(scale)
    bn_shift = jnp.zeros((1, Hp), jnp.float32).at[0, :H].set(shift)
    wfc = jnp.zeros((Hp, Op), jnp.float32).at[:H, :O].set(
        params["fc_w"].T.astype(jnp.float32)).astype(jnp.bfloat16)
    bfc = jnp.zeros((1, Op), jnp.float32).at[0, :O].set(params["fc_b"].astype(jnp.float32))
    return {"layers": layers, "bn_scale": bn_scale, "bn_shift": bn_shift,
            "wfc": wfc, "bfc": bfc}


# -------------------------------- full forward --------------------------------
def lstm_cluster_forward(x, params):
    """x: (B, T, I) batch_first. Returns (B, output_size). Eval-mode semantics."""
    kp = _prepare_kernel_params(params)
    B, T, _ = x.shape
    O = params["fc_w"].shape[0]
    Bp = _round_up(B, 16)     # native bf16 tile is (16,128): full-tile MXU LHS / h stores
    TC = min(T, 16)           # time chunk: amortize per-grid-step overhead over TC steps
    Tp = _round_up(T, TC)

    x_tm = jnp.transpose(x, (1, 0, 2))                            # (T, B, I) time-major
    seq = jnp.pad(x_tm, ((0, Tp - T), (0, Bp - B), (0, 0))).astype(jnp.bfloat16)

    n_layers = len(kp["layers"])
    out = None
    for li, (wih, whh, bias) in enumerate(kp["layers"]):
        if li + 1 < n_layers:
            # TODO(synk): training-mode inter-layer dropout (p=0.2) not implemented (eval no-op).
            seq = _lstm_layer_seq(seq, wih, whh, bias, TC)        # (Tp, Bp, Hp) bf16
        else:
            out = _lstm_layer_head(seq, wih, whh, bias, kp["bn_scale"], kp["bn_shift"],
                                   kp["wfc"], kp["bfc"], TC, T)   # (Bp, Op) f32
    return out[:B, :O]


# --------------------------- pure-JAX reference (check) ---------------------------
def _round_bf16(a):
    return a.astype(jnp.bfloat16).astype(jnp.float32)


def lstm_cluster_reference(x, params, *, emulate_bf16=False):
    """PyTorch-semantics reference (eval mode). If emulate_bf16, round matmul inputs
    to bf16 (matching the kernel's precision policy) for a tight comparison."""
    rd = _round_bf16 if emulate_bf16 else (lambda a: a)
    B, T, _ = x.shape
    seq = jnp.transpose(x, (1, 0, 2)).astype(jnp.float32)         # (T, B, I)
    for (w_ih, w_hh, b_ih, b_hh) in params["lstm_layers"]:
        H = w_hh.shape[1]
        wih_t = rd(w_ih.astype(jnp.float32)).T
        whh_t = rd(w_hh.astype(jnp.float32)).T
        b = (b_ih + b_hh).astype(jnp.float32)

        def step(carry, x_t, wih_t=wih_t, whh_t=whh_t, b=b):
            h, c = carry
            gates = rd(x_t) @ wih_t + b + rd(h) @ whh_t
            i, f, g, o = jnp.split(gates, 4, axis=-1)
            i, f, o = jax.nn.sigmoid(i), jax.nn.sigmoid(f), jax.nn.sigmoid(o)
            g = jnp.tanh(g)
            c = f * c + i * g
            h = o * jnp.tanh(c)
            return (h, c), h

        init = (jnp.zeros((B, H), jnp.float32), jnp.zeros((B, H), jnp.float32))
        _, seq = jax.lax.scan(step, init, seq)
    h_last = seq[-1]                                              # (B, H) == out[:, -1, :]
    scale = params["bn_gamma"] / jnp.sqrt(params["bn_var"] + _BN_EPS)
    shift = params["bn_beta"] - params["bn_mean"] * scale
    z = jnp.maximum(h_last * scale + shift, 0.0)                  # BN(eval) then ReLU
    return rd(z) @ rd(params["fc_w"].astype(jnp.float32)).T + params["fc_b"]


# ----------------------------------- params -----------------------------------
def init_params(key, input_size, hidden_size, num_layers, output_size):
    bound = 1.0 / np.sqrt(hidden_size)
    layers = []
    for layer in range(num_layers):
        in_sz = input_size if layer == 0 else hidden_size
        key, k1, k2, k3, k4 = jax.random.split(key, 5)
        w_ih = jax.random.uniform(k1, (4 * hidden_size, in_sz), jnp.float32, -bound, bound)
        w_hh = jax.random.uniform(k2, (4 * hidden_size, hidden_size), jnp.float32, -bound, bound)
        b_ih = jax.random.uniform(k3, (4 * hidden_size,), jnp.float32, -bound, bound)
        b_hh = jax.random.uniform(k4, (4 * hidden_size,), jnp.float32, -bound, bound)
        layers.append((w_ih, w_hh, b_ih, b_hh))
    key, k5, k6, k7, k8, k9, k10 = jax.random.split(key, 7)
    fc_w = jax.random.uniform(k5, (output_size, hidden_size), jnp.float32, -bound, bound)
    fc_b = jax.random.uniform(k6, (output_size,), jnp.float32, -bound, bound)
    # BatchNorm1d(hidden) eval-mode affine params + running stats (randomized so BN is exercised)
    bn_gamma = jax.random.uniform(k7, (hidden_size,), jnp.float32, 0.5, 1.5)
    bn_beta = 0.1 * jax.random.normal(k8, (hidden_size,), jnp.float32)
    bn_mean = 0.1 * jax.random.normal(k9, (hidden_size,), jnp.float32)
    bn_var = jax.random.uniform(k10, (hidden_size,), jnp.float32, 0.5, 1.5)
    return {"lstm_layers": layers, "fc_w": fc_w, "fc_b": fc_b,
            "bn_gamma": bn_gamma, "bn_beta": bn_beta,
            "bn_mean": bn_mean, "bn_var": bn_var}


if __name__ == "__main__":
    # Small shapes: batch=2, seq=8, input_size=16, hidden=32, layers=2, output=4
    B, T, I, H, L, O = 2, 8, 16, 32, 2, 4

    key = jax.random.PRNGKey(0)
    key, kx = jax.random.split(key)
    x = jax.random.normal(kx, (B, T, I), jnp.float32)
    params = init_params(key, I, H, L, O)

    out = jax.block_until_ready(jax.jit(lstm_cluster_forward)(x, params))
    assert out.shape == (B, O)

    # Tight check vs a reference that uses the same bf16-matmul-input precision policy.
    ref_bf16 = jax.block_until_ready(lstm_cluster_reference(x, params, emulate_bf16=True))
    np.testing.assert_allclose(np.asarray(out), np.asarray(ref_bf16), atol=2e-3, rtol=2e-3)

    # Loose sanity check vs the pure-f32 PyTorch-semantics reference.
    ref_f32 = jax.block_until_ready(lstm_cluster_reference(x, params, emulate_bf16=False))
    np.testing.assert_allclose(np.asarray(out), np.asarray(ref_f32), atol=5e-2, rtol=5e-2)

    print("KERNEL_OK")
</pallas_src>

<mosaic_0001>
module attributes {stable_mosaic.version = 11 : i64} {
  func.func @_lstm_seq_kernel(%arg0: i32, %arg1: memref<8x16x16xbf16, #tpu.memory_space<vmem>>, %arg2: memref<16x512xbf16, #tpu.memory_space<vmem>>, %arg3: memref<128x512xbf16, #tpu.memory_space<vmem>>, %arg4: memref<1x512xf32, #tpu.memory_space<vmem>>, %arg5: memref<8x16x128xbf16, #tpu.memory_space<vmem>>, %arg6: memref<8x16x512xf32, #tpu.memory_space<vmem>>, %arg7: memref<16x128xbf16, #tpu.memory_space<vmem>>, %arg8: memref<16x128xf32, #tpu.memory_space<vmem>>) attributes {dimension_semantics = [#tpu.dimension_semantics<arbitrary>], iteration_bounds = array<i64: 1>, scalar_prefetch = 0 : i64, scratch_operands = 3 : i64, tpu.core_type = #tpu.core_type<tc>, window_params = [{transform_indices = @transform_0, window_bounds = array<i64: 8, 16, 16>}, {pipeline_mode = #tpu.pipeline_mode<synchronous>, transform_indices = @transform_1, window_bounds = array<i64: 16, 512>}, {pipeline_mode = #tpu.pipeline_mode<synchronous>, transform_indices = @transform_2, window_bounds = array<i64: 128, 512>}, {pipeline_mode = #tpu.pipeline_mode<synchronous>, transform_indices = @transform_3, window_bounds = array<i64: 1, 512>}, {transform_indices = @transform_4, window_bounds = array<i64: 8, 16, 128>}]} {
    %c0_i32 = arith.constant 0 : i32
    %0 = arith.cmpi eq, %arg0, %c0_i32 : i32
    %1 = arith.extui %0 : i1 to i32
    %c0_i32_0 = arith.constant 0 : i32
    %2 = arith.cmpi ne, %1, %c0_i32_0 : i32
    scf.if %2 {
      %cst_155 = arith.constant 0.000000e+00 : bf16
      %332 = vector.broadcast %cst_155 : bf16 to vector<16x128xbf16>
      %c0_156 = arith.constant 0 : index
      %c0_157 = arith.constant 0 : index
      %333 = vector.load %arg7[%c0_156, %c0_157] : memref<16x128xbf16, #tpu.memory_space<vmem>>, vector<16x128xbf16>
      tpu.vector_store %arg7[%c0_156, %c0_157], %332 {strides = array<i32>} : memref<16x128xbf16, #tpu.memory_space<vmem>>, vector<16x128xbf16>,
      %cst_158 = arith.constant 0.000000e+00 : f32
      %334 = vector.broadcast %cst_158 : f32 to vector<16x128xf32>
      %c0_159 = arith.constant 0 : index
      %c0_160 = arith.constant 0 : index
      %335 = vector.load %arg8[%c0_159, %c0_160] : memref<16x128xf32, #tpu.memory_space<vmem>>, vector<16x128xf32>
      tpu.vector_store %arg8[%c0_159, %c0_160], %334 {strides = array<i32>} : memref<16x128xf32, #tpu.memory_space<vmem>>, vector<16x128xf32>,
    } else {
    }
    %c0 = arith.constant 0 : index
    %c0_1 = arith.constant 0 : index
    %c0_2 = arith.constant 0 : index
    %3 = vector.load %arg1[%c0, %c0_1, %c0_2] : memref<8x16x16xbf16, #tpu.memory_space<vmem>>, vector<8x16x16xbf16>
    %4 = vector.shape_cast %3 : vector<8x16x16xbf16> to vector<128x16xbf16>
    %c0_3 = arith.constant 0 : index
    %c0_4 = arith.constant 0 : index
    %5 = vector.load %arg2[%c0_3, %c0_4] : memref<16x512xbf16, #tpu.memory_space<vmem>>, vector<16x512xbf16>
    %cst = arith.constant dense<0.000000e+00> : vector<128x512xf32>
    %6 = tpu.matmul %4, %5, %cst {dimension_numbers = #tpu.dot_dimension_numbers<[1], [0], [0], [1], [0, 0, 1, 1], [], []>} : vector<128x16xbf16>, vector<16x512xbf16>, vector<128x512xf32> -> vector<128x512xf32>
    %c0_5 = arith.constant 0 : index
    %c0_6 = arith.constant 0 : index
    %7 = vector.load %arg4[%c0_5, %c0_6] : memref<1x512xf32, #tpu.memory_space<vmem>>, vector<1x512xf32>
    %8 = vector.broadcast %7 : vector<1x512xf32> to vector<128x512xf32>
    %9 = arith.addf %6, %8 : vector<128x512xf32>
    %10 = vector.shape_cast %9 : vector<128x512xf32> to vector<8x16x512xf32>
    %c0_7 = arith.constant 0 : index
    %c0_8 = arith.constant 0 : index
    %c0_9 = arith.constant 0 : index
    %11 = vector.load %arg6[%c0_7, %c0_8, %c0_9] : memref<8x16x512xf32, #tpu.memory_space<vmem>>, vector<8x16x512xf32>
    tpu.vector_store %arg6[%c0_7, %c0_8, %c0_9], %10 {strides = array<i32>} : memref<8x16x512xf32, #tpu.memory_space<vmem>>, vector<8x16x512xf32>,
    %c0_i32_10 = arith.constant 0 : i32
    %12 = arith.index_cast %c0_i32_10 : i32 to index
    %c0_11 = arith.constant 0 : index
    %c0_12 = arith.constant 0 : index
    %13 = vector.load %arg6[%12, %c0_11, %c0_12] : memref<8x16x512xf32, #tpu.memory_space<vmem>>, vector<1x16x512xf32>
    %14 = vector.shape_cast %13 : vector<1x16x512xf32> to vector<16x512xf32>
    %c0_13 = arith.constant 0 : index
    %c0_14 = arith.constant 0 : index
    %15 = vector.load %arg7[%c0_13, %c0_14] : memref<16x128xbf16, #tpu.memory_space<vmem>>, vector<16x128xbf16>
    %c0_15 = arith.constant 0 : index
    %c0_16 = arith.constant 0 : index
    %16 = vector.load %arg8[%c0_15, %c0_16] : memref<16x128xf32, #tpu.memory_space<vmem>>, vector<16x128xf32>
    %c0_17 = arith.constant 0 : index
    %c0_18 = arith.constant 0 : index
    %17 = vector.load %arg3[%c0_17, %c0_18] : memref<128x512xbf16, #tpu.memory_space<vmem>>, vector<128x512xbf16>
    %cst_19 = arith.constant dense<0.000000e+00> : vector<16x512xf32>
    %18 = tpu.matmul %15, %17, %cst_19 {dimension_numbers = #tpu.dot_dimension_numbers<[1], [0], [0], [1], [0, 0, 1, 1], [], []>} : vector<16x128xbf16>, vector<128x512xbf16>, vector<16x512xf32> -> vector<16x512xf32>
    %19 = arith.addf %14, %18 : vector<16x512xf32>
    %20 = vector.extract_strided_slice %19 {offsets = [0, 0], sizes = [16, 128], strides = [1, 1]} : vector<16x512xf32> to vector<16x128xf32>
    %21 = arith.negf %20 : vector<16x128xf32>
    %22 = math.exp %21 : vector<16x128xf32>
    %cst_20 = arith.constant 1.000000e+00 : f32
    %23 = vector.broadcast %cst_20 : f32 to vector<16x128xf32>
    %24 = arith.addf %23, %22 : vector<16x128xf32>
    %25 = arith.divf %23, %24 : vector<16x128xf32>
    %26 = vector.extract_strided_slice %19 {offsets = [0, 128], sizes = [16, 128], strides = [1, 1]} : vector<16x512xf32> to vector<16x128xf32>
    %27 = arith.negf %26 : vector<16x128xf32>
    %28 = math.exp %27 : vector<16x128xf32>
    %cst_21 = arith.constant 1.000000e+00 : f32
    %29 = vector.broadcast %cst_21 : f32 to vector<16x128xf32>
    %30 = arith.addf %29, %28 : vector<16x128xf32>
    %31 = arith.divf %29, %30 : vector<16x128xf32>
    %32 = vector.extract_strided_slice %19 {offsets = [0, 256], sizes = [16, 128], strides = [1, 1]} : vector<16x512xf32> to vector<16x128xf32>
    %33 = math.tanh %32 : vector<16x128xf32>
    %34 = vector.extract_strided_slice %19 {offsets = [0, 384], sizes = [16, 128], strides = [1, 1]} : vector<16x512xf32> to vector<16x128xf32>
    %35 = arith.negf %34 : vector<16x128xf32>
    %36 = math.exp %35 : vector<16x128xf32>
    %cst_22 = arith.constant 1.000000e+00 : f32
    %37 = vector.broadcast %cst_22 : f32 to vector<16x128xf32>
    %38 = arith.addf %37, %36 : vector<16x128xf32>
    %39 = arith.divf %37, %38 : vector<16x128xf32>
    %40 = arith.mulf %31, %16 : vector<16x128xf32>
    %41 = arith.mulf %25, %33 : vector<16x128xf32>
    %42 = arith.addf %40, %41 : vector<16x128xf32>
    %43 = math.tanh %42 : vector<16x128xf32>
    %44 = arith.mulf %39, %43 : vector<16x128xf32>
    %45 = arith.truncf %44 : vector<16x128xf32> to vector<16x128xbf16>
    %c0_23 = arith.constant 0 : index
    %c0_24 = arith.constant 0 : index
    %46 = vector.load %arg7[%c0_23, %c0_24] : memref<16x128xbf16, #tpu.memory_space<vmem>>, vector<16x128xbf16>
    tpu.vector_store %arg7[%c0_23, %c0_24], %45 {strides = array<i32>} : memref<16x128xbf16, #tpu.memory_space<vmem>>, vector<16x128xbf16>,
    %c0_25 = arith.constant 0 : index
    %c0_26 = arith.constant 0 : index
    %47 = vector.load %arg8[%c0_25, %c0_26] : memref<16x128xf32, #tpu.memory_space<vmem>>, vector<16x128xf32>
    tpu.vector_store %arg8[%c0_25, %c0_26], %42 {strides = array<i32>} : memref<16x128xf32, #tpu.memory_space<vmem>>, vector<16x128xf32>,
    %48 = arith.index_cast %c0_i32_10 : i32 to index
    %c0_27 = arith.constant 0 : index
    %c0_28 = arith.constant 0 : index
    %49 = vector.load %arg5[%48, %c0_27, %c0_28] : memref<8x16x128xbf16, #tpu.memory_space<vmem>>, vector<1x16x128xbf16>
    %50 = vector.shape_cast %49 : vector<1x16x128xbf16> to vector<16x128xbf16>
    %51 = vector.shape_cast %45 : vector<16x128xbf16> to vector<1x16x128xbf16>
    tpu.vector_store %arg5[%48, %c0_27, %c0_28], %51 {strides = array<i32>} : memref<8x16x128xbf16, #tpu.memory_space<vmem>>, vector<1x16x128xbf16>,
    %c1_i32 = arith.constant 1 : i32
    %52 = arith.index_cast %c1_i32 : i32 to index
    %c0_29 = arith.constant 0 : index
    %c0_30 = arith.constant 0 : index
    %53 = vector.load %arg6[%52, %c0_29, %c0_30] : memref<8x16x512xf32, #tpu.memory_space<vmem>>, vector<1x16x512xf32>
    %54 = vector.shape_cast %53 : vector<1x16x512xf32> to vector<16x512xf32>
    %c0_31 = arith.constant 0 : index
    %c0_32 = arith.constant 0 : index
    %55 = vector.load %arg7[%c0_31, %c0_32] : memref<16x128xbf16, #tpu.memory_space<vmem>>, vector<16x128xbf16>
    %c0_33 = arith.constant 0 : index
    %c0_34 = arith.constant 0 : index
    %56 = vector.load %arg8[%c0_33, %c0_34] : memref<16x128xf32, #tpu.memory_space<vmem>>, vector<16x128xf32>
    %c0_35 = arith.constant 0 : index
    %c0_36 = arith.constant 0 : index
    %57 = vector.load %arg3[%c0_35, %c0_36] : memref<128x512xbf16, #tpu.memory_space<vmem>>, vector<128x512xbf16>
    %cst_37 = arith.constant dense<0.000000e+00> : vector<16x512xf32>
    %58 = tpu.matmul %55, %57, %cst_37 {dimension_numbers = #tpu.dot_dimension_numbers<[1], [0], [0], [1], [0, 0, 1, 1], [], []>} : vector<16x128xbf16>, vector<128x512xbf16>, vector<16x512xf32> -> vector<16x512xf32>
    %59 = arith.addf %54, %58 : vector<16x512xf32>
    %60 = vector.extract_strided_slice %59 {offsets = [0, 0], sizes = [16, 128], strides = [1, 1]} : vector<16x512xf32> to vector<16x128xf32>
    %61 = arith.negf %60 : vector<16x128xf32>
    %62 = math.exp %61 : vector<16x128xf32>
    %cst_38 = arith.constant 1.000000e+00 : f32
    %63 = vector.broadcast %cst_38 : f32 to vector<16x128xf32>
    %64 = arith.addf %63, %62 : vector<16x128xf32>
    %65 = arith.divf %63, %64 : vector<16x128xf32>
    %66 = vector.extract_strided_slice %59 {offsets = [0, 128], sizes = [16, 128], strides = [1, 1]} : vector<16x512xf32> to vector<16x128xf32>
    %67 = arith.negf %66 : vector<16x128xf32>
    %68 = math.exp %67 : vector<16x128xf32>
    %cst_39 = arith.constant 1.000000e+00 : f32
    %69 = vector.broadcast %cst_39 : f32 to vector<16x128xf32>
    %70 = arith.addf %69, %68 : vector<16x128xf32>
    %71 = arith.divf %69, %70 : vector<16x128xf32>
    %72 = vector.extract_strided_slice %59 {offsets = [0, 256], sizes = [16, 128], strides = [1, 1]} : vector<16x512xf32> to vector<16x128xf32>
    %73 = math.tanh %72 : vector<16x128xf32>
    %74 = vector.extract_strided_slice %59 {offsets = [0, 384], sizes = [16, 128], strides = [1, 1]} : vector<16x512xf32> to vector<16x128xf32>
    %75 = arith.negf %74 : vector<16x128xf32>
    %76 = math.exp %75 : vector<16x128xf32>
    %cst_40 = arith.constant 1.000000e+00 : f32
    %77 = vector.broadcast %cst_40 : f32 to vector<16x128xf32>
    %78 = arith.addf %77, %76 : vector<16x128xf32>
    %79 = arith.divf %77, %78 : vector<16x128xf32>
    %80 = arith.mulf %71, %56 : vector<16x128xf32>
    %81 = arith.mulf %65, %73 : vector<16x128xf32>
    %82 = arith.addf %80, %81 : vector<16x128xf32>
    %83 = math.tanh %82 : vector<16x128xf32>
    %84 = arith.mulf %79, %83 : vector<16x128xf32>
    %85 = arith.truncf %84 : vector<16x128xf32> to vector<16x128xbf16>
    %c0_41 = arith.constant 0 : index
    %c0_42 = arith.constant 0 : index
    %86 = vector.load %arg7[%c0_41, %c0_42] : memref<16x128xbf16, #tpu.memory_space<vmem>>, vector<16x128xbf16>
    tpu.vector_store %arg7[%c0_41, %c0_42], %85 {strides = array<i32>} : memref<16x128xbf16, #tpu.memory_space<vmem>>, vector<16x128xbf16>,
    %c0_43 = arith.constant 0 : index
    %c0_44 = arith.constant 0 : index
    %87 = vector.load %arg8[%c0_43, %c0_44] : memref<16x128xf32, #tpu.memory_space<vmem>>, vector<16x128xf32>
    tpu.vector_store %arg8[%c0_43, %c0_44], %82 {strides = array<i32>} : memref<16x128xf32, #tpu.memory_space<vmem>>, vector<16x128xf32>,
    %88 = arith.index_cast %c1_i32 : i32 to index
    %c0_45 = arith.constant 0 : index
    %c0_46 = arith.constant 0 : index
    %89 = vector.load %arg5[%88, %c0_45, %c0_46] : memref<8x16x128xbf16, #tpu.memory_space<vmem>>, vector<1x16x128xbf16>
    %90 = vector.shape_cast %89 : vector<1x16x128xbf16> to vector<16x128xbf16>
    %91 = vector.shape_cast %85 : vector<16x128xbf16> to vector<1x16x128xbf16>
    tpu.vector_store %arg5[%88, %c0_45, %c0_46], %91 {strides = array<i32>} : memref<8x16x128xbf16, #tpu.memory_space<vmem>>, vector<1x16x128xbf16>,
    %c2_i32 = arith.constant 2 : i32
    %92 = arith.index_cast %c2_i32 : i32 to index
    %c0_47 = arith.constant 0 : index
    %c0_48 = arith.constant 0 : index
    %93 = vector.load %arg6[%92, %c0_47, %c0_48] : memref<8x16x512xf32, #tpu.memory_space<vmem>>, vector<1x16x512xf32>
    %94 = vector.shape_cast %93 : vector<1x16x512xf32> to vector<16x512xf32>
    %c0_49 = arith.constant 0 : index
    %c0_50 = arith.constant 0 : index
    %95 = vector.load %arg7[%c0_49, %c0_50] : memref<16x128xbf16, #tpu.memory_space<vmem>>, vector<16x128xbf16>
    %c0_51 = arith.constant 0 : index
    %c0_52 = arith.constant 0 : index
    %96 = vector.load %arg8[%c0_51, %c0_52] : memref<16x128xf32, #tpu.memory_space<vmem>>, vector<16x128xf32>
    %c0_53 = arith.constant 0 : index
    %c0_54 = arith.constant 0 : index
    %97 = vector.load %arg3[%c0_53, %c0_54] : memref<128x512xbf16, #tpu.memory_space<vmem>>, vector<128x512xbf16>
    %cst_55 = arith.constant dense<0.000000e+00> : vector<16x512xf32>
    %98 = tpu.matmul %95, %97, %cst_55 {dimension_numbers = #tpu.dot_dimension_numbers<[1], [0], [0], [1], [0, 0, 1, 1], [], []>} : vector<16x128xbf16>, vector<128x512xbf16>, vector<16x512xf32> -> vector<16x512xf32>
    %99 = arith.addf %94, %98 : vector<16x512xf32>
    %100 = vector.extract_strided_slice %99 {offsets = [0, 0], sizes = [16, 128], strides = [1, 1]} : vector<16x512xf32> to vector<16x128xf32>
    %101 = arith.negf %100 : vector<16x128xf32>
    %102 = math.exp %101 : vector<16x128xf32>
    %cst_56 = arith.constant 1.000000e+00 : f32
    %103 = vector.broadcast %cst_56 : f32 to vector<16x128xf32>
    %104 = arith.addf %103, %102 : vector<16x128xf32>
    %105 = arith.divf %103, %104 : vector<16x128xf32>
    %106 = vector.extract_strided_slice %99 {offsets = [0, 128], sizes = [16, 128], strides = [1, 1]} : vector<16x512xf32> to vector<16x128xf32>
    %107 = arith.negf %106 : vector<16x128xf32>
    %108 = math.exp %107 : vector<16x128xf32>
    %cst_57 = arith.constant 1.000000e+00 : f32
    %109 = vector.broadcast %cst_57 : f32 to vector<16x128xf32>
    %110 = arith.addf %109, %108 : vector<16x128xf32>
    %111 = arith.divf %109, %110 : vector<16x128xf32>
    %112 = vector.extract_strided_slice %99 {offsets = [0, 256], sizes = [16, 128], strides = [1, 1]} : vector<16x512xf32> to vector<16x128xf32>
    %113 = math.tanh %112 : vector<16x128xf32>
    %114 = vector.extract_strided_slice %99 {offsets = [0, 384], sizes = [16, 128], strides = [1, 1]} : vector<16x512xf32> to vector<16x128xf32>
    %115 = arith.negf %114 : vector<16x128xf32>
    %116 = math.exp %115 : vector<16x128xf32>
    %cst_58 = arith.constant 1.000000e+00 : f32
    %117 = vector.broadcast %cst_58 : f32 to vector<16x128xf32>
    %118 = arith.addf %117, %116 : vector<16x128xf32>
    %119 = arith.divf %117, %118 : vector<16x128xf32>
    %120 = arith.mulf %111, %96 : vector<16x128xf32>
    %121 = arith.mulf %105, %113 : vector<16x128xf32>
    %122 = arith.addf %120, %121 : vector<16x128xf32>
    %123 = math.tanh %122 : vector<16x128xf32>
    %124 = arith.mulf %119, %123 : vector<16x128xf32>
    %125 = arith.truncf %124 : vector<16x128xf32> to vector<16x128xbf16>
    %c0_59 = arith.constant 0 : index
    %c0_60 = arith.constant 0 : index
    %126 = vector.load %arg7[%c0_59, %c0_60] : memref<16x128xbf16, #tpu.memory_space<vmem>>, vector<16x128xbf16>
    tpu.vector_store %arg7[%c0_59, %c0_60], %125 {strides = array<i32>} : memref<16x128xbf16, #tpu.memory_space<vmem>>, vector<16x128xbf16>,
    %c0_61 = arith.constant 0 : index
    %c0_62 = arith.constant 0 : index
    %127 = vector.load %arg8[%c0_61, %c0_62] : memref<16x128xf32, #tpu.memory_space<vmem>>, vector<16x128xf32>
    tpu.vector_store %arg8[%c0_61, %c0_62], %122 {strides = array<i32>} : memref<16x128xf32, #tpu.memory_space<vmem>>, vector<16x128xf32>,
    %128 = arith.index_cast %c2_i32 : i32 to index
    %c0_63 = arith.constant 0 : index
    %c0_64 = arith.constant 0 : index
    %129 = vector.load %arg5[%128, %c0_63, %c0_64] : memref<8x16x128xbf16, #tpu.memory_space<vmem>>, vector<1x16x128xbf16>
    %130 = vector.shape_cast %129 : vector<1x16x128xbf16> to vector<16x128xbf16>
    %131 = vector.shape_cast %125 : vector<16x128xbf16> to vector<1x16x128xbf16>
    tpu.vector_store %arg5[%128, %c0_63, %c0_64], %131 {strides = array<i32>} : memref<8x16x128xbf16, #tpu.memory_space<vmem>>, vector<1x16x128xbf16>,
    %c3_i32 = arith.constant 3 : i32
    %132 = arith.index_cast %c3_i32 : i32 to index
    %c0_65 = arith.constant 0 : index
    %c0_66 = arith.constant 0 : index
    %133 = vector.load %arg6[%132, %c0_65, %c0_66] : memref<8x16x512xf32, #tpu.memory_space<vmem>>, vector<1x16x512xf32>
    %134 = vector.shape_cast %133 : vector<1x16x512xf32> to vector<16x512xf32>
    %c0_67 = arith.constant 0 : index
    %c0_68 = arith.constant 0 : index
    %135 = vector.load %arg7[%c0_67, %c0_68] : memref<16x128xbf16, #tpu.memory_space<vmem>>, vector<16x128xbf16>
    %c0_69 = arith.constant 0 : index
    %c0_70 = arith.constant 0 : index
    %136 = vector.load %arg8[%c0_69, %c0_70] : memref<16x128xf32, #tpu.memory_space<vmem>>, vector<16x128xf32>
    %c0_71 = arith.constant 0 : index
    %c0_72 = arith.constant 0 : index
    %137 = vector.load %arg3[%c0_71, %c0_72] : memref<128x512xbf16, #tpu.memory_space<vmem>>, vector<128x512xbf16>
    %cst_73 = arith.constant dense<0.000000e+00> : vector<16x512xf32>
    %138 = tpu.matmul %135, %137, %cst_73 {dimension_numbers = #tpu.dot_dimension_numbers<[1], [0], [0], [1], [0, 0, 1, 1], [], []>} : vector<16x128xbf16>, vector<128x512xbf16>, vector<16x512xf32> -> vector<16x512xf32>
    %139 = arith.addf %134, %138 : vector<16x512xf32>
    %140 = vector.extract_strided_slice %139 {offsets = [0, 0], sizes = [16, 128], strides = [1, 1]} : vector<16x512xf32> to vector<16x128xf32>
    %141 = arith.negf %140 : vector<16x128xf32>
    %142 = math.exp %141 : vector<16x128xf32>
    %cst_74 = arith.constant 1.000000e+00 : f32
    %143 = vector.broadcast %cst_74 : f32 to vector<16x128xf32>
    %144 = arith.addf %143, %142 : vector<16x128xf32>
    %145 = arith.divf %143, %144 : vector<16x128xf32>
    %146 = vector.extract_strided_slice %139 {offsets = [0, 128], sizes = [16, 128], strides = [1, 1]} : vector<16x512xf32> to vector<16x128xf32>
    %147 = arith.negf %146 : vector<16x128xf32>
    %148 = math.exp %147 : vector<16x128xf32>
    %cst_75 = arith.constant 1.000000e+00 : f32
    %149 = vector.broadcast %cst_75 : f32 to vector<16x128xf32>
    %150 = arith.addf %149, %148 : vector<16x128xf32>
    %151 = arith.divf %149, %150 : vector<16x128xf32>
    %152 = vector.extract_strided_slice %139 {offsets = [0, 256], sizes = [16, 128], strides = [1, 1]} : vector<16x512xf32> to vector<16x128xf32>
    %153 = math.tanh %152 : vector<16x128xf32>
    %154 = vector.extract_strided_slice %139 {offsets = [0, 384], sizes = [16, 128], strides = [1, 1]} : vector<16x512xf32> to vector<16x128xf32>
    %155 = arith.negf %154 : vector<16x128xf32>
    %156 = math.exp %155 : vector<16x128xf32>
    %cst_76 = arith.constant 1.000000e+00 : f32
    %157 = vector.broadcast %cst_76 : f32 to vector<16x128xf32>
    %158 = arith.addf %157, %156 : vector<16x128xf32>
    %159 = arith.divf %157, %158 : vector<16x128xf32>
    %160 = arith.mulf %151, %136 : vector<16x128xf32>
    %161 = arith.mulf %145, %153 : vector<16x128xf32>
    %162 = arith.addf %160, %161 : vector<16x128xf32>
    %163 = math.tanh %162 : vector<16x128xf32>
    %164 = arith.mulf %159, %163 : vector<16x128xf32>
    %165 = arith.truncf %164 : vector<16x128xf32> to vector<16x128xbf16>
    %c0_77 = arith.constant 0 : index
    %c0_78 = arith.constant 0 : index
    %166 = vector.load %arg7[%c0_77, %c0_78] : memref<16x128xbf16, #tpu.memory_space<vmem>>, vector<16x128xbf16>
    tpu.vector_store %arg7[%c0_77, %c0_78], %165 {strides = array<i32>} : memref<16x128xbf16, #tpu.memory_space<vmem>>, vector<16x128xbf16>,
    %c0_79 = arith.constant 0 : index
    %c0_80 = arith.constant 0 : index
    %167 = vector.load %arg8[%c0_79, %c0_80] : memref<16x128xf32, #tpu.memory_space<vmem>>, vector<16x128xf32>
    tpu.vector_store %arg8[%c0_79, %c0_80], %162 {strides = array<i32>} : memref<16x128xf32, #tpu.memory_space<vmem>>, vector<16x128xf32>,
    %168 = arith.index_cast %c3_i32 : i32 to index
    %c0_81 = arith.constant 0 : index
    %c0_82 = arith.constant 0 : index
    %169 = vector.load %arg5[%168, %c0_81, %c0_82] : memref<8x16x128xbf16, #tpu.memory_space<vmem>>, vector<1x16x128xbf16>
    %170 = vector.shape_cast %169 : vector<1x16x128xbf16> to vector<16x128xbf16>
    %171 = vector.shape_cast %165 : vector<16x128xbf16> to vector<1x16x128xbf16>
    tpu.vector_store %arg5[%168, %c0_81, %c0_82], %171 {strides = array<i32>} : memref<8x16x128xbf16, #tpu.memory_space<vmem>>, vector<1x16x128xbf16>,
    %c4_i32 = arith.constant 4 : i32
    %172 = arith.index_cast %c4_i32 : i32 to index
    %c0_83 = arith.constant 0 : index
    %c0_84 = arith.constant 0 : index
    %173 = vector.load %arg6[%172, %c0_83, %c0_84] : memref<8x16x512xf32, #tpu.memory_space<vmem>>, vector<1x16x512xf32>
    %174 = vector.shape_cast %173 : vector<1x16x512xf32> to vector<16x512xf32>
    %c0_85 = arith.constant 0 : index
    %c0_86 = arith.constant 0 : index
    %175 = vector.load %arg7[%c0_85, %c0_86] : memref<16x128xbf16, #tpu.memory_space<vmem>>, vector<16x128xbf16>
    %c0_87 = arith.constant 0 : index
    %c0_88 = arith.constant 0 : index
    %176 = vector.load %arg8[%c0_87, %c0_88] : memref<16x128xf32, #tpu.memory_space<vmem>>, vector<16x128xf32>
    %c0_89 = arith.constant 0 : index
    %c0_90 = arith.constant 0 : index
    %177 = vector.load %arg3[%c0_89, %c0_90] : memref<128x512xbf16, #tpu.memory_space<vmem>>, vector<128x512xbf16>
    %cst_91 = arith.constant dense<0.000000e+00> : vector<16x512xf32>
    %178 = tpu.matmul %175, %177, %cst_91 {dimension_numbers = #tpu.dot_dimension_numbers<[1], [0], [0], [1], [0, 0, 1, 1], [], []>} : vector<16x128xbf16>, vector<128x512xbf16>, vector<16x512xf32> -> vector<16x512xf32>
    %179 = arith.addf %174, %178 : vector<16x512xf32>
    %180 = vector.extract_strided_slice %179 {offsets = [0, 0], sizes = [16, 128], strides = [1, 1]} : vector<16x512xf32> to vector<16x128xf32>
    %181 = arith.negf %180 : vector<16x128xf32>
    %182 = math.exp %181 : vector<16x128xf32>
    %cst_92 = arith.constant 1.000000e+00 : f32
    %183 = vector.broadcast %cst_92 : f32 to vector<16x128xf32>
    %184 = arith.addf %183, %182 : vector<16x128xf32>
    %185 = arith.divf %183, %184 : vector<16x128xf32>
    %186 = vector.extract_strided_slice %179 {offsets = [0, 128], sizes = [16, 128], strides = [1, 1]} : vector<16x512xf32> to vector<16x128xf32>
    %187 = arith.negf %186 : vector<16x128xf32>
    %188 = math.exp %187 : vector<16x128xf32>
    %cst_93 = arith.constant 1.000000e+00 : f32
    %189 = vector.broadcast %cst_93 : f32 to vector<16x128xf32>
    %190 = arith.addf %189, %188 : vector<16x128xf32>
    %191 = arith.divf %189, %190 : vector<16x128xf32>
    %192 = vector.extract_strided_slice %179 {offsets = [0, 256], sizes = [16, 128], strides = [1, 1]} : vector<16x512xf32> to vector<16x128xf32>
    %193 = math.tanh %192 : vector<16x128xf32>
    %194 = vector.extract_strided_slice %179 {offsets = [0, 384], sizes = [16, 128], strides = [1, 1]} : vector<16x512xf32> to vector<16x128xf32>
    %195 = arith.negf %194 : vector<16x128xf32>
    %196 = math.exp %195 : vector<16x128xf32>
    %cst_94 = arith.constant 1.000000e+00 : f32
    %197 = vector.broadcast %cst_94 : f32 to vector<16x128xf32>
    %198 = arith.addf %197, %196 : vector<16x128xf32>
    %199 = arith.divf %197, %198 : vector<16x128xf32>
    %200 = arith.mulf %191, %176 : vector<16x128xf32>
    %201 = arith.mulf %185, %193 : vector<16x128xf32>
    %202 = arith.addf %200, %201 : vector<16x128xf32>
    %203 = math.tanh %202 : vector<16x128xf32>
    %204 = arith.mulf %199, %203 : vector<16x128xf32>
    %205 = arith.truncf %204 : vector<16x128xf32> to vector<16x128xbf16>
    %c0_95 = arith.constant 0 : index
    %c0_96 = arith.constant 0 : index
    %206 = vector.load %arg7[%c0_95, %c0_96] : memref<16x128xbf16, #tpu.memory_space<vmem>>, vector<16x128xbf16>
    tpu.vector_store %arg7[%c0_95, %c0_96], %205 {strides = array<i32>} : memref<16x128xbf16, #tpu.memory_space<vmem>>, vector<16x128xbf16>,
    %c0_97 = arith.constant 0 : index
    %c0_98 = arith.constant 0 : index
    %207 = vector.load %arg8[%c0_97, %c0_98] : memref<16x128xf32, #tpu.memory_space<vmem>>, vector<16x128xf32>
    tpu.vector_store %arg8[%c0_97, %c0_98], %202 {strides = array<i32>} : memref<16x128xf32, #tpu.memory_space<vmem>>, vector<16x128xf32>,
    %208 = arith.index_cast %c4_i32 : i32 to index
    %c0_99 = arith.constant 0 : index
    %c0_100 = arith.constant 0 : index
    %209 = vector.load %arg5[%208, %c0_99, %c0_100] : memref<8x16x128xbf16, #tpu.memory_space<vmem>>, vector<1x16x128xbf16>
    %210 = vector.shape_cast %209 : vector<1x16x128xbf16> to vector<16x128xbf16>
    %211 = vector.shape_cast %205 : vector<16x128xbf16> to vector<1x16x128xbf16>
    tpu.vector_store %arg5[%208, %c0_99, %c0_100], %211 {strides = array<i32>} : memref<8x16x128xbf16, #tpu.memory_space<vmem>>, vector<1x16x128xbf16>,
    %c5_i32 = arith.constant 5 : i32
    %212 = arith.index_cast %c5_i32 : i32 to index
    %c0_101 = arith.constant 0 : index
    %c0_102 = arith.constant 0 : index
    %213 = vector.load %arg6[%212, %c0_101, %c0_102] : memref<8x16x512xf32, #tpu.memory_space<vmem>>, vector<1x16x512xf32>
    %214 = vector.shape_cast %213 : vector<1x16x512xf32> to vector<16x512xf32>
    %c0_103 = arith.constant 0 : index
    %c0_104 = arith.constant 0 : index
    %215 = vector.load %arg7[%c0_103, %c0_104] : memref<16x128xbf16, #tpu.memory_space<vmem>>, vector<16x128xbf16>
    %c0_105 = arith.constant 0 : index
    %c0_106 = arith.constant 0 : index
    %216 = vector.load %arg8[%c0_105, %c0_106] : memref<16x128xf32, #tpu.memory_space<vmem>>, vector<16x128xf32>
    %c0_107 = arith.constant 0 : index
    %c0_108 = arith.constant 0 : index
    %217 = vector.load %arg3[%c0_107, %c0_108] : memref<128x512xbf16, #tpu.memory_space<vmem>>, vector<128x512xbf16>
    %cst_109 = arith.constant dense<0.000000e+00> : vector<16x512xf32>
    %218 = tpu.matmul %215, %217, %cst_109 {dimension_numbers = #tpu.dot_dimension_numbers<[1], [0], [0], [1], [0, 0, 1, 1], [], []>} : vector<16x128xbf16>, vector<128x512xbf16>, vector<16x512xf32> -> vector<16x512xf32>
    %219 = arith.addf %214, %218 : vector<16x512xf32>
    %220 = vector.extract_strided_slice %219 {offsets = [0, 0], sizes = [16, 128], strides = [1, 1]} : vector<16x512xf32> to vector<16x128xf32>
    %221 = arith.negf %220 : vector<16x128xf32>
    %222 = math.exp %221 : vector<16x128xf32>
    %cst_110 = arith.constant 1.000000e+00 : f32
    %223 = vector.broadcast %cst_110 : f32 to vector<16x128xf32>
    %224 = arith.addf %223, %222 : vector<16x128xf32>
    %225 = arith.divf %223, %224 : vector<16x128xf32>
    %226 = vector.extract_strided_slice %219 {offsets = [0, 128], sizes = [16, 128], strides = [1, 1]} : vector<16x512xf32> to vector<16x128xf32>
    %227 = arith.negf %226 : vector<16x128xf32>
    %228 = math.exp %227 : vector<16x128xf32>
    %cst_111 = arith.constant 1.000000e+00 : f32
    %229 = vector.broadcast %cst_111 : f32 to vector<16x128xf32>
    %230 = arith.addf %229, %228 : vector<16x128xf32>
    %231 = arith.divf %229, %230 : vector<16x128xf32>
    %232 = vector.extract_strided_slice %219 {offsets = [0, 256], sizes = [16, 128], strides = [1, 1]} : vector<16x512xf32> to vector<16x128xf32>
    %233 = math.tanh %232 : vector<16x128xf32>
    %234 = vector.extract_strided_slice %219 {offsets = [0, 384], sizes = [16, 128], strides = [1, 1]} : vector<16x512xf32> to vector<16x128xf32>
    %235 = arith.negf %234 : vector<16x128xf32>
    %236 = math.exp %235 : vector<16x128xf32>
    %cst_112 = arith.constant 1.000000e+00 : f32
    %237 = vector.broadcast %cst_112 : f32 to vector<16x128xf32>
    %238 = arith.addf %237, %236 : vector<16x128xf32>
    %239 = arith.divf %237, %238 : vector<16x128xf32>
    %240 = arith.mulf %231, %216 : vector<16x128xf32>
    %241 = arith.mulf %225, %233 : vector<16x128xf32>
    %242 = arith.addf %240, %241 : vector<16x128xf32>
    %243 = math.tanh %242 : vector<16x128xf32>
    %244 = arith.mulf %239, %243 : vector<16x128xf32>
    %245 = arith.truncf %244 : vector<16x128xf32> to vector<16x128xbf16>
    %c0_113 = arith.constant 0 : index
    %c0_114 = arith.constant 0 : index
    %246 = vector.load %arg7[%c0_113, %c0_114] : memref<16x128xbf16, #tpu.memory_space<vmem>>, vector<16x128xbf16>
    tpu.vector_store %arg7[%c0_113, %c0_114], %245 {strides = array<i32>} : memref<16x128xbf16, #tpu.memory_space<vmem>>, vector<16x128xbf16>,
    %c0_115 = arith.constant 0 : index
    %c0_116 = arith.constant 0 : index
    %247 = vector.load %arg8[%c0_115, %c0_116] : memref<16x128xf32, #tpu.memory_space<vmem>>, vector<16x128xf32>
    tpu.vector_store %arg8[%c0_115, %c0_116], %242 {strides = array<i32>} : memref<16x128xf32, #tpu.memory_space<vmem>>, vector<16x128xf32>,
    %248 = arith.index_cast %c5_i32 : i32 to index
    %c0_117 = arith.constant 0 : index
    %c0_118 = arith.constant 0 : index
    %249 = vector.load %arg5[%248, %c0_117, %c0_118] : memref<8x16x128xbf16, #tpu.memory_space<vmem>>, vector<1x16x128xbf16>
    %250 = vector.shape_cast %249 : vector<1x16x128xbf16> to vector<16x128xbf16>
    %251 = vector.shape_cast %245 : vector<16x128xbf16> to vector<1x16x128xbf16>
    tpu.vector_store %arg5[%248, %c0_117, %c0_118], %251 {strides = array<i32>} : memref<8x16x128xbf16, #tpu.memory_space<vmem>>, vector<1x16x128xbf16>,
    %c6_i32 = arith.constant 6 : i32
    %252 = arith.index_cast %c6_i32 : i32 to index
    %c0_119 = arith.constant 0 : index
    %c0_120 = arith.constant 0 : index
    %253 = vector.load %arg6[%252, %c0_119, %c0_120] : memref<8x16x512xf32, #tpu.memory_space<vmem>>, vector<1x16x512xf32>
    %254 = vector.shape_cast %253 : vector<1x16x512xf32> to vector<16x512xf32>
    %c0_121 = arith.constant 0 : index
    %c0_122 = arith.constant 0 : index
    %255 = vector.load %arg7[%c0_121, %c0_122] : memref<16x128xbf16, #tpu.memory_space<vmem>>, vector<16x128xbf16>
    %c0_123 = arith.constant 0 : index
    %c0_124 = arith.constant 0 : index
    %256 = vector.load %arg8[%c0_123, %c0_124] : memref<16x128xf32, #tpu.memory_space<vmem>>, vector<16x128xf32>
    %c0_125 = arith.constant 0 : index
    %c0_126 = arith.constant 0 : index
    %257 = vector.load %arg3[%c0_125, %c0_126] : memref<128x512xbf16, #tpu.memory_space<vmem>>, vector<128x512xbf16>
    %cst_127 = arith.constant dense<0.000000e+00> : vector<16x512xf32>
    %258 = tpu.matmul %255, %257, %cst_127 {dimension_numbers = #tpu.dot_dimension_numbers<[1], [0], [0], [1], [0, 0, 1, 1], [], []>} : vector<16x128xbf16>, vector<128x512xbf16>, vector<16x512xf32> -> vector<16x512xf32>
    %259 = arith.addf %254, %258 : vector<16x512xf32>
    %260 = vector.extract_strided_slice %259 {offsets = [0, 0], sizes = [16, 128], strides = [1, 1]} : vector<16x512xf32> to vector<16x128xf32>
    %261 = arith.negf %260 : vector<16x128xf32>
    %262 = math.exp %261 : vector<16x128xf32>
    %cst_128 = arith.constant 1.000000e+00 : f32
    %263 = vector.broadcast %cst_128 : f32 to vector<16x128xf32>
    %264 = arith.addf %263, %262 : vector<16x128xf32>
    %265 = arith.divf %263, %264 : vector<16x128xf32>
    %266 = vector.extract_strided_slice %259 {offsets = [0, 128], sizes = [16, 128], strides = [1, 1]} : vector<16x512xf32> to vector<16x128xf32>
    %267 = arith.negf %266 : vector<16x128xf32>
    %268 = math.exp %267 : vector<16x128xf32>
    %cst_129 = arith.constant 1.000000e+00 : f32
    %269 = vector.broadcast %cst_129 : f32 to vector<16x128xf32>
    %270 = arith.addf %269, %268 : vector<16x128xf32>
    %271 = arith.divf %269, %270 : vector<16x128xf32>
    %272 = vector.extract_strided_slice %259 {offsets = [0, 256], sizes = [16, 128], strides = [1, 1]} : vector<16x512xf32> to vector<16x128xf32>
    %273 = math.tanh %272 : vector<16x128xf32>
    %274 = vector.extract_strided_slice %259 {offsets = [0, 384], sizes = [16, 128], strides = [1, 1]} : vector<16x512xf32> to vector<16x128xf32>
    %275 = arith.negf %274 : vector<16x128xf32>
    %276 = math.exp %275 : vector<16x128xf32>
    %cst_130 = arith.constant 1.000000e+00 : f32
    %277 = vector.broadcast %cst_130 : f32 to vector<16x128xf32>
    %278 = arith.addf %277, %276 : vector<16x128xf32>
    %279 = arith.divf %277, %278 : vector<16x128xf32>
    %280 = arith.mulf %271, %256 : vector<16x128xf32>
    %281 = arith.mulf %265, %273 : vector<16x128xf32>
    %282 = arith.addf %280, %281 : vector<16x128xf32>
    %283 = math.tanh %282 : vector<16x128xf32>
    %284 = arith.mulf %279, %283 : vector<16x128xf32>
    %285 = arith.truncf %284 : vector<16x128xf32> to vector<16x128xbf16>
    %c0_131 = arith.constant 0 : index
    %c0_132 = arith.constant 0 : index
    %286 = vector.load %arg7[%c0_131, %c0_132] : memref<16x128xbf16, #tpu.memory_space<vmem>>, vector<16x128xbf16>
    tpu.vector_store %arg7[%c0_131, %c0_132], %285 {strides = array<i32>} : memref<16x128xbf16, #tpu.memory_space<vmem>>, vector<16x128xbf16>,
    %c0_133 = arith.constant 0 : index
    %c0_134 = arith.constant 0 : index
    %287 = vector.load %arg8[%c0_133, %c0_134] : memref<16x128xf32, #tpu.memory_space<vmem>>, vector<16x128xf32>
    tpu.vector_store %arg8[%c0_133, %c0_134], %282 {strides = array<i32>} : memref<16x128xf32, #tpu.memory_space<vmem>>, vector<16x128xf32>,
    %288 = arith.index_cast %c6_i32 : i32 to index
    %c0_135 = arith.constant 0 : index
    %c0_136 = arith.constant 0 : index
    %289 = vector.load %arg5[%288, %c0_135, %c0_136] : memref<8x16x128xbf16, #tpu.memory_space<vmem>>, vector<1x16x128xbf16>
    %290 = vector.shape_cast %289 : vector<1x16x128xbf16> to vector<16x128xbf16>
    %291 = vector.shape_cast %285 : vector<16x128xbf16> to vector<1x16x128xbf16>
    tpu.vector_store %arg5[%288, %c0_135, %c0_136], %291 {strides = array<i32>} : memref<8x16x128xbf16, #tpu.memory_space<vmem>>, vector<1x16x128xbf16>,
    %c7_i32 = arith.constant 7 : i32
    %292 = arith.index_cast %c7_i32 : i32 to index
    %c0_137 = arith.constant 0 : index
    %c0_138 = arith.constant 0 : index
    %293 = vector.load %arg6[%292, %c0_137, %c0_138] : memref<8x16x512xf32, #tpu.memory_space<vmem>>, vector<1x16x512xf32>
    %294 = vector.shape_cast %293 : vector<1x16x512xf32> to vector<16x512xf32>
    %c0_139 = arith.constant 0 : index
    %c0_140 = arith.constant 0 : index
    %295 = vector.load %arg7[%c0_139, %c0_140] : memref<16x128xbf16, #tpu.memory_space<vmem>>, vector<16x128xbf16>
    %c0_141 = arith.constant 0 : index
    %c0_142 = arith.constant 0 : index
    %296 = vector.load %arg8[%c0_141, %c0_142] : memref<16x128xf32, #tpu.memory_space<vmem>>, vector<16x128xf32>
    %c0_143 = arith.constant 0 : index
    %c0_144 = arith.constant 0 : index
    %297 = vector.load %arg3[%c0_143, %c0_144] : memref<128x512xbf16, #tpu.memory_space<vmem>>, vector<128x512xbf16>
    %cst_145 = arith.constant dense<0.000000e+00> : vector<16x512xf32>
    %298 = tpu.matmul %295, %297, %cst_145 {dimension_numbers = #tpu.dot_dimension_numbers<[1], [0], [0], [1], [0, 0, 1, 1], [], []>} : vector<16x128xbf16>, vector<128x512xbf16>, vector<16x512xf32> -> vector<16x512xf32>
    %299 = arith.addf %294, %298 : vector<16x512xf32>
    %300 = vector.extract_strided_slice %299 {offsets = [0, 0], sizes = [16, 128], strides = [1, 1]} : vector<16x512xf32> to vector<16x128xf32>
    %301 = arith.negf %300 : vector<16x128xf32>
    %302 = math.exp %301 : vector<16x128xf32>
    %cst_146 = arith.constant 1.000000e+00 : f32
    %303 = vector.broadcast %cst_146 : f32 to vector<16x128xf32>
    %304 = arith.addf %303, %302 : vector<16x128xf32>
    %305 = arith.divf %303, %304 : vector<16x128xf32>
    %306 = vector.extract_strided_slice %299 {offsets = [0, 128], sizes = [16, 128], strides = [1, 1]} : vector<16x512xf32> to vector<16x128xf32>
    %307 = arith.negf %306 : vector<16x128xf32>
    %308 = math.exp %307 : vector<16x128xf32>
    %cst_147 = arith.constant 1.000000e+00 : f32
    %309 = vector.broadcast %cst_147 : f32 to vector<16x128xf32>
    %310 = arith.addf %309, %308 : vector<16x128xf32>
    %311 = arith.divf %309, %310 : vector<16x128xf32>
    %312 = vector.extract_strided_slice %299 {offsets = [0, 256], sizes = [16, 128], strides = [1, 1]} : vector<16x512xf32> to vector<16x128xf32>
    %313 = math.tanh %312 : vector<16x128xf32>
    %314 = vector.extract_strided_slice %299 {offsets = [0, 384], sizes = [16, 128], strides = [1, 1]} : vector<16x512xf32> to vector<16x128xf32>
    %315 = arith.negf %314 : vector<16x128xf32>
    %316 = math.exp %315 : vector<16x128xf32>
    %cst_148 = arith.constant 1.000000e+00 : f32
    %317 = vector.broadcast %cst_148 : f32 to vector<16x128xf32>
    %318 = arith.addf %317, %316 : vector<16x128xf32>
    %319 = arith.divf %317, %318 : vector<16x128xf32>
    %320 = arith.mulf %311, %296 : vector<16x128xf32>
    %321 = arith.mulf %305, %313 : vector<16x128xf32>
    %322 = arith.addf %320, %321 : vector<16x128xf32>
    %323 = math.tanh %322 : vector<16x128xf32>
    %324 = arith.mulf %319, %323 : vector<16x128xf32>
    %325 = arith.truncf %324 : vector<16x128xf32> to vector<16x128xbf16>
    %c0_149 = arith.constant 0 : index
    %c0_150 = arith.constant 0 : index
    %326 = vector.load %arg7[%c0_149, %c0_150] : memref<16x128xbf16, #tpu.memory_space<vmem>>, vector<16x128xbf16>
    tpu.vector_store %arg7[%c0_149, %c0_150], %325 {strides = array<i32>} : memref<16x128xbf16, #tpu.memory_space<vmem>>, vector<16x128xbf16>,
    %c0_151 = arith.constant 0 : index
    %c0_152 = arith.constant 0 : index
    %327 = vector.load %arg8[%c0_151, %c0_152] : memref<16x128xf32, #tpu.memory_space<vmem>>, vector<16x128xf32>
    tpu.vector_store %arg8[%c0_151, %c0_152], %322 {strides = array<i32>} : memref<16x128xf32, #tpu.memory_space<vmem>>, vector<16x128xf32>,
    %328 = arith.index_cast %c7_i32 : i32 to index
    %c0_153 = arith.constant 0 : index
    %c0_154 = arith.constant 0 : index
    %329 = vector.load %arg5[%328, %c0_153, %c0_154] : memref<8x16x128xbf16, #tpu.memory_space<vmem>>, vector<1x16x128xbf16>
    %330 = vector.shape_cast %329 : vector<1x16x128xbf16> to vector<16x128xbf16>
    %331 = vector.shape_cast %325 : vector<16x128xbf16> to vector<1x16x128xbf16>
    tpu.vector_store %arg5[%328, %c0_153, %c0_154], %331 {strides = array<i32>} : memref<8x16x128xbf16, #tpu.memory_space<vmem>>, vector<1x16x128xbf16>,
    %c8_i32 = arith.constant 8 : i32
    return
  }
  func.func @transform_0(%arg0: i32) -> (i32, i32, i32) {
    %c0_i32 = arith.constant 0 : i32
    %c0_i32_0 = arith.constant 0 : i32
    %c0_i32_1 = arith.constant 0 : i32
    return %arg0, %c0_i32, %c0_i32_0 : i32, i32, i32
  }
  func.func @transform_1(%arg0: i32) -> (i32, i32) {
    %c0_i32 = arith.constant 0 : i32
    %c0_i32_0 = arith.constant 0 : i32
    %c0_i32_1 = arith.constant 0 : i32
    return %c0_i32, %c0_i32_0 : i32, i32
  }
  func.func @transform_2(%arg0: i32) -> (i32, i32) {
    %c0_i32 = arith.constant 0 : i32
    %c0_i32_0 = arith.constant 0 : i32
    %c0_i32_1 = arith.constant 0 : i32
    return %c0_i32, %c0_i32_0 : i32, i32
  }
  func.func @transform_3(%arg0: i32) -> (i32, i32) {
    %c0_i32 = arith.constant 0 : i32
    %c0_i32_0 = arith.constant 0 : i32
    %c0_i32_1 = arith.constant 0 : i32
    return %c0_i32, %c0_i32_0 : i32, i32
  }
  func.func @transform_4(%arg0: i32) -> (i32, i32, i32) {
    %c0_i32 = arith.constant 0 : i32
    %c0_i32_0 = arith.constant 0 : i32
    %c0_i32_1 = arith.constant 0 : i32
    return %arg0, %c0_i32, %c0_i32_0 : i32, i32, i32
  }
}

module attributes {stable_mosaic.version = 11 : i64} {
  func.func @kernel(%arg0: i32, %arg1: memref<8x16x128xbf16, #tpu.memory_space<vmem>>, %arg2: memref<128x512xbf16, #tpu.memory_space<vmem>>, %arg3: memref<128x512xbf16, #tpu.memory_space<vmem>>, %arg4: memref<1x512xf32, #tpu.memory_space<vmem>>, %arg5: memref<1x128xf32, #tpu.memory_space<vmem>>, %arg6: memref<1x128xf32, #tpu.memory_space<vmem>>, %arg7: memref<128x128xbf16, #tpu.memory_space<vmem>>, %arg8: memref<1x128xf32, #tpu.memory_space<vmem>>, %arg9: memref<16x128xf32, #tpu.memory_space<vmem>>, %arg10: memref<8x16x512xf32, #tpu.memory_space<vmem>>, %arg11: memref<16x128xbf16, #tpu.memory_space<vmem>>, %arg12: memref<16x128xf32, #tpu.memory_space<vmem>>, %arg13: memref<16x128xf32, #tpu.memory_space<vmem>>) attributes {dimension_semantics = [#tpu.dimension_semantics<arbitrary>], iteration_bounds = array<i64: 1>, scalar_prefetch = 0 : i64, scratch_operands = 4 : i64, tpu.core_type = #tpu.core_type<tc>, window_params = [{transform_indices = @transform_0, window_bounds = array<i64: 8, 16, 128>}, {pipeline_mode = #tpu.pipeline_mode<synchronous>, transform_indices = @transform_1, window_bounds = array<i64: 128, 512>}, {pipeline_mode = #tpu.pipeline_mode<synchronous>, transform_indices = @transform_2, window_bounds = array<i64: 128, 512>}, {pipeline_mode = #tpu.pipeline_mode<synchronous>, transform_indices = @transform_3, window_bounds = array<i64: 1, 512>}, {pipeline_mode = #tpu.pipeline_mode<synchronous>, transform_indices = @transform_4, window_bounds = array<i64: 1, 128>}, {pipeline_mode = #tpu.pipeline_mode<synchronous>, transform_indices = @transform_5, window_bounds = array<i64: 1, 128>}, {pipeline_mode = #tpu.pipeline_mode<synchronous>, transform_indices = @transform_6, window_bounds = array<i64: 128, 128>}, {pipeline_mode = #tpu.pipeline_mode<synchronous>, transform_indices = @transform_7, window_bounds = array<i64: 1, 128>}, {pipeline_mode = #tpu.pipeline_mode<synchronous>, transform_indices = @transform_8, window_bounds = array<i64: 16, 128>}]} {
    %c0_i32 = arith.constant 0 : i32
    %0 = arith.cmpi eq, %arg0, %c0_i32 : i32
    %1 = arith.extui %0 : i1 to i32
    %c0_i32_0 = arith.constant 0 : i32
    %2 = arith.cmpi ne, %1, %c0_i32_0 : i32
    scf.if %2 {
      %cst_157 = arith.constant 0.000000e+00 : bf16
      %311 = vector.broadcast %cst_157 : bf16 to vector<16x128xbf16>
      %c0_158 = arith.constant 0 : index
      %c0_159 = arith.constant 0 : index
      %312 = vector.load %arg11[%c0_158, %c0_159] : memref<16x128xbf16, #tpu.memory_space<vmem>>, vector<16x128xbf16>
      tpu.vector_store %arg11[%c0_158, %c0_159], %311 {strides = array<i32>} : memref<16x128xbf16, #tpu.memory_space<vmem>>, vector<16x128xbf16>,
      %cst_160 = arith.constant 0.000000e+00 : f32
      %313 = vector.broadcast %cst_160 : f32 to vector<16x128xf32>
      %c0_161 = arith.constant 0 : index
      %c0_162 = arith.constant 0 : index
      %314 = vector.load %arg12[%c0_161, %c0_162] : memref<16x128xf32, #tpu.memory_space<vmem>>, vector<16x128xf32>
      tpu.vector_store %arg12[%c0_161, %c0_162], %313 {strides = array<i32>} : memref<16x128xf32, #tpu.memory_space<vmem>>, vector<16x128xf32>,
      %cst_163 = arith.constant 0.000000e+00 : f32
      %315 = vector.broadcast %cst_163 : f32 to vector<16x128xf32>
      %c0_164 = arith.constant 0 : index
      %c0_165 = arith.constant 0 : index
      %316 = vector.load %arg13[%c0_164, %c0_165] : memref<16x128xf32, #tpu.memory_space<vmem>>, vector<16x128xf32>
      tpu.vector_store %arg13[%c0_164, %c0_165], %315 {strides = array<i32>} : memref<16x128xf32, #tpu.memory_space<vmem>>, vector<16x128xf32>,
      %cst_166 = arith.constant 0.000000e+00 : f32
      %317 = vector.broadcast %cst_166 : f32 to vector<16x128xf32>
      %c0_167 = arith.constant 0 : index
      %c0_168 = arith.constant 0 : index
      %318 = vector.load %arg9[%c0_167, %c0_168] : memref<16x128xf32, #tpu.memory_space<vmem>>, vector<16x128xf32>
      tpu.vector_store %arg9[%c0_167, %c0_168], %317 {strides = array<i32>} : memref<16x128xf32, #tpu.memory_space<vmem>>, vector<16x128xf32>,
    } else {
    }
    %c0 = arith.constant 0 : index
    %c0_1 = arith.constant 0 : index
    %c0_2 = arith.constant 0 : index
    %3 = vector.load %arg1[%c0, %c0_1, %c0_2] : memref<8x16x128xbf16, #tpu.memory_space<vmem>>, vector<8x16x128xbf16>
    %4 = vector.shape_cast %3 : vector<8x16x128xbf16> to vector<128x128xbf16>
    %c0_3 = arith.constant 0 : index
    %c0_4 = arith.constant 0 : index
    %5 = vector.load %arg2[%c0_3, %c0_4] : memref<128x512xbf16, #tpu.memory_space<vmem>>, vector<128x512xbf16>
    %cst = arith.constant dense<0.000000e+00> : vector<128x512xf32>
    %6 = tpu.matmul %4, %5, %cst {dimension_numbers = #tpu.dot_dimension_numbers<[1], [0], [0], [1], [0, 0, 1, 1], [], []>} : vector<128x128xbf16>, vector<128x512xbf16>, vector<128x512xf32> -> vector<128x512xf32>
    %c0_5 = arith.constant 0 : index
    %c0_6 = arith.constant 0 : index
    %7 = vector.load %arg4[%c0_5, %c0_6] : memref<1x512xf32, #tpu.memory_space<vmem>>, vector<1x512xf32>
    %8 = vector.broadcast %7 : vector<1x512xf32> to vector<128x512xf32>
    %9 = arith.addf %6, %8 : vector<128x512xf32>
    %10 = vector.shape_cast %9 : vector<128x512xf32> to vector<8x16x512xf32>
    %c0_7 = arith.constant 0 : index
    %c0_8 = arith.constant 0 : index
    %c0_9 = arith.constant 0 : index
    %11 = vector.load %arg10[%c0_7, %c0_8, %c0_9] : memref<8x16x512xf32, #tpu.memory_space<vmem>>, vector<8x16x512xf32>
    tpu.vector_store %arg10[%c0_7, %c0_8, %c0_9], %10 {strides = array<i32>} : memref<8x16x512xf32, #tpu.memory_space<vmem>>, vector<8x16x512xf32>,
    %c0_i32_10 = arith.constant 0 : i32
    %12 = arith.index_cast %c0_i32_10 : i32 to index
    %c0_11 = arith.constant 0 : index
    %c0_12 = arith.constant 0 : index
    %13 = vector.load %arg10[%12, %c0_11, %c0_12] : memref<8x16x512xf32, #tpu.memory_space<vmem>>, vector<1x16x512xf32>
    %14 = vector.shape_cast %13 : vector<1x16x512xf32> to vector<16x512xf32>
    %c0_13 = arith.constant 0 : index
    %c0_14 = arith.constant 0 : index
    %15 = vector.load %arg11[%c0_13, %c0_14] : memref<16x128xbf16, #tpu.memory_space<vmem>>, vector<16x128xbf16>
    %c0_15 = arith.constant 0 : index
    %c0_16 = arith.constant 0 : index
    %16 = vector.load %arg12[%c0_15, %c0_16] : memref<16x128xf32, #tpu.memory_space<vmem>>, vector<16x128xf32>
    %c0_17 = arith.constant 0 : index
    %c0_18 = arith.constant 0 : index
    %17 = vector.load %arg3[%c0_17, %c0_18] : memref<128x512xbf16, #tpu.memory_space<vmem>>, vector<128x512xbf16>
    %cst_19 = arith.constant dense<0.000000e+00> : vector<16x512xf32>
    %18 = tpu.matmul %15, %17, %cst_19 {dimension_numbers = #tpu.dot_dimension_numbers<[1], [0], [0], [1], [0, 0, 1, 1], [], []>} : vector<16x128xbf16>, vector<128x512xbf16>, vector<16x512xf32> -> vector<16x512xf32>
    %19 = arith.addf %14, %18 : vector<16x512xf32>
    %20 = vector.extract_strided_slice %19 {offsets = [0, 0], sizes = [16, 128], strides = [1, 1]} : vector<16x512xf32> to vector<16x128xf32>
    %21 = arith.negf %20 : vector<16x128xf32>
    %22 = math.exp %21 : vector<16x128xf32>
    %cst_20 = arith.constant 1.000000e+00 : f32
    %23 = vector.broadcast %cst_20 : f32 to vector<16x128xf32>
    %24 = arith.addf %23, %22 : vector<16x128xf32>
    %25 = arith.divf %23, %24 : vector<16x128xf32>
    %26 = vector.extract_strided_slice %19 {offsets = [0, 128], sizes = [16, 128], strides = [1, 1]} : vector<16x512xf32> to vector<16x128xf32>
    %27 = arith.negf %26 : vector<16x128xf32>
    %28 = math.exp %27 : vector<16x128xf32>
    %cst_21 = arith.constant 1.000000e+00 : f32
    %29 = vector.broadcast %cst_21 : f32 to vector<16x128xf32>
    %30 = arith.addf %29, %28 : vector<16x128xf32>
    %31 = arith.divf %29, %30 : vector<16x128xf32>
    %32 = vector.extract_strided_slice %19 {offsets = [0, 256], sizes = [16, 128], strides = [1, 1]} : vector<16x512xf32> to vector<16x128xf32>
    %33 = math.tanh %32 : vector<16x128xf32>
    %34 = vector.extract_strided_slice %19 {offsets = [0, 384], sizes = [16, 128], strides = [1, 1]} : vector<16x512xf32> to vector<16x128xf32>
    %35 = arith.negf %34 : vector<16x128xf32>
    %36 = math.exp %35 : vector<16x128xf32>
    %cst_22 = arith.constant 1.000000e+00 : f32
    %37 = vector.broadcast %cst_22 : f32 to vector<16x128xf32>
    %38 = arith.addf %37, %36 : vector<16x128xf32>
    %39 = arith.divf %37, %38 : vector<16x128xf32>
    %40 = arith.mulf %31, %16 : vector<16x128xf32>
    %41 = arith.mulf %25, %33 : vector<16x128xf32>
    %42 = arith.addf %40, %41 : vector<16x128xf32>
    %43 = math.tanh %42 : vector<16x128xf32>
    %44 = arith.mulf %39, %43 : vector<16x128xf32>
    %45 = arith.truncf %44 : vector<16x128xf32> to vector<16x128xbf16>
    %c0_23 = arith.constant 0 : index
    %c0_24 = arith.constant 0 : index
    %46 = vector.load %arg11[%c0_23, %c0_24] : memref<16x128xbf16, #tpu.memory_space<vmem>>, vector<16x128xbf16>
    tpu.vector_store %arg11[%c0_23, %c0_24], %45 {strides = array<i32>} : memref<16x128xbf16, #tpu.memory_space<vmem>>, vector<16x128xbf16>,
    %c0_25 = arith.constant 0 : index
    %c0_26 = arith.constant 0 : index
    %47 = vector.load %arg12[%c0_25, %c0_26] : memref<16x128xf32, #tpu.memory_space<vmem>>, vector<16x128xf32>
    tpu.vector_store %arg12[%c0_25, %c0_26], %42 {strides = array<i32>} : memref<16x128xf32, #tpu.memory_space<vmem>>, vector<16x128xf32>,
    %c0_27 = arith.constant 0 : index
    %c0_28 = arith.constant 0 : index
    %48 = vector.load %arg13[%c0_27, %c0_28] : memref<16x128xf32, #tpu.memory_space<vmem>>, vector<16x128xf32>
    tpu.vector_store %arg13[%c0_27, %c0_28], %44 {strides = array<i32>} : memref<16x128xf32, #tpu.memory_space<vmem>>, vector<16x128xf32>,
    %c1_i32 = arith.constant 1 : i32
    %49 = arith.index_cast %c1_i32 : i32 to index
    %c0_29 = arith.constant 0 : index
    %c0_30 = arith.constant 0 : index
    %50 = vector.load %arg10[%49, %c0_29, %c0_30] : memref<8x16x512xf32, #tpu.memory_space<vmem>>, vector<1x16x512xf32>
    %51 = vector.shape_cast %50 : vector<1x16x512xf32> to vector<16x512xf32>
    %c0_31 = arith.constant 0 : index
    %c0_32 = arith.constant 0 : index
    %52 = vector.load %arg11[%c0_31, %c0_32] : memref<16x128xbf16, #tpu.memory_space<vmem>>, vector<16x128xbf16>
    %c0_33 = arith.constant 0 : index
    %c0_34 = arith.constant 0 : index
    %53 = vector.load %arg12[%c0_33, %c0_34] : memref<16x128xf32, #tpu.memory_space<vmem>>, vector<16x128xf32>
    %c0_35 = arith.constant 0 : index
    %c0_36 = arith.constant 0 : index
    %54 = vector.load %arg3[%c0_35, %c0_36] : memref<128x512xbf16, #tpu.memory_space<vmem>>, vector<128x512xbf16>
    %cst_37 = arith.constant dense<0.000000e+00> : vector<16x512xf32>
    %55 = tpu.matmul %52, %54, %cst_37 {dimension_numbers = #tpu.dot_dimension_numbers<[1], [0], [0], [1], [0, 0, 1, 1], [], []>} : vector<16x128xbf16>, vector<128x512xbf16>, vector<16x512xf32> -> vector<16x512xf32>
    %56 = arith.addf %51, %55 : vector<16x512xf32>
    %57 = vector.extract_strided_slice %56 {offsets = [0, 0], sizes = [16, 128], strides = [1, 1]} : vector<16x512xf32> to vector<16x128xf32>
    %58 = arith.negf %57 : vector<16x128xf32>
    %59 = math.exp %58 : vector<16x128xf32>
    %cst_38 = arith.constant 1.000000e+00 : f32
    %60 = vector.broadcast %cst_38 : f32 to vector<16x128xf32>
    %61 = arith.addf %60, %59 : vector<16x128xf32>
    %62 = arith.divf %60, %61 : vector<16x128xf32>
    %63 = vector.extract_strided_slice %56 {offsets = [0, 128], sizes = [16, 128], strides = [1, 1]} : vector<16x512xf32> to vector<16x128xf32>
    %64 = arith.negf %63 : vector<16x128xf32>
    %65 = math.exp %64 : vector<16x128xf32>
    %cst_39 = arith.constant 1.000000e+00 : f32
    %66 = vector.broadcast %cst_39 : f32 to vector<16x128xf32>
    %67 = arith.addf %66, %65 : vector<16x128xf32>
    %68 = arith.divf %66, %67 : vector<16x128xf32>
    %69 = vector.extract_strided_slice %56 {offsets = [0, 256], sizes = [16, 128], strides = [1, 1]} : vector<16x512xf32> to vector<16x128xf32>
    %70 = math.tanh %69 : vector<16x128xf32>
    %71 = vector.extract_strided_slice %56 {offsets = [0, 384], sizes = [16, 128], strides = [1, 1]} : vector<16x512xf32> to vector<16x128xf32>
    %72 = arith.negf %71 : vector<16x128xf32>
    %73 = math.exp %72 : vector<16x128xf32>
    %cst_40 = arith.constant 1.000000e+00 : f32
    %74 = vector.broadcast %cst_40 : f32 to vector<16x128xf32>
    %75 = arith.addf %74, %73 : vector<16x128xf32>
    %76 = arith.divf %74, %75 : vector<16x128xf32>
    %77 = arith.mulf %68, %53 : vector<16x128xf32>
    %78 = arith.mulf %62, %70 : vector<16x128xf32>
    %79 = arith.addf %77, %78 : vector<16x128xf32>
    %80 = math.tanh %79 : vector<16x128xf32>
    %81 = arith.mulf %76, %80 : vector<16x128xf32>
    %82 = arith.truncf %81 : vector<16x128xf32> to vector<16x128xbf16>
    %c0_41 = arith.constant 0 : index
    %c0_42 = arith.constant 0 : index
    %83 = vector.load %arg11[%c0_41, %c0_42] : memref<16x128xbf16, #tpu.memory_space<vmem>>, vector<16x128xbf16>
    tpu.vector_store %arg11[%c0_41, %c0_42], %82 {strides = array<i32>} : memref<16x128xbf16, #tpu.memory_space<vmem>>, vector<16x128xbf16>,
    %c0_43 = arith.constant 0 : index
    %c0_44 = arith.constant 0 : index
    %84 = vector.load %arg12[%c0_43, %c0_44] : memref<16x128xf32, #tpu.memory_space<vmem>>, vector<16x128xf32>
    tpu.vector_store %arg12[%c0_43, %c0_44], %79 {strides = array<i32>} : memref<16x128xf32, #tpu.memory_space<vmem>>, vector<16x128xf32>,
    %c0_45 = arith.constant 0 : index
    %c0_46 = arith.constant 0 : index
    %85 = vector.load %arg13[%c0_45, %c0_46] : memref<16x128xf32, #tpu.memory_space<vmem>>, vector<16x128xf32>
    tpu.vector_store %arg13[%c0_45, %c0_46], %81 {strides = array<i32>} : memref<16x128xf32, #tpu.memory_space<vmem>>, vector<16x128xf32>,
    %c2_i32 = arith.constant 2 : i32
    %86 = arith.index_cast %c2_i32 : i32 to index
    %c0_47 = arith.constant 0 : index
    %c0_48 = arith.constant 0 : index
    %87 = vector.load %arg10[%86, %c0_47, %c0_48] : memref<8x16x512xf32, #tpu.memory_space<vmem>>, vector<1x16x512xf32>
    %88 = vector.shape_cast %87 : vector<1x16x512xf32> to vector<16x512xf32>
    %c0_49 = arith.constant 0 : index
    %c0_50 = arith.constant 0 : index
    %89 = vector.load %arg11[%c0_49, %c0_50] : memref<16x128xbf16, #tpu.memory_space<vmem>>, vector<16x128xbf16>
    %c0_51 = arith.constant 0 : index
    %c0_52 = arith.constant 0 : index
    %90 = vector.load %arg12[%c0_51, %c0_52] : memref<16x128xf32, #tpu.memory_space<vmem>>, vector<16x128xf32>
    %c0_53 = arith.constant 0 : index
    %c0_54 = arith.constant 0 : index
    %91 = vector.load %arg3[%c0_53, %c0_54] : memref<128x512xbf16, #tpu.memory_space<vmem>>, vector<128x512xbf16>
    %cst_55 = arith.constant dense<0.000000e+00> : vector<16x512xf32>
    %92 = tpu.matmul %89, %91, %cst_55 {dimension_numbers = #tpu.dot_dimension_numbers<[1], [0], [0], [1], [0, 0, 1, 1], [], []>} : vector<16x128xbf16>, vector<128x512xbf16>, vector<16x512xf32> -> vector<16x512xf32>
    %93 = arith.addf %88, %92 : vector<16x512xf32>
    %94 = vector.extract_strided_slice %93 {offsets = [0, 0], sizes = [16, 128], strides = [1, 1]} : vector<16x512xf32> to vector<16x128xf32>
    %95 = arith.negf %94 : vector<16x128xf32>
    %96 = math.exp %95 : vector<16x128xf32>
    %cst_56 = arith.constant 1.000000e+00 : f32
    %97 = vector.broadcast %cst_56 : f32 to vector<16x128xf32>
    %98 = arith.addf %97, %96 : vector<16x128xf32>
    %99 = arith.divf %97, %98 : vector<16x128xf32>
    %100 = vector.extract_strided_slice %93 {offsets = [0, 128], sizes = [16, 128], strides = [1, 1]} : vector<16x512xf32> to vector<16x128xf32>
    %101 = arith.negf %100 : vector<16x128xf32>
    %102 = math.exp %101 : vector<16x128xf32>
    %cst_57 = arith.constant 1.000000e+00 : f32
    %103 = vector.broadcast %cst_57 : f32 to vector<16x128xf32>
    %104 = arith.addf %103, %102 : vector<16x128xf32>
    %105 = arith.divf %103, %104 : vector<16x128xf32>
    %106 = vector.extract_strided_slice %93 {offsets = [0, 256], sizes = [16, 128], strides = [1, 1]} : vector<16x512xf32> to vector<16x128xf32>
    %107 = math.tanh %106 : vector<16x128xf32>
    %108 = vector.extract_strided_slice %93 {offsets = [0, 384], sizes = [16, 128], strides = [1, 1]} : vector<16x512xf32> to vector<16x128xf32>
    %109 = arith.negf %108 : vector<16x128xf32>
    %110 = math.exp %109 : vector<16x128xf32>
    %cst_58 = arith.constant 1.000000e+00 : f32
    %111 = vector.broadcast %cst_58 : f32 to vector<16x128xf32>
    %112 = arith.addf %111, %110 : vector<16x128xf32>
    %113 = arith.divf %111, %112 : vector<16x128xf32>
    %114 = arith.mulf %105, %90 : vector<16x128xf32>
    %115 = arith.mulf %99, %107 : vector<16x128xf32>
    %116 = arith.addf %114, %115 : vector<16x128xf32>
    %117 = math.tanh %116 : vector<16x128xf32>
    %118 = arith.mulf %113, %117 : vector<16x128xf32>
    %119 = arith.truncf %118 : vector<16x128xf32> to vector<16x128xbf16>
    %c0_59 = arith.constant 0 : index
    %c0_60 = arith.constant 0 : index
    %120 = vector.load %arg11[%c0_59, %c0_60] : memref<16x128xbf16, #tpu.memory_space<vmem>>, vector<16x128xbf16>
    tpu.vector_store %arg11[%c0_59, %c0_60], %119 {strides = array<i32>} : memref<16x128xbf16, #tpu.memory_space<vmem>>, vector<16x128xbf16>,
    %c0_61 = arith.constant 0 : index
    %c0_62 = arith.constant 0 : index
    %121 = vector.load %arg12[%c0_61, %c0_62] : memref<16x128xf32, #tpu.memory_space<vmem>>, vector<16x128xf32>
    tpu.vector_store %arg12[%c0_61, %c0_62], %116 {strides = array<i32>} : memref<16x128xf32, #tpu.memory_space<vmem>>, vector<16x128xf32>,
    %c0_63 = arith.constant 0 : index
    %c0_64 = arith.constant 0 : index
    %122 = vector.load %arg13[%c0_63, %c0_64] : memref<16x128xf32, #tpu.memory_space<vmem>>, vector<16x128xf32>
    tpu.vector_store %arg13[%c0_63, %c0_64], %118 {strides = array<i32>} : memref<16x128xf32, #tpu.memory_space<vmem>>, vector<16x128xf32>,
    %c3_i32 = arith.constant 3 : i32
    %123 = arith.index_cast %c3_i32 : i32 to index
    %c0_65 = arith.constant 0 : index
    %c0_66 = arith.constant 0 : index
    %124 = vector.load %arg10[%123, %c0_65, %c0_66] : memref<8x16x512xf32, #tpu.memory_space<vmem>>, vector<1x16x512xf32>
    %125 = vector.shape_cast %124 : vector<1x16x512xf32> to vector<16x512xf32>
    %c0_67 = arith.constant 0 : index
    %c0_68 = arith.constant 0 : index
    %126 = vector.load %arg11[%c0_67, %c0_68] : memref<16x128xbf16, #tpu.memory_space<vmem>>, vector<16x128xbf16>
    %c0_69 = arith.constant 0 : index
    %c0_70 = arith.constant 0 : index
    %127 = vector.load %arg12[%c0_69, %c0_70] : memref<16x128xf32, #tpu.memory_space<vmem>>, vector<16x128xf32>
    %c0_71 = arith.constant 0 : index
    %c0_72 = arith.constant 0 : index
    %128 = vector.load %arg3[%c0_71, %c0_72] : memref<128x512xbf16, #tpu.memory_space<vmem>>, vector<128x512xbf16>
    %cst_73 = arith.constant dense<0.000000e+00> : vector<16x512xf32>
    %129 = tpu.matmul %126, %128, %cst_73 {dimension_numbers = #tpu.dot_dimension_numbers<[1], [0], [0], [1], [0, 0, 1, 1], [], []>} : vector<16x128xbf16>, vector<128x512xbf16>, vector<16x512xf32> -> vector<16x512xf32>
    %130 = arith.addf %125, %129 : vector<16x512xf32>
    %131 = vector.extract_strided_slice %130 {offsets = [0, 0], sizes = [16, 128], strides = [1, 1]} : vector<16x512xf32> to vector<16x128xf32>
    %132 = arith.negf %131 : vector<16x128xf32>
    %133 = math.exp %132 : vector<16x128xf32>
    %cst_74 = arith.constant 1.000000e+00 : f32
    %134 = vector.broadcast %cst_74 : f32 to vector<16x128xf32>
    %135 = arith.addf %134, %133 : vector<16x128xf32>
    %136 = arith.divf %134, %135 : vector<16x128xf32>
    %137 = vector.extract_strided_slice %130 {offsets = [0, 128], sizes = [16, 128], strides = [1, 1]} : vector<16x512xf32> to vector<16x128xf32>
    %138 = arith.negf %137 : vector<16x128xf32>
    %139 = math.exp %138 : vector<16x128xf32>
    %cst_75 = arith.constant 1.000000e+00 : f32
    %140 = vector.broadcast %cst_75 : f32 to vector<16x128xf32>
    %141 = arith.addf %140, %139 : vector<16x128xf32>
    %142 = arith.divf %140, %141 : vector<16x128xf32>
    %143 = vector.extract_strided_slice %130 {offsets = [0, 256], sizes = [16, 128], strides = [1, 1]} : vector<16x512xf32> to vector<16x128xf32>
    %144 = math.tanh %143 : vector<16x128xf32>
    %145 = vector.extract_strided_slice %130 {offsets = [0, 384], sizes = [16, 128], strides = [1, 1]} : vector<16x512xf32> to vector<16x128xf32>
    %146 = arith.negf %145 : vector<16x128xf32>
    %147 = math.exp %146 : vector<16x128xf32>
    %cst_76 = arith.constant 1.000000e+00 : f32
    %148 = vector.broadcast %cst_76 : f32 to vector<16x128xf32>
    %149 = arith.addf %148, %147 : vector<16x128xf32>
    %150 = arith.divf %148, %149 : vector<16x128xf32>
    %151 = arith.mulf %142, %127 : vector<16x128xf32>
    %152 = arith.mulf %136, %144 : vector<16x128xf32>
    %153 = arith.addf %151, %152 : vector<16x128xf32>
    %154 = math.tanh %153 : vector<16x128xf32>
    %155 = arith.mulf %150, %154 : vector<16x128xf32>
    %156 = arith.truncf %155 : vector<16x128xf32> to vector<16x128xbf16>
    %c0_77 = arith.constant 0 : index
    %c0_78 = arith.constant 0 : index
    %157 = vector.load %arg11[%c0_77, %c0_78] : memref<16x128xbf16, #tpu.memory_space<vmem>>, vector<16x128xbf16>
    tpu.vector_store %arg11[%c0_77, %c0_78], %156 {strides = array<i32>} : memref<16x128xbf16, #tpu.memory_space<vmem>>, vector<16x128xbf16>,
    %c0_79 = arith.constant 0 : index
    %c0_80 = arith.constant 0 : index
    %158 = vector.load %arg12[%c0_79, %c0_80] : memref<16x128xf32, #tpu.memory_space<vmem>>, vector<16x128xf32>
    tpu.vector_store %arg12[%c0_79, %c0_80], %153 {strides = array<i32>} : memref<16x128xf32, #tpu.memory_space<vmem>>, vector<16x128xf32>,
    %c0_81 = arith.constant 0 : index
    %c0_82 = arith.constant 0 : index
    %159 = vector.load %arg13[%c0_81, %c0_82] : memref<16x128xf32, #tpu.memory_space<vmem>>, vector<16x128xf32>
    tpu.vector_store %arg13[%c0_81, %c0_82], %155 {strides = array<i32>} : memref<16x128xf32, #tpu.memory_space<vmem>>, vector<16x128xf32>,
    %c4_i32 = arith.constant 4 : i32
    %160 = arith.index_cast %c4_i32 : i32 to index
    %c0_83 = arith.constant 0 : index
    %c0_84 = arith.constant 0 : index
    %161 = vector.load %arg10[%160, %c0_83, %c0_84] : memref<8x16x512xf32, #tpu.memory_space<vmem>>, vector<1x16x512xf32>
    %162 = vector.shape_cast %161 : vector<1x16x512xf32> to vector<16x512xf32>
    %c0_85 = arith.constant 0 : index
    %c0_86 = arith.constant 0 : index
    %163 = vector.load %arg11[%c0_85, %c0_86] : memref<16x128xbf16, #tpu.memory_space<vmem>>, vector<16x128xbf16>
    %c0_87 = arith.constant 0 : index
    %c0_88 = arith.constant 0 : index
    %164 = vector.load %arg12[%c0_87, %c0_88] : memref<16x128xf32, #tpu.memory_space<vmem>>, vector<16x128xf32>
    %c0_89 = arith.constant 0 : index
    %c0_90 = arith.constant 0 : index
    %165 = vector.load %arg3[%c0_89, %c0_90] : memref<128x512xbf16, #tpu.memory_space<vmem>>, vector<128x512xbf16>
    %cst_91 = arith.constant dense<0.000000e+00> : vector<16x512xf32>
    %166 = tpu.matmul %163, %165, %cst_91 {dimension_numbers = #tpu.dot_dimension_numbers<[1], [0], [0], [1], [0, 0, 1, 1], [], []>} : vector<16x128xbf16>, vector<128x512xbf16>, vector<16x512xf32> -> vector<16x512xf32>
    %167 = arith.addf %162, %166 : vector<16x512xf32>
    %168 = vector.extract_strided_slice %167 {offsets = [0, 0], sizes = [16, 128], strides = [1, 1]} : vector<16x512xf32> to vector<16x128xf32>
    %169 = arith.negf %168 : vector<16x128xf32>
    %170 = math.exp %169 : vector<16x128xf32>
    %cst_92 = arith.constant 1.000000e+00 : f32
    %171 = vector.broadcast %cst_92 : f32 to vector<16x128xf32>
    %172 = arith.addf %171, %170 : vector<16x128xf32>
    %173 = arith.divf %171, %172 : vector<16x128xf32>
    %174 = vector.extract_strided_slice %167 {offsets = [0, 128], sizes = [16, 128], strides = [1, 1]} : vector<16x512xf32> to vector<16x128xf32>
    %175 = arith.negf %174 : vector<16x128xf32>
    %176 = math.exp %175 : vector<16x128xf32>
    %cst_93 = arith.constant 1.000000e+00 : f32
    %177 = vector.broadcast %cst_93 : f32 to vector<16x128xf32>
    %178 = arith.addf %177, %176 : vector<16x128xf32>
    %179 = arith.divf %177, %178 : vector<16x128xf32>
    %180 = vector.extract_strided_slice %167 {offsets = [0, 256], sizes = [16, 128], strides = [1, 1]} : vector<16x512xf32> to vector<16x128xf32>
    %181 = math.tanh %180 : vector<16x128xf32>
    %182 = vector.extract_strided_slice %167 {offsets = [0, 384], sizes = [16, 128], strides = [1, 1]} : vector<16x512xf32> to vector<16x128xf32>
    %183 = arith.negf %182 : vector<16x128xf32>
    %184 = math.exp %183 : vector<16x128xf32>
    %cst_94 = arith.constant 1.000000e+00 : f32
    %185 = vector.broadcast %cst_94 : f32 to vector<16x128xf32>
    %186 = arith.addf %185, %184 : vector<16x128xf32>
    %187 = arith.divf %185, %186 : vector<16x128xf32>
    %188 = arith.mulf %179, %164 : vector<16x128xf32>
    %189 = arith.mulf %173, %181 : vector<16x128xf32>
    %190 = arith.addf %188, %189 : vector<16x128xf32>
    %191 = math.tanh %190 : vector<16x128xf32>
    %192 = arith.mulf %187, %191 : vector<16x128xf32>
    %193 = arith.truncf %192 : vector<16x128xf32> to vector<16x128xbf16>
    %c0_95 = arith.constant 0 : index
    %c0_96 = arith.constant 0 : index
    %194 = vector.load %arg11[%c0_95, %c0_96] : memref<16x128xbf16, #tpu.memory_space<vmem>>, vector<16x128xbf16>
    tpu.vector_store %arg11[%c0_95, %c0_96], %193 {strides = array<i32>} : memref<16x128xbf16, #tpu.memory_space<vmem>>, vector<16x128xbf16>,
    %c0_97 = arith.constant 0 : index
    %c0_98 = arith.constant 0 : index
    %195 = vector.load %arg12[%c0_97, %c0_98] : memref<16x128xf32, #tpu.memory_space<vmem>>, vector<16x128xf32>
    tpu.vector_store %arg12[%c0_97, %c0_98], %190 {strides = array<i32>} : memref<16x128xf32, #tpu.memory_space<vmem>>, vector<16x128xf32>,
    %c0_99 = arith.constant 0 : index
    %c0_100 = arith.constant 0 : index
    %196 = vector.load %arg13[%c0_99, %c0_100] : memref<16x128xf32, #tpu.memory_space<vmem>>, vector<16x128xf32>
    tpu.vector_store %arg13[%c0_99, %c0_100], %192 {strides = array<i32>} : memref<16x128xf32, #tpu.memory_space<vmem>>, vector<16x128xf32>,
    %c5_i32 = arith.constant 5 : i32
    %197 = arith.index_cast %c5_i32 : i32 to index
    %c0_101 = arith.constant 0 : index
    %c0_102 = arith.constant 0 : index
    %198 = vector.load %arg10[%197, %c0_101, %c0_102] : memref<8x16x512xf32, #tpu.memory_space<vmem>>, vector<1x16x512xf32>
    %199 = vector.shape_cast %198 : vector<1x16x512xf32> to vector<16x512xf32>
    %c0_103 = arith.constant 0 : index
    %c0_104 = arith.constant 0 : index
    %200 = vector.load %arg11[%c0_103, %c0_104] : memref<16x128xbf16, #tpu.memory_space<vmem>>, vector<16x128xbf16>
    %c0_105 = arith.constant 0 : index
    %c0_106 = arith.constant 0 : index
    %201 = vector.load %arg12[%c0_105, %c0_106] : memref<16x128xf32, #tpu.memory_space<vmem>>, vector<16x128xf32>
    %c0_107 = arith.constant 0 : index
    %c0_108 = arith.constant 0 : index
    %202 = vector.load %arg3[%c0_107, %c0_108] : memref<128x512xbf16, #tpu.memory_space<vmem>>, vector<128x512xbf16>
    %cst_109 = arith.constant dense<0.000000e+00> : vector<16x512xf32>
    %203 = tpu.matmul %200, %202, %cst_109 {dimension_numbers = #tpu.dot_dimension_numbers<[1], [0], [0], [1], [0, 0, 1, 1], [], []>} : vector<16x128xbf16>, vector<128x512xbf16>, vector<16x512xf32> -> vector<16x512xf32>
    %204 = arith.addf %199, %203 : vector<16x512xf32>
    %205 = vector.extract_strided_slice %204 {offsets = [0, 0], sizes = [16, 128], strides = [1, 1]} : vector<16x512xf32> to vector<16x128xf32>
    %206 = arith.negf %205 : vector<16x128xf32>
    %207 = math.exp %206 : vector<16x128xf32>
    %cst_110 = arith.constant 1.000000e+00 : f32
    %208 = vector.broadcast %cst_110 : f32 to vector<16x128xf32>
    %209 = arith.addf %208, %207 : vector<16x128xf32>
    %210 = arith.divf %208, %209 : vector<16x128xf32>
    %211 = vector.extract_strided_slice %204 {offsets = [0, 128], sizes = [16, 128], strides = [1, 1]} : vector<16x512xf32> to vector<16x128xf32>
    %212 = arith.negf %211 : vector<16x128xf32>
    %213 = math.exp %212 : vector<16x128xf32>
    %cst_111 = arith.constant 1.000000e+00 : f32
    %214 = vector.broadcast %cst_111 : f32 to vector<16x128xf32>
    %215 = arith.addf %214, %213 : vector<16x128xf32>
    %216 = arith.divf %214, %215 : vector<16x128xf32>
    %217 = vector.extract_strided_slice %204 {offsets = [0, 256], sizes = [16, 128], strides = [1, 1]} : vector<16x512xf32> to vector<16x128xf32>
    %218 = math.tanh %217 : vector<16x128xf32>
    %219 = vector.extract_strided_slice %204 {offsets = [0, 384], sizes = [16, 128], strides = [1, 1]} : vector<16x512xf32> to vector<16x128xf32>
    %220 = arith.negf %219 : vector<16x128xf32>
    %221 = math.exp %220 : vector<16x128xf32>
    %cst_112 = arith.constant 1.000000e+00 : f32
    %222 = vector.broadcast %cst_112 : f32 to vector<16x128xf32>
    %223 = arith.addf %222, %221 : vector<16x128xf32>
    %224 = arith.divf %222, %223 : vector<16x128xf32>
    %225 = arith.mulf %216, %201 : vector<16x128xf32>
    %226 = arith.mulf %210, %218 : vector<16x128xf32>
    %227 = arith.addf %225, %226 : vector<16x128xf32>
    %228 = math.tanh %227 : vector<16x128xf32>
    %229 = arith.mulf %224, %228 : vector<16x128xf32>
    %230 = arith.truncf %229 : vector<16x128xf32> to vector<16x128xbf16>
    %c0_113 = arith.constant 0 : index
    %c0_114 = arith.constant 0 : index
    %231 = vector.load %arg11[%c0_113, %c0_114] : memref<16x128xbf16, #tpu.memory_space<vmem>>, vector<16x128xbf16>
    tpu.vector_store %arg11[%c0_113, %c0_114], %230 {strides = array<i32>} : memref<16x128xbf16, #tpu.memory_space<vmem>>, vector<16x128xbf16>,
    %c0_115 = arith.constant 0 : index
    %c0_116 = arith.constant 0 : index
    %232 = vector.load %arg12[%c0_115, %c0_116] : memref<16x128xf32, #tpu.memory_space<vmem>>, vector<16x128xf32>
    tpu.vector_store %arg12[%c0_115, %c0_116], %227 {strides = array<i32>} : memref<16x128xf32, #tpu.memory_space<vmem>>, vector<16x128xf32>,
    %c0_117 = arith.constant 0 : index
    %c0_118 = arith.constant 0 : index
    %233 = vector.load %arg13[%c0_117, %c0_118] : memref<16x128xf32, #tpu.memory_space<vmem>>, vector<16x128xf32>
    tpu.vector_store %arg13[%c0_117, %c0_118], %229 {strides = array<i32>} : memref<16x128xf32, #tpu.memory_space<vmem>>, vector<16x128xf32>,
    %c6_i32 = arith.constant 6 : i32
    %234 = arith.index_cast %c6_i32 : i32 to index
    %c0_119 = arith.constant 0 : index
    %c0_120 = arith.constant 0 : index
    %235 = vector.load %arg10[%234, %c0_119, %c0_120] : memref<8x16x512xf32, #tpu.memory_space<vmem>>, vector<1x16x512xf32>
    %236 = vector.shape_cast %235 : vector<1x16x512xf32> to vector<16x512xf32>
    %c0_121 = arith.constant 0 : index
    %c0_122 = arith.constant 0 : index
    %237 = vector.load %arg11[%c0_121, %c0_122] : memref<16x128xbf16, #tpu.memory_space<vmem>>, vector<16x128xbf16>
    %c0_123 = arith.constant 0 : index
    %c0_124 = arith.constant 0 : index
    %238 = vector.load %arg12[%c0_123, %c0_124] : memref<16x128xf32, #tpu.memory_space<vmem>>, vector<16x128xf32>
    %c0_125 = arith.constant 0 : index
    %c0_126 = arith.constant 0 : index
    %239 = vector.load %arg3[%c0_125, %c0_126] : memref<128x512xbf16, #tpu.memory_space<vmem>>, vector<128x512xbf16>
    %cst_127 = arith.constant dense<0.000000e+00> : vector<16x512xf32>
    %240 = tpu.matmul %237, %239, %cst_127 {dimension_numbers = #tpu.dot_dimension_numbers<[1], [0], [0], [1], [0, 0, 1, 1], [], []>} : vector<16x128xbf16>, vector<128x512xbf16>, vector<16x512xf32> -> vector<16x512xf32>
    %241 = arith.addf %236, %240 : vector<16x512xf32>
    %242 = vector.extract_strided_slice %241 {offsets = [0, 0], sizes = [16, 128], strides = [1, 1]} : vector<16x512xf32> to vector<16x128xf32>
    %243 = arith.negf %242 : vector<16x128xf32>
    %244 = math.exp %243 : vector<16x128xf32>
    %cst_128 = arith.constant 1.000000e+00 : f32
    %245 = vector.broadcast %cst_128 : f32 to vector<16x128xf32>
    %246 = arith.addf %245, %244 : vector<16x128xf32>
    %247 = arith.divf %245, %246 : vector<16x128xf32>
    %248 = vector.extract_strided_slice %241 {offsets = [0, 128], sizes = [16, 128], strides = [1, 1]} : vector<16x512xf32> to vector<16x128xf32>
    %249 = arith.negf %248 : vector<16x128xf32>
    %250 = math.exp %249 : vector<16x128xf32>
    %cst_129 = arith.constant 1.000000e+00 : f32
    %251 = vector.broadcast %cst_129 : f32 to vector<16x128xf32>
    %252 = arith.addf %251, %250 : vector<16x128xf32>
    %253 = arith.divf %251, %252 : vector<16x128xf32>
    %254 = vector.extract_strided_slice %241 {offsets = [0, 256], sizes = [16, 128], strides = [1, 1]} : vector<16x512xf32> to vector<16x128xf32>
    %255 = math.tanh %254 : vector<16x128xf32>
    %256 = vector.extract_strided_slice %241 {offsets = [0, 384], sizes = [16, 128], strides = [1, 1]} : vector<16x512xf32> to vector<16x128xf32>
    %257 = arith.negf %256 : vector<16x128xf32>
    %258 = math.exp %257 : vector<16x128xf32>
    %cst_130 = arith.constant 1.000000e+00 : f32
    %259 = vector.broadcast %cst_130 : f32 to vector<16x128xf32>
    %260 = arith.addf %259, %258 : vector<16x128xf32>
    %261 = arith.divf %259, %260 : vector<16x128xf32>
    %262 = arith.mulf %253, %238 : vector<16x128xf32>
    %263 = arith.mulf %247, %255 : vector<16x128xf32>
    %264 = arith.addf %262, %263 : vector<16x128xf32>
    %265 = math.tanh %264 : vector<16x128xf32>
    %266 = arith.mulf %261, %265 : vector<16x128xf32>
    %267 = arith.truncf %266 : vector<16x128xf32> to vector<16x128xbf16>
    %c0_131 = arith.constant 0 : index
    %c0_132 = arith.constant 0 : index
    %268 = vector.load %arg11[%c0_131, %c0_132] : memref<16x128xbf16, #tpu.memory_space<vmem>>, vector<16x128xbf16>
    tpu.vector_store %arg11[%c0_131, %c0_132], %267 {strides = array<i32>} : memref<16x128xbf16, #tpu.memory_space<vmem>>, vector<16x128xbf16>,
    %c0_133 = arith.constant 0 : index
    %c0_134 = arith.constant 0 : index
    %269 = vector.load %arg12[%c0_133, %c0_134] : memref<16x128xf32, #tpu.memory_space<vmem>>, vector<16x128xf32>
    tpu.vector_store %arg12[%c0_133, %c0_134], %264 {strides = array<i32>} : memref<16x128xf32, #tpu.memory_space<vmem>>, vector<16x128xf32>,
    %c0_135 = arith.constant 0 : index
    %c0_136 = arith.constant 0 : index
    %270 = vector.load %arg13[%c0_135, %c0_136] : memref<16x128xf32, #tpu.memory_space<vmem>>, vector<16x128xf32>
    tpu.vector_store %arg13[%c0_135, %c0_136], %266 {strides = array<i32>} : memref<16x128xf32, #tpu.memory_space<vmem>>, vector<16x128xf32>,
    %c7_i32 = arith.constant 7 : i32
    %271 = arith.index_cast %c7_i32 : i32 to index
    %c0_137 = arith.constant 0 : index
    %c0_138 = arith.constant 0 : index
    %272 = vector.load %arg10[%271, %c0_137, %c0_138] : memref<8x16x512xf32, #tpu.memory_space<vmem>>, vector<1x16x512xf32>
    %273 = vector.shape_cast %272 : vector<1x16x512xf32> to vector<16x512xf32>
    %c0_139 = arith.constant 0 : index
    %c0_140 = arith.constant 0 : index
    %274 = vector.load %arg11[%c0_139, %c0_140] : memref<16x128xbf16, #tpu.memory_space<vmem>>, vector<16x128xbf16>
    %c0_141 = arith.constant 0 : index
    %c0_142 = arith.constant 0 : index
    %275 = vector.load %arg12[%c0_141, %c0_142] : memref<16x128xf32, #tpu.memory_space<vmem>>, vector<16x128xf32>
    %c0_143 = arith.constant 0 : index
    %c0_144 = arith.constant 0 : index
    %276 = vector.load %arg3[%c0_143, %c0_144] : memref<128x512xbf16, #tpu.memory_space<vmem>>, vector<128x512xbf16>
    %cst_145 = arith.constant dense<0.000000e+00> : vector<16x512xf32>
    %277 = tpu.matmul %274, %276, %cst_145 {dimension_numbers = #tpu.dot_dimension_numbers<[1], [0], [0], [1], [0, 0, 1, 1], [], []>} : vector<16x128xbf16>, vector<128x512xbf16>, vector<16x512xf32> -> vector<16x512xf32>
    %278 = arith.addf %273, %277 : vector<16x512xf32>
    %279 = vector.extract_strided_slice %278 {offsets = [0, 0], sizes = [16, 128], strides = [1, 1]} : vector<16x512xf32> to vector<16x128xf32>
    %280 = arith.negf %279 : vector<16x128xf32>
    %281 = math.exp %280 : vector<16x128xf32>
    %cst_146 = arith.constant 1.000000e+00 : f32
    %282 = vector.broadcast %cst_146 : f32 to vector<16x128xf32>
    %283 = arith.addf %282, %281 : vector<16x128xf32>
    %284 = arith.divf %282, %283 : vector<16x128xf32>
    %285 = vector.extract_strided_slice %278 {offsets = [0, 128], sizes = [16, 128], strides = [1, 1]} : vector<16x512xf32> to vector<16x128xf32>
    %286 = arith.negf %285 : vector<16x128xf32>
    %287 = math.exp %286 : vector<16x128xf32>
    %cst_147 = arith.constant 1.000000e+00 : f32
    %288 = vector.broadcast %cst_147 : f32 to vector<16x128xf32>
    %289 = arith.addf %288, %287 : vector<16x128xf32>
    %290 = arith.divf %288, %289 : vector<16x128xf32>
    %291 = vector.extract_strided_slice %278 {offsets = [0, 256], sizes = [16, 128], strides = [1, 1]} : vector<16x512xf32> to vector<16x128xf32>
    %292 = math.tanh %291 : vector<16x128xf32>
    %293 = vector.extract_strided_slice %278 {offsets = [0, 384], sizes = [16, 128], strides = [1, 1]} : vector<16x512xf32> to vector<16x128xf32>
    %294 = arith.negf %293 : vector<16x128xf32>
    %295 = math.exp %294 : vector<16x128xf32>
    %cst_148 = arith.constant 1.000000e+00 : f32
    %296 = vector.broadcast %cst_148 : f32 to vector<16x128xf32>
    %297 = arith.addf %296, %295 : vector<16x128xf32>
    %298 = arith.divf %296, %297 : vector<16x128xf32>
    %299 = arith.mulf %290, %275 : vector<16x128xf32>
    %300 = arith.mulf %284, %292 : vector<16x128xf32>
    %301 = arith.addf %299, %300 : vector<16x128xf32>
    %302 = math.tanh %301 : vector<16x128xf32>
    %303 = arith.mulf %298, %302 : vector<16x128xf32>
    %304 = arith.truncf %303 : vector<16x128xf32> to vector<16x128xbf16>
    %c0_149 = arith.constant 0 : index
    %c0_150 = arith.constant 0 : index
    %305 = vector.load %arg11[%c0_149, %c0_150] : memref<16x128xbf16, #tpu.memory_space<vmem>>, vector<16x128xbf16>
    tpu.vector_store %arg11[%c0_149, %c0_150], %304 {strides = array<i32>} : memref<16x128xbf16, #tpu.memory_space<vmem>>, vector<16x128xbf16>,
    %c0_151 = arith.constant 0 : index
    %c0_152 = arith.constant 0 : index
    %306 = vector.load %arg12[%c0_151, %c0_152] : memref<16x128xf32, #tpu.memory_space<vmem>>, vector<16x128xf32>
    tpu.vector_store %arg12[%c0_151, %c0_152], %301 {strides = array<i32>} : memref<16x128xf32, #tpu.memory_space<vmem>>, vector<16x128xf32>,
    %c0_153 = arith.constant 0 : index
    %c0_154 = arith.constant 0 : index
    %307 = vector.load %arg13[%c0_153, %c0_154] : memref<16x128xf32, #tpu.memory_space<vmem>>, vector<16x128xf32>
    tpu.vector_store %arg13[%c0_153, %c0_154], %303 {strides = array<i32>} : memref<16x128xf32, #tpu.memory_space<vmem>>, vector<16x128xf32>,
    %c8_i32 = arith.constant 8 : i32
    %c0_i32_155 = arith.constant 0 : i32
    %308 = arith.cmpi eq, %arg0, %c0_i32_155 : i32
    %309 = arith.extui %308 : i1 to i32
    %c0_i32_156 = arith.constant 0 : i32
    %310 = arith.cmpi ne, %309, %c0_i32_156 : i32
    scf.if %310 {
      %c0_157 = arith.constant 0 : index
      %c0_158 = arith.constant 0 : index
      %311 = vector.load %arg13[%c0_157, %c0_158] : memref<16x128xf32, #tpu.memory_space<vmem>>, vector<16x128xf32>
      %c0_159 = arith.constant 0 : index
      %c0_160 = arith.constant 0 : index
      %312 = vector.load %arg5[%c0_159, %c0_160] : memref<1x128xf32, #tpu.memory_space<vmem>>, vector<1x128xf32>
      %313 = vector.broadcast %312 : vector<1x128xf32> to vector<16x128xf32>
      %314 = arith.mulf %311, %313 : vector<16x128xf32>
      %c0_161 = arith.constant 0 : index
      %c0_162 = arith.constant 0 : index
      %315 = vector.load %arg6[%c0_161, %c0_162] : memref<1x128xf32, #tpu.memory_space<vmem>>, vector<1x128xf32>
      %316 = vector.broadcast %315 : vector<1x128xf32> to vector<16x128xf32>
      %317 = arith.addf %314, %316 : vector<16x128xf32>
      %cst_163 = arith.constant 0.000000e+00 : f32
      %318 = vector.broadcast %cst_163 : f32 to vector<16x128xf32>
      %319 = arith.maximumf %317, %318 : vector<16x128xf32>
      %320 = arith.truncf %319 : vector<16x128xf32> to vector<16x128xbf16>
      %c0_164 = arith.constant 0 : index
      %c0_165 = arith.constant 0 : index
      %321 = vector.load %arg7[%c0_164, %c0_165] : memref<128x128xbf16, #tpu.memory_space<vmem>>, vector<128x128xbf16>
      %cst_166 = arith.constant dense<0.000000e+00> : vector<16x128xf32>
      %322 = tpu.matmul %320, %321, %cst_166 {dimension_numbers = #tpu.dot_dimension_numbers<[1], [0], [0], [1], [0, 0, 1, 1], [], []>} : vector<16x128xbf16>, vector<128x128xbf16>, vector<16x128xf32> -> vector<16x128xf32>
      %c0_167 = arith.constant 0 : index
      %c0_168 = arith.constant 0 : index
      %323 = vector.load %arg8[%c0_167, %c0_168] : memref<1x128xf32, #tpu.memory_space<vmem>>, vector<1x128xf32>
      %324 = vector.broadcast %323 : vector<1x128xf32> to vector<16x128xf32>
      %325 = arith.addf %322, %324 : vector<16x128xf32>
      %c0_169 = arith.constant 0 : index
      %c0_170 = arith.constant 0 : index
      %326 = vector.load %arg9[%c0_169, %c0_170] : memref<16x128xf32, #tpu.memory_space<vmem>>, vector<16x128xf32>
      tpu.vector_store %arg9[%c0_169, %c0_170], %325 {strides = array<i32>} : memref<16x128xf32, #tpu.memory_space<vmem>>, vector<16x128xf32>,
    } else {
    }
    return
  }
  func.func @transform_0(%arg0: i32) -> (i32, i32, i32) {
    %c0_i32 = arith.constant 0 : i32
    %c0_i32_0 = arith.constant 0 : i32
    %c0_i32_1 = arith.constant 0 : i32
    return %arg0, %c0_i32, %c0_i32_0 : i32, i32, i32
  }
  func.func @transform_1(%arg0: i32) -> (i32, i32) {
    %c0_i32 = arith.constant 0 : i32
    %c0_i32_0 = arith.constant 0 : i32
    %c0_i32_1 = arith.constant 0 : i32
    return %c0_i32, %c0_i32_0 : i32, i32
  }
  func.func @transform_2(%arg0: i32) -> (i32, i32) {
    %c0_i32 = arith.constant 0 : i32
    %c0_i32_0 = arith.constant 0 : i32
    %c0_i32_1 = arith.constant 0 : i32
    return %c0_i32, %c0_i32_0 : i32, i32
  }
  func.func @transform_3(%arg0: i32) -> (i32, i32) {
    %c0_i32 = arith.constant 0 : i32
    %c0_i32_0 = arith.constant 0 : i32
    %c0_i32_1 = arith.constant 0 : i32
    return %c0_i32, %c0_i32_0 : i32, i32
  }
  func.func @transform_4(%arg0: i32) -> (i32, i32) {
    %c0_i32 = arith.constant 0 : i32
    %c0_i32_0 = arith.constant 0 : i32
    %c0_i32_1 = arith.constant 0 : i32
    return %c0_i32, %c0_i32_0 : i32, i32
  }
  func.func @transform_5(%arg0: i32) -> (i32, i32) {
    %c0_i32 = arith.constant 0 : i32
    %c0_i32_0 = arith.constant 0 : i32
    %c0_i32_1 = arith.constant 0 : i32
    return %c0_i32, %c0_i32_0 : i32, i32
  }
  func.func @transform_6(%arg0: i32) -> (i32, i32) {
    %c0_i32 = arith.constant 0 : i32
    %c0_i32_0 = arith.constant 0 : i32
    %c0_i32_1 = arith.constant 0 : i32
    return %c0_i32, %c0_i32_0 : i32, i32
  }
  func.func @transform_7(%arg0: i32) -> (i32, i32) {
    %c0_i32 = arith.constant 0 : i32
    %c0_i32_0 = arith.constant 0 : i32
    %c0_i32_1 = arith.constant 0 : i32
    return %c0_i32, %c0_i32_0 : i32, i32
  }
  func.func @transform_8(%arg0: i32) -> (i32, i32) {
    %c0_i32 = arith.constant 0 : i32
    %c0_i32_0 = arith.constant 0 : i32
    %c0_i32_1 = arith.constant 0 : i32
    return %c0_i32, %c0_i32_0 : i32, i32
  }
}

</mosaic_0001>

<bundles_post_ra>
// kernel: lstm_cluster_forward.2
= control target key start
LH: loop header
LB: loop body
LE: loop exit
PB: predicated region body
PF: predicated region fallthrough
CT: control target
= control target key end

     0   :  { %v5389_v1 = vmov 0   ;;  %vm128_vm0 = vcmask 130048   ;;  %v48_v46 = vlaneseq  ;;  %s5384_s1 = inlined_call_operand.vmem [shape: bf16[16,512], index: 1, kind: input, shape index: {}]   ;;  %s5385_s0 = inlined_call_operand.vmem [shape: bf16[8,16,16], index: 0, kind: input, shape index: {}]   ;;  %s5386_s2 = inlined_call_operand.vmem [shape: bf16[128,512], index: 2, kind: input, shape index: {}]   ;;  %s5387_s3 = inlined_call_operand.vmem [shape: f32[1,512], index: 3, kind: input, shape index: {}]   ;;  %s5388_s4 = inlined_call_operand.vmem [shape: bf16[8,16,128], index: 4, kind: output, shape index: {}]  }
   0x1   :  { %v3863_v0 = vld [vmem:[%s5384_s1 + $0x4] ss:$16 sps:$4 sm:$0xff]   ;;  %185 = vmatprep.mubr.bf16.mxu0 %v5389_v1  ;;  %22 = vst [vmem:[#allocation3] sm:$0xf] %v5389_v1  ;;  %23 = vst [vmem:[#allocation3 + $0x4] sm:$0xf] %v5389_v1  ;;  %298 = vmatprep.mubr.bf16.mxu1 %v5389_v1 }
   0x2   :  { %v3865_v2 = vld [vmem:[%s5384_s1 + $0xc] ss:$16 sps:$4 sm:$0xff]   ;;  %167 = vmatprep.subr.bf16.mxu0 %v3863_v0  ;;  %v3867_v3 = vld [vmem:[%s5384_s1] ss:$16 sps:$4 sm:$0xff]   ;;  %v3868_v4 = vld [vmem:[%s5384_s1 + $0x8] ss:$16 sps:$4 sm:$0xff]  }
   0x3   :  { %280 = vmatprep.subr.bf16.mxu1 %v3865_v2  ;;  %v3869_v5 = vld [vmem:[%s5385_s0] sm:$0xff]   ;;  %168 = vmatpush1.bf16.msra.mxu0 %v3867_v3  ;;  %v4365_v11 = vld [vmem:[%s5386_s2 + $0xe8] ss:$16 sps:$4 sm:$0xff]   ;;  %v4370_v12 = vld [vmem:[%s5386_s2 + $0xec] ss:$16 sps:$4 sm:$0xff]   ;;  %v49_v47 = vshrl.u32 %v48_v46, 7 }
   0x4   :  { %281 = vmatpush1.bf16.msra.mxu1 %v3868_v4  ;;  %v4333_v6 = vld [vmem:[%s5386_s2 + $0xe0] ss:$16 sps:$4 sm:$0xff]   ;;  %v4338_v7 = vld [vmem:[%s5386_s2 + $0xe4] ss:$16 sps:$4 sm:$0xff]   ;;  %v3873_v13 = vld [vmem:[%s5385_s0 + $0x8] sm:$0xff]  }
   0x5   :  { %653 = vmatprep.subr.bf16.mxu0 %v4338_v7  ;;  %v4346_v8 = vld [vmem:[%s5386_s2 + $0xc4] ss:$16 sps:$4 sm:$0xff]   ;;  %v4353_v9 = vld [vmem:[%s5386_s2 + $0xc0] ss:$16 sps:$4 sm:$0xff]   ;;  %696 = vmatprep.subr.bf16.mxu1 %v4370_v12  ;;  %v4392_v16 = vld [vmem:[%s5386_s2 + $0xc8] ss:$16 sps:$4 sm:$0xff]  }
   0x6   :  { %3401 = vmatmul.mubr.msk.bf16.vlgmr.msra.gmra.mxu0 %vm128_vm0, %v3869_v5  ;;  %v4360_v10 = vld [vmem:[%s5386_s2 + $0xa4] ss:$16 sps:$4 sm:$0xff]   ;;  %v4379_v14 = vld [vmem:[%s5386_s2 + $0xa0] ss:$16 sps:$4 sm:$0xff]   ;;  %v4397_v17 = vld [vmem:[%s5386_s2 + $0xcc] ss:$16 sps:$4 sm:$0xff]  }
   0x7   :  { %3409 = vmatmul.mubr.msk.bf16.vlgmr.msra.gmra.mxu1 %vm128_vm0, %v3869_v5  ;;  %654 = vmatpush1.bf16.msra.mxu0 %v4333_v6  ;;  %v4387_v15 = vld [vmem:[%s5386_s2 + $0x84] ss:$16 sps:$4 sm:$0xff]   ;;  %v4406_v18 = vld [vmem:[%s5386_s2 + $0x80] ss:$16 sps:$4 sm:$0xff]   ;;  %v4418_v20 = vld [vmem:[%s5386_s2 + $0xa8] ss:$16 sps:$4 sm:$0xff]  }
   0x8   :  { %195 = vmatprep.mubr.bf16.mxu0 %v5389_v1  ;;  %308 = vmatprep.mubr.bf16.mxu1 %v5389_v1  ;;  %v4411_v19 = vld [vmem:[%s5386_s2 + $0x64] ss:$16 sps:$4 sm:$0xff]   ;;  %v4425_v21 = vld [vmem:[%s5386_s2 + $0xac] ss:$16 sps:$4 sm:$0xff]   ;;  %v4433_v23 = vld [vmem:[%s5386_s2 + $0x60] ss:$16 sps:$4 sm:$0xff]  }
   0x9   :  { %655 = vmatprep.subr.bf16.mxu0 %v4346_v8  ;;  %697 = vmatpush1.bf16.msra.mxu1 %v4365_v11  ;;  %v3877_v22 = vld [vmem:[%s5385_s0 + $0x10] sm:$0xff]   ;;  %v4445_v25 = vld [vmem:[%s5386_s2 + $0x8c] ss:$16 sps:$4 sm:$0xff]   ;;  %v4452_v26 = vld [vmem:[%s5386_s2 + $0x88] ss:$16 sps:$4 sm:$0xff]   ;;  %v50_v52 = vsub.s32 0, %v49_v47 }
   0xa   :  { %698 = vmatprep.subr.bf16.mxu1 %v4397_v17  ;;  %v4440_v24 = vld [vmem:[%s5386_s2 + $0x44] ss:$16 sps:$4 sm:$0xff]   ;;  %v4462_v27 = vld [vmem:[%s5386_s2 + $0x40] ss:$16 sps:$4 sm:$0xff]   ;;  %v4468_v28 = vld [vmem:[%s5386_s2 + $0x6c] ss:$16 sps:$4 sm:$0xff]  }
   0xb   :  { %656 = vmatpush1.bf16.msra.mxu0 %v4353_v9  ;;  %v4475_v29 = vld [vmem:[%s5386_s2 + $0x24] ss:$16 sps:$4 sm:$0xff]   ;;  %v4480_v30 = vld [vmem:[%s5386_s2 + $0x68] ss:$16 sps:$4 sm:$0xff]   ;;  %v4489_v32 = vld [vmem:[%s5386_s2 + $0x20] ss:$16 sps:$4 sm:$0xff]  }
   0xc   :  { %657 = vmatprep.subr.bf16.mxu0 %v4360_v10  ;;  %v3884_v31 = vld [vmem:[%s5385_s0 + $0x18] sm:$0xff]   ;;  %v4507_v35 = vld [vmem:[%s5386_s2 + $0x4] ss:$16 sps:$4 sm:$0xff]   ;;  %v4521_v37 = vld [vmem:[%s5386_s2] ss:$16 sps:$4 sm:$0xff]   ;;  %v58_v53 = vsub.s32 2, %v49_v47 }
   0xd   :  { %699 = vmatpush1.bf16.msra.mxu1 %v4392_v16  ;;  %v4495_v33 = vld [vmem:[%s5386_s2 + $0x4c] ss:$16 sps:$4 sm:$0xff]   ;;  %v4502_v34 = vld [vmem:[%s5386_s2 + $0x48] ss:$16 sps:$4 sm:$0xff]   ;;  %v3891_v38 = vld [vmem:[%s5385_s0 + $0x20] sm:$0xff]   ;;  %v54_v57 = vsub.s32 1, %v49_v47 }
   0xe   :  { %3402 = vmatmul.mubr.msk.bf16.gmra.mxu0 %vm128_vm0, %v3873_v13  ;;  %700 = vmatprep.subr.bf16.mxu1 %v4425_v21  ;;  %v4514_v36 = vld [vmem:[%s5386_s2 + $0x2c] ss:$16 sps:$4 sm:$0xff]   ;;  %v4531_v39 = vld [vmem:[%s5386_s2 + $0x28] ss:$16 sps:$4 sm:$0xff]   ;;  %v3905_v43 = vld [vmem:[%s5385_s0 + $0x30] sm:$0xff]   ;;  %v62_v58 = vsub.s32 3, %v49_v47 }
   0xf   :  { %3410 = vmatmul.mubr.msk.bf16.gmra.mxu1 %vm128_vm0, %v3873_v13  ;;  %205 = vmatprep.mubr.bf16.mxu0 %v5389_v1  ;;  %v4539_v40 = vld [vmem:[%s5386_s2 + $0xc] ss:$16 sps:$4 sm:$0xff]   ;;  %v4544_v41 = vld [vmem:[%s5386_s2 + $0x8] ss:$16 sps:$4 sm:$0xff]   ;;  %v3925_v45 = vld [vmem:[#allocation3] sm:$0xff]  }
  0x10   :  { %318 = vmatprep.mubr.bf16.mxu1 %v5389_v1  ;;  %658 = vmatpush1.bf16.msra.mxu0 %v4379_v14  ;;  %v3898_v42 = vld [vmem:[%s5385_s0 + $0x28] sm:$0xff]   ;;  %v3915_v44 = vld [vmem:[%s5385_s0 + $0x38] sm:$0xff]   ;;  %v46_v54 = vld [vmem:[%s5387_s3] sm:$0xf] }
  0x11   :  { %659 = vmatprep.subr.bf16.mxu0 %v4387_v15  ;;  %701 = vmatpush1.bf16.msra.mxu1 %v4418_v20  ;;  %v4630_v61 = vrot.slane %v46_v54, %v50_v52  ;;  %v4632_v62 = vrot.slane %v46_v54, %v58_v53  ;;  %v4634_v2 = vrot.slane %v46_v54, %v54_v57 }
  0x12   :  { %702 = vmatprep.subr.bf16.mxu1 %v4445_v25  ;;  %v4636_v3 = vrot.slane %v46_v54, %v62_v58 }
  0x14   :  { %660 = vmatpush1.bf16.msra.mxu0 %v4406_v18 }
  0x15   :  { %661 = vmatprep.subr.bf16.mxu0 %v4411_v19  ;;  %703 = vmatpush1.bf16.msra.mxu1 %v4452_v26 }
  0x16   :  { %3403 = vmatmul.mubr.msk.bf16.gmra.mxu0 %vm128_vm0, %v3877_v22  ;;  %704 = vmatprep.subr.bf16.mxu1 %v4468_v28 }
  0x17   :  { %3411 = vmatmul.mubr.msk.bf16.gmra.mxu1 %vm128_vm0, %v3877_v22  ;;  %215 = vmatprep.mubr.bf16.mxu0 %v5389_v1 }
  0x18   :  { %328 = vmatprep.mubr.bf16.mxu1 %v5389_v1  ;;  %662 = vmatpush1.bf16.msra.mxu0 %v4433_v23 }
  0x19   :  { %663 = vmatprep.subr.bf16.mxu0 %v4440_v24  ;;  %705 = vmatpush1.bf16.msra.mxu1 %v4480_v30 }
  0x1a   :  { %706 = vmatprep.subr.bf16.mxu1 %v4495_v33 }
  0x1c   :  { %664 = vmatpush1.bf16.msra.mxu0 %v4462_v27 }
  0x1d   :  { %665 = vmatprep.subr.bf16.mxu0 %v4475_v29  ;;  %707 = vmatpush1.bf16.msra.mxu1 %v4502_v34 }
  0x1e   :  { %3404 = vmatmul.mubr.msk.bf16.gmra.mxu0 %vm128_vm0, %v3884_v31  ;;  %708 = vmatprep.subr.bf16.mxu1 %v4514_v36 }
  0x1f   :  { %3412 = vmatmul.mubr.msk.bf16.gmra.mxu1 %vm128_vm0, %v3884_v31  ;;  %225 = vmatprep.mubr.bf16.mxu0 %v5389_v1 }
  0x20   :  { %338 = vmatprep.mubr.bf16.mxu1 %v5389_v1  ;;  %666 = vmatpush1.bf16.msra.mxu0 %v4489_v32 }
  0x21   :  { %667 = vmatprep.subr.bf16.mxu0 %v4507_v35  ;;  %709 = vmatpush1.bf16.msra.mxu1 %v4531_v39 }
  0x22   :  { %710 = vmatprep.subr.bf16.mxu1 %v4539_v40 }
  0x24   :  { %668 = vmatpush1.bf16.msra.mxu0 %v4521_v37 }
  0x25   :  { %1020 = vmatprep.subr.bf16.mxu0 %v4338_v7  ;;  %711 = vmatpush1.bf16.msra.mxu1 %v4544_v41 }
  0x26   :  { %3405 = vmatmul.mubr.msk.bf16.gmra.mxu0 %vm128_vm0, %v3891_v38  ;;  %1063 = vmatprep.subr.bf16.mxu1 %v4370_v12 }
  0x27   :  { %3413 = vmatmul.mubr.msk.bf16.gmra.mxu1 %vm128_vm0, %v3891_v38  ;;  %235 = vmatprep.mubr.bf16.mxu0 %v5389_v1 }
  0x28   :  { %348 = vmatprep.mubr.bf16.mxu1 %v5389_v1 }
  0x2e   :  { %3406 = vmatmul.mubr.msk.bf16.gmra.mxu0 %vm128_vm0, %v3898_v42 }
  0x2f   :  { %3414 = vmatmul.mubr.msk.bf16.gmra.mxu1 %vm128_vm0, %v3898_v42  ;;  %245 = vmatprep.mubr.bf16.mxu0 %v5389_v1 }
  0x30   :  { %358 = vmatprep.mubr.bf16.mxu1 %v5389_v1 }
  0x36   :  { %3407 = vmatmul.mubr.msk.bf16.gmra.mxu0 %vm128_vm0, %v3905_v43 }
  0x37   :  { %3415 = vmatmul.mubr.msk.bf16.gmra.mxu1 %vm128_vm0, %v3905_v43  ;;  %255 = vmatprep.mubr.bf16.mxu0 %v5389_v1 }
  0x38   :  { %368 = vmatprep.mubr.bf16.mxu1 %v5389_v1 }
  0x3e   :  { %3408 = vmatmul.mubr.msk.bf16.gmra.mxu0 %vm128_vm0, %v3915_v44 }
  0x3f   :  { %3416 = vmatmul.mubr.msk.bf16.gmra.mxu1 %vm128_vm0, %v3915_v44  ;;  %685 = vmatprep.mubr.bf16.mxu0 %v5389_v1 }
  0x40   :  { %728 = vmatprep.mubr.bf16.mxu1 %v5389_v1 }
  0x46   :  { %686 = vmatmul.mubr.bf16.vlgmr.msra.gmra.mxu0 %v3925_v45 }
  0x47   :  { %729 = vmatmul.mubr.bf16.vlgmr.msra.gmra.mxu1 %v3925_v45  ;;  %1021 = vmatpush1.bf16.msra.mxu0 %v4333_v6 }
  0x48   :  { %1064 = vmatpush1.bf16.msra.mxu1 %v4365_v11  ;;  %1022 = vmatprep.subr.bf16.mxu0 %v4346_v8 }
  0x49   :  { %1065 = vmatprep.subr.bf16.mxu1 %v4397_v17  ;;  %1052 = vmatprep.mubr.bf16.mxu0 %v5389_v1 }
  0x4a   :  { %1095 = vmatprep.mubr.bf16.mxu1 %v5389_v1 }
  0x4b   :  { %1023 = vmatpush1.bf16.msra.mxu0 %v4353_v9 }
  0x4c   :  { %1066 = vmatpush1.bf16.msra.mxu1 %v4392_v16  ;;  %1024 = vmatprep.subr.bf16.mxu0 %v4360_v10 }
  0x4d   :  { %1067 = vmatprep.subr.bf16.mxu1 %v4425_v21 }
  0x4f   :  { %1025 = vmatpush1.bf16.msra.mxu0 %v4379_v14 }
  0x50   :  { %1068 = vmatpush1.bf16.msra.mxu1 %v4418_v20  ;;  %1026 = vmatprep.subr.bf16.mxu0 %v4387_v15 }
  0x51   :  { %1069 = vmatprep.subr.bf16.mxu1 %v4445_v25 }
  0x53   :  { %1027 = vmatpush1.bf16.msra.mxu0 %v4406_v18 }
  0x54   :  { %1070 = vmatpush1.bf16.msra.mxu1 %v4452_v26  ;;  %1028 = vmatprep.subr.bf16.mxu0 %v4411_v19 }
  0x55   :  { %1071 = vmatprep.subr.bf16.mxu1 %v4468_v28 }
  0x57   :  { %1029 = vmatpush1.bf16.msra.mxu0 %v4433_v23 }
  0x58   :  { %1072 = vmatpush1.bf16.msra.mxu1 %v4480_v30  ;;  %1030 = vmatprep.subr.bf16.mxu0 %v4440_v24 }
  0x59   :  { %1073 = vmatprep.subr.bf16.mxu1 %v4495_v33 }
  0x5b   :  { %1031 = vmatpush1.bf16.msra.mxu0 %v4462_v27 }
  0x5c   :  { %1074 = vmatpush1.bf16.msra.mxu1 %v4502_v34  ;;  %1032 = vmatprep.subr.bf16.mxu0 %v4475_v29 }
  0x5d   :  { %1075 = vmatprep.subr.bf16.mxu1 %v4514_v36 }
  0x5f   :  { %1033 = vmatpush1.bf16.msra.mxu0 %v4489_v32 }
  0x60   :  { %1076 = vmatpush1.bf16.msra.mxu1 %v4531_v39  ;;  %1034 = vmatprep.subr.bf16.mxu0 %v4507_v35 }
  0x61   :  { %1077 = vmatprep.subr.bf16.mxu1 %v4539_v40 }
  0x63   :  { %1035 = vmatpush1.bf16.msra.mxu0 %v4521_v37 }
  0x64   :  { %1078 = vmatpush1.bf16.msra.mxu1 %v4544_v41  ;;  %1388 = vmatprep.subr.bf16.mxu0 %v4338_v7 }
  0x65   :  { %1431 = vmatprep.subr.bf16.mxu1 %v4370_v12 }
  0xc6   :  { %v4611_v48 = vpop.f32.mrf.mxu0 }
  0xc7   :  { %v4613_v49 = vpop.f32.mrf.mxu1 }
  0xc8   :  { %v4615_v50 = vpop.f32.mrf.mxu0 }
  0xc9   :  { %v4617_v51 = vpop.f32.mrf.mxu1 }
  0xca   :  { %v4622_v55 = vpop.f32.mrf.mxu0 }
  0xcb   :  { %v4624_v56 = vpop.f32.mrf.mxu1 }
  0xcc   :  { %v4626_v59 = vpop.f32.mrf.mxu0 }
  0xcd   :  { %v4628_v60 = vpop.f32.mrf.mxu1 }
  0xce   :  { %v197_v63 = vpop.f32.mrf.mxu0 }
  0xcf   :  { %v310_v0 = vpop.f32.mrf.mxu1  ;;  %v4639_v4 = vadd.f32 %v197_v63, %v4630_v61 }
  0xd0   :  { %v4642_v5 = vadd.f32 %v310_v0, %v4632_v62  ;;  %v199_v7 = vpop.f32.mrf.mxu0 }
  0xd1   :  { %v312_v12 = vpop.f32.mrf.mxu1  ;;  %v4645_v13 = vadd.f32 %v199_v7, %v4634_v2 }
  0xd2   :  { %v4648_v22 = vadd.f32 %v312_v12, %v4636_v3  ;;  %v201_v31 = vpop.f32.mrf.mxu0 }
  0xd3   :  { %v314_v38 = vpop.f32.mrf.mxu1  ;;  %v4651_v42 = vadd.f32 %v201_v31, %v4630_v61 }
  0xd4   :  { %v4654_v43 = vadd.f32 %v314_v38, %v4632_v62  ;;  %v203_v44 = vpop.f32.mrf.mxu0 }
  0xd5   :  { %v316_v45 = vpop.f32.mrf.mxu1  ;;  %v4657_v46 = vadd.f32 %v203_v44, %v4634_v2 }
  0xd6   :  { %5391 = vst [vmem:[#allocation5_spill] sm:$0xff] %v4654_v43  ;;  %v4660_v47 = vadd.f32 %v316_v45, %v4636_v3  ;;  %v207_v52 = vpop.f32.mrf.mxu0 }
  0xd7   :  { %v320_v53 = vpop.f32.mrf.mxu1  ;;  %v4663_v54 = vadd.f32 %v207_v52, %v4630_v61 }
  0xd8   :  { %v4666_v57 = vadd.f32 %v320_v53, %v4632_v62  ;;  %v209_v58 = vpop.f32.mrf.mxu0 }
  0xd9   :  { %5392 = vst [vmem:[#allocation6_spill] sm:$0xff] %v4663_v54  ;;  %v322_v63 = vpop.f32.mrf.mxu1  ;;  %v4669_v0 = vadd.f32 %v209_v58, %v4634_v2 }
  0xda   :  { %5393 = vst [vmem:[#allocation7_spill] sm:$0xff] %v4666_v57  ;;  %v4672_v7 = vadd.f32 %v322_v63, %v4636_v3  ;;  %v211_v12 = vpop.f32.mrf.mxu0 }
  0xdb   :  { %5394 = vst [vmem:[#allocation8_spill] sm:$0xff] %v4669_v0  ;;  %v324_v31 = vpop.f32.mrf.mxu1  ;;  %v4675_v38 = vadd.f32 %v211_v12, %v4630_v61 }
  0xdc   :  { %5395 = vst [vmem:[#allocation9_spill] sm:$0xff] %v4672_v7  ;;  %v4678_v44 = vadd.f32 %v324_v31, %v4632_v62  ;;  %v213_v45 = vpop.f32.mrf.mxu0 }
  0xdd   :  { %5396 = vst [vmem:[#allocation10_spill] sm:$0xff] %v4675_v38  ;;  %v326_v52 = vpop.f32.mrf.mxu1  ;;  %v4681_v53 = vadd.f32 %v213_v45, %v4634_v2 }
  0xde   :  { %5397 = vst [vmem:[#allocation11_spill] sm:$0xff] %v4678_v44  ;;  %v4684_v1 = vadd.f32 %v326_v52, %v4636_v3  ;;  %v217_v58 = vpop.f32.mrf.mxu0 }
  0xdf   :  { %5398 = vst [vmem:[#allocation12_spill] sm:$0xff] %v4681_v53  ;;  %v330_v57 = vpop.f32.mrf.mxu1  ;;  %v4687_v63 = vadd.f32 %v217_v58, %v4630_v61 }
  0xe0   :  { %5399 = vst [vmem:[#allocation13_spill] sm:$0xff] %v4684_v1  ;;  %v4690_v7 = vadd.f32 %v330_v57, %v4632_v62  ;;  %v219_v12 = vpop.f32.mrf.mxu0 }
  0xe1   :  { %5400 = vst [vmem:[#allocation14_spill] sm:$0xff] %v4687_v63  ;;  %v332_v38 = vpop.f32.mrf.mxu1  ;;  %v4693_v31 = vadd.f32 %v219_v12, %v4634_v2 }
  0xe2   :  { %5401 = vst [vmem:[#allocation15_spill] sm:$0xff] %v4690_v7  ;;  %v4696_v44 = vadd.f32 %v332_v38, %v4636_v3  ;;  %v221_v45 = vpop.f32.mrf.mxu0 }
  0xe3   :  { %5402 = vst [vmem:[#allocation16_spill] sm:$0xff] %v4693_v31  ;;  %v334_v53 = vpop.f32.mrf.mxu1  ;;  %v4699_v52 = vadd.f32 %v221_v45, %v4630_v61 }
  0xe4   :  { %5403 = vst [vmem:[#allocation17_spill] sm:$0xff] %v4696_v44  ;;  %v4702_v1 = vadd.f32 %v334_v53, %v4632_v62  ;;  %v223_v58 = vpop.f32.mrf.mxu0 }
  0xe5   :  { %5404 = vst [vmem:[#allocation18_spill] sm:$0xff] %v4699_v52  ;;  %v336_v63 = vpop.f32.mrf.mxu1  ;;  %v4705_v57 = vadd.f32 %v223_v58, %v4634_v2 }
  0xe6   :  { %5405 = vst [vmem:[#allocation19_spill] sm:$0xff] %v4702_v1  ;;  %v4708_v7 = vadd.f32 %v336_v63, %v4636_v3  ;;  %v227_v12 = vpop.f32.mrf.mxu0 }
  0xe7   :  { %5406 = vst [vmem:[#allocation20_spill] sm:$0xff] %v4705_v57  ;;  %v340_v31 = vpop.f32.mrf.mxu1  ;;  %v4711_v38 = vadd.f32 %v227_v12, %v4630_v61 }
  0xe8   :  { %5407 = vst [vmem:[#allocation21_spill] sm:$0xff] %v4708_v7  ;;  %v4714_v44 = vadd.f32 %v340_v31, %v4632_v62  ;;  %v229_v45 = vpop.f32.mrf.mxu0 }
  0xe9   :  { %5408 = vst [vmem:[#allocation22_spill] sm:$0xff] %v4711_v38  ;;  %v342_v52 = vpop.f32.mrf.mxu1  ;;  %v4717_v53 = vadd.f32 %v229_v45, %v4634_v2 }
  0xea   :  { %5409 = vst [vmem:[#allocation23_spill] sm:$0xff] %v4714_v44  ;;  %v4720_v1 = vadd.f32 %v342_v52, %v4636_v3  ;;  %v231_v58 = vpop.f32.mrf.mxu0 }
  0xeb   :  { %5410 = vst [vmem:[#allocation24_spill] sm:$0xff] %v4717_v53  ;;  %v344_v57 = vpop.f32.mrf.mxu1  ;;  %v4723_v63 = vadd.f32 %v231_v58, %v4630_v61 }
  0xec   :  { %5411 = vst [vmem:[#allocation25_spill] sm:$0xff] %v4720_v1  ;;  %v4726_v7 = vadd.f32 %v344_v57, %v4632_v62  ;;  %v233_v12 = vpop.f32.mrf.mxu0 }
  0xed   :  { %5412 = vst [vmem:[#allocation26_spill] sm:$0xff] %v4723_v63  ;;  %v346_v38 = vpop.f32.mrf.mxu1  ;;  %v4729_v31 = vadd.f32 %v233_v12, %v4634_v2 }
  0xee   :  { %5413 = vst [vmem:[#allocation27_spill] sm:$0xff] %v4726_v7  ;;  %v4732_v44 = vadd.f32 %v346_v38, %v4636_v3  ;;  %v237_v45 = vpop.f32.mrf.mxu0 }
  0xef   :  { %5414 = vst [vmem:[#allocation28_spill] sm:$0xff] %v4729_v31  ;;  %v350_v53 = vpop.f32.mrf.mxu1  ;;  %v4735_v52 = vadd.f32 %v237_v45, %v4630_v61 }
  0xf0   :  { %5415 = vst [vmem:[#allocation29_spill] sm:$0xff] %v4732_v44  ;;  %v4738_v1 = vadd.f32 %v350_v53, %v4632_v62  ;;  %v239_v58 = vpop.f32.mrf.mxu0 }
  0xf1   :  { %5416 = vst [vmem:[#allocation30_spill] sm:$0xff] %v4735_v52  ;;  %v352_v63 = vpop.f32.mrf.mxu1  ;;  %v4741_v57 = vadd.f32 %v239_v58, %v4634_v2 }
  0xf2   :  { %5417 = vst [vmem:[#allocation31_spill] sm:$0xff] %v4738_v1  ;;  %v4744_v7 = vadd.f32 %v352_v63, %v4636_v3  ;;  %v241_v12 = vpop.f32.mrf.mxu0 }
  0xf3   :  { %5418 = vst [vmem:[#allocation32_spill] sm:$0xff] %v4741_v57  ;;  %v354_v31 = vpop.f32.mrf.mxu1  ;;  %v4747_v38 = vadd.f32 %v241_v12, %v4630_v61 }
  0xf4   :  { %5419 = vst [vmem:[#allocation33_spill] sm:$0xff] %v4744_v7  ;;  %v4750_v44 = vadd.f32 %v354_v31, %v4632_v62  ;;  %v243_v45 = vpop.f32.mrf.mxu0 }
  0xf5   :  { %5420 = vst [vmem:[#allocation34_spill] sm:$0xff] %v4747_v38  ;;  %v356_v52 = vpop.f32.mrf.mxu1  ;;  %v4753_v53 = vadd.f32 %v243_v45, %v4634_v2 }
  0xf6   :  { %5421 = vst [vmem:[#allocation35_spill] sm:$0xff] %v4750_v44  ;;  %v4756_v1 = vadd.f32 %v356_v52, %v4636_v3  ;;  %v247_v58 = vpop.f32.mrf.mxu0 }
  0xf7   :  { %5422 = vst [vmem:[#allocation36_spill] sm:$0xff] %v4753_v53  ;;  %v360_v57 = vpop.f32.mrf.mxu1  ;;  %v4759_v63 = vadd.f32 %v247_v58, %v4630_v61 }
  0xf8   :  { %5423 = vst [vmem:[#allocation37_spill] sm:$0xff] %v4756_v1  ;;  %v4762_v7 = vadd.f32 %v360_v57, %v4632_v62  ;;  %v249_v12 = vpop.f32.mrf.mxu0 }
  0xf9   :  { %5424 = vst [vmem:[#allocation38_spill] sm:$0xff] %v4759_v63  ;;  %v362_v38 = vpop.f32.mrf.mxu1  ;;  %v4765_v31 = vadd.f32 %v249_v12, %v4634_v2 }
  0xfa   :  { %5425 = vst [vmem:[#allocation39_spill] sm:$0xff] %v4762_v7  ;;  %v4768_v44 = vadd.f32 %v362_v38, %v4636_v3  ;;  %v251_v45 = vpop.f32.mrf.mxu0 }
  0xfb   :  { %5426 = vst [vmem:[#allocation40_spill] sm:$0xff] %v4765_v31  ;;  %v364_v53 = vpop.f32.mrf.mxu1  ;;  %v4771_v52 = vadd.f32 %v251_v45, %v4630_v61 }
  0xfc   :  { %5427 = vst [vmem:[#allocation41_spill] sm:$0xff] %v4768_v44  ;;  %v4774_v1 = vadd.f32 %v364_v53, %v4632_v62  ;;  %v253_v58 = vpop.f32.mrf.mxu0 }
  0xfd   :  { %5428 = vst [vmem:[#allocation42_spill] sm:$0xff] %v4771_v52  ;;  %v366_v63 = vpop.f32.mrf.mxu1  ;;  %v4777_v57 = vadd.f32 %v253_v58, %v4634_v2 }
  0xfe   :  { %5429 = vst [vmem:[#allocation43_spill] sm:$0xff] %v4774_v1  ;;  %v4780_v7 = vadd.f32 %v366_v63, %v4636_v3  ;;  %v257_v12 = vpop.f32.mrf.mxu0 }
  0xff   :  { %5430 = vst [vmem:[#allocation44_spill] sm:$0xff] %v4777_v57  ;;  %v370_v31 = vpop.f32.mrf.mxu1  ;;  %v4783_v38 = vadd.f32 %v257_v12, %v4630_v61 }
 0x100   :  { %5431 = vst [vmem:[#allocation45_spill] sm:$0xff] %v4780_v7  ;;  %v4786_v44 = vadd.f32 %v370_v31, %v4632_v62  ;;  %v259_v45 = vpop.f32.mrf.mxu0  ;;  %v188_v31 = vadd.f32 %v4611_v48, %v4630_v61  ;;  %v194_v48 = vadd.f32 %v4626_v59, %v4634_v2 }
 0x101   :  { %5432 = vst [vmem:[#allocation46_spill] sm:$0xff] %v4783_v38  ;;  %v372_v52 = vpop.f32.mrf.mxu1  ;;  %v4789_v53 = vadd.f32 %v259_v45, %v4634_v2 }
 0x102   :  { %5433 = vst [vmem:[#allocation47_spill] sm:$0xff] %v4786_v44  ;;  %v4792_v1 = vadd.f32 %v372_v52, %v4636_v3  ;;  %v261_v58 = vpop.f32.mrf.mxu0 }
 0x103   :  { %5434 = vst [vmem:[#allocation48_spill] sm:$0xff] %v4789_v53  ;;  %v374_v57 = vpop.f32.mrf.mxu1  ;;  %v4795_v63 = vadd.f32 %v261_v58, %v4630_v61 }
 0x104   :  { %5435 = vst [vmem:[#allocation49_spill] sm:$0xff] %v4792_v1  ;;  %v4798_v7 = vadd.f32 %v374_v57, %v4632_v62  ;;  %v263_v12 = vpop.f32.mrf.mxu0  ;;  %v190_v1 = vadd.f32 %v4615_v50, %v4634_v2  ;;  %v192_v57 = vadd.f32 %v4622_v55, %v4630_v61  ;;  %v303_v55 = vadd.f32 %v4617_v51, %v4636_v3 }
 0x105   :  { %5436 = vst [vmem:[#allocation50_spill] sm:$0xff] %v4795_v63  ;;  %v376_v38 = vpop.f32.mrf.mxu1  ;;  %v4803_v44 = vadd.f32 %v263_v12, %v4634_v2  ;;  %v301_v61 = vadd.f32 %v4613_v49, %v4632_v62  ;;  %v307_v2 = vadd.f32 %v4628_v60, %v4636_v3 }
 0x106   :  { %5437 = vst [vmem:[#allocation51_spill] sm:$0xff] %v4798_v7  ;;  %v4806_v45 = vadd.f32 %v376_v38, %v4636_v3  ;;  %v687_v52 = vpop.f32.mrf.mxu0 }
 0x107   :  { %5438 = vst [vmem:[#allocation52_spill] sm:$0xff] %v4803_v44  ;;  %v739_v58 = vadd.f32 %v687_v52, %v188_v31  ;;  %v730_v63 = vpop.f32.mrf.mxu1 }
 0x108   :  { %5439 = vst [vmem:[#allocation53_spill] sm:$0xff] %v4806_v45  ;;  %v689_v53 = vpop.f32.mrf.mxu0 }
 0x109   :  { %v3450_v7 = vmul.f32 -1.442695, %v739_v58  ;;  %v740_v0 = vadd.f32 %v689_v53, %v190_v1  ;;  %v732_v38 = vpop.f32.mrf.mxu1 }
 0x10a   :  { %v691_v54 = vpop.f32.mrf.mxu0  ;;  %v742_v1 = vadd.f32 %v732_v38, %v303_v55 }
 0x10b   :  { %4029 = vpow2.f32 %v3450_v7  ;;  %v3452_v12 = vmul.f32 -1.442695, %v740_v0  ;;  %v743_v45 = vadd.f32 %v691_v54, %v192_v57  ;;  %v734_v31 = vpop.f32.mrf.mxu1  ;;  %v741_v54 = vadd.f32 %v730_v63, %v301_v61 }
 0x10c   :  { %v693_v44 = vpop.f32.mrf.mxu0  ;;  %v305_v0 = vadd.f32 %v4624_v56, %v4632_v62  ;;  %v3454_v7 = vmul.f32 -1.442695, %v742_v1 }
 0x10d   :  { %4031 = vpow2.f32 %v3452_v12  ;;  %v3451_v43 = vmul.f32 -1.442695, %v743_v45  ;;  %v744_v50 = vadd.f32 %v693_v44, %v194_v48  ;;  %v736_v59 = vpop.f32.mrf.mxu1 }
 0x10e   :  { %v745_v53 = vadd.f32 %v734_v31, %v305_v0 }
 0x10f   :  { %4033 = vpow2.f32 %v3451_v43  ;;  %v3453_v52 = vmul.f32 -1.442695, %v744_v50  ;;  %v746_v43 = vadd.f32 %v736_v59, %v307_v2 }
 0x111   :  { %4035 = vpow2.f32 %v3453_v52  ;;  %v3455_v58 = vmul.f32 -1.442695, %v746_v43 }
 0x112   :  { %4037 = vtanh.f32 %v741_v54 }
 0x113   :  { %4039 = vpow2.f32 %v3454_v7 }
 0x118   :  { %v4030_v44 = vpop.eup %4029 }
 0x119   :  { %v753_v45 = vadd.f32 1.0, %v4030_v44 }
 0x11a   :  { %v4032_v51 = vpop.eup %4031 }
 0x11b   :  { %4041 = vrcp.f32 %v753_v45  ;;  %v765_v57 = vadd.f32 1.0, %v4032_v51 }
 0x11c   :  { %v4034_v49 = vpop.eup %4033  ;;  %4043 = vtanh.f32 %v745_v53 }
 0x11d   :  { %4045 = vrcp.f32 %v765_v57  ;;  %v754_v48 = vadd.f32 1.0, %v4034_v49 }
 0x11e   :  { %v4036_v60 = vpop.eup %4035  ;;  %4047 = vpow2.f32 %v3455_v58 }
 0x11f   :  { %4049 = vrcp.f32 %v754_v48  ;;  %v766_v3 = vadd.f32 1.0, %v4036_v60  ;;  %v4038_v56 = vpop.eup %4037  ;;  %v5440_v48 = vmov 0  }
 0x120   :  { %v4040_v62 = vpop.eup %4039 }
 0x121   :  { %4051 = vrcp.f32 %v766_v3  ;;  %v779_v1 = vadd.f32 1.0, %v4040_v62 }
 0x123   :  { %4053 = vrcp.f32 %v779_v1 }
 0x128   :  { %v4042_v63 = vpop.eup %4041 }
 0x129   :  { %v4044_v12 = vpop.eup %4043  ;;  %v787_v38 = vmul.f32 %v4042_v63, %v4038_v56 }
 0x12a   :  { %v4046_v50 = vpop.eup %4045 }
 0x12b   :  { %v4048_v31 = vpop.eup %4047  ;;  %v785_v52 = vmul.f32 0.0, %v4046_v50 }
 0x12c   :  { %v4050_v55 = vpop.eup %4049  ;;  %v780_v54 = vadd.f32 1.0, %v4048_v31 }
 0x12d   :  { %v4822_v61 = vadd.f32 %v787_v38, %v785_v52  ;;  %v788_v59 = vmul.f32 %v4050_v55, %v4044_v12 }
 0x12e   :  { %v4052_v2 = vpop.eup %4051 }
 0x12f   :  { %v786_v0 = vmul.f32 0.0, %v4052_v2  ;;  %4055 = vtanh.f32 %v4822_v61 }
 0x130   :  { %4057 = vrcp.f32 %v780_v54  ;;  %v4054_v43 = vpop.eup %4053 }
 0x131   :  { %v4825_v7 = vadd.f32 %v788_v59, %v786_v0 }
 0x133   :  { %4059 = vtanh.f32 %v4825_v7 }
 0x13c   :  { %v4056_v44 = vpop.eup %4055 }
 0x13d   :  { %v4058_v53 = vpop.eup %4057  ;;  %v793_v51 = vmul.f32 %v4056_v44, %v4054_v43  ;;  %v4887_v43 = vld [vmem:[%s5386_s2 + $0xe4] ss:$16 sps:$4 sm:$0xff]   ;;  %v4892_v44 = vld [vmem:[%s5386_s2 + $0xec] ss:$16 sps:$4 sm:$0xff]  }
 0x140   :  { %v4060_v45 = vpop.eup %4059 }
 0x141   :  { %v794_v58 = vmul.f32 %v4060_v45, %v4058_v53  ;;  %v4897_v53 = vld [vmem:[%s5386_s2 + $0xe0] ss:$16 sps:$4 sm:$0xff]   ;;  %v4902_v45 = vld [vmem:[%s5386_s2 + $0xe8] ss:$16 sps:$4 sm:$0xff]  }
 0x143   :  { %v3778_v57 = vpack.c.bf16 %v794_v58, %v793_v51  ;;  %v4911_v51 = vld [vmem:[%s5386_s2 + $0xc4] ss:$16 sps:$4 sm:$0xff]   ;;  %v4916_v58 = vld [vmem:[%s5386_s2 + $0xcc] ss:$16 sps:$4 sm:$0xff]  }
 0x145   :  { %3779 = vst [vmem:[#allocation3] sm:$0xff] %v3778_v57   ;;  %3784 = vst [vmem:[%s5388_s4] sm:$0xff] %v3778_v57   ;;  %v4921_v57 = vld [vmem:[%s5386_s2 + $0xc0] ss:$16 sps:$4 sm:$0xff]  }
 0x14c   :  { %v3926_v49 = vld [vmem:[#allocation3] sm:$0xff]  }
 0x14d   :  { %1053 = vmatmul.mubr.bf16.vlgmr.msra.gmra.mxu0 %v3926_v49  ;;  %1096 = vmatmul.mubr.bf16.vlgmr.msra.gmra.mxu1 %v3926_v49  ;;  %v4926_v49 = vld [vmem:[%s5386_s2 + $0xc8] ss:$16 sps:$4 sm:$0xff]  }
 0x14e   :  { %1389 = vmatpush1.bf16.msra.mxu0 %v4333_v6  ;;  %1432 = vmatpush1.bf16.msra.mxu1 %v4365_v11 }
 0x14f   :  { %1390 = vmatprep.subr.bf16.mxu0 %v4346_v8  ;;  %1433 = vmatprep.subr.bf16.mxu1 %v4397_v17 }
 0x150   :  { %1420 = vmatprep.mubr.bf16.mxu0 %v5440_v48  ;;  %1463 = vmatprep.mubr.bf16.mxu1 %v5440_v48 }
 0x152   :  { %1391 = vmatpush1.bf16.msra.mxu0 %v4353_v9  ;;  %1434 = vmatpush1.bf16.msra.mxu1 %v4392_v16 }
 0x153   :  { %1392 = vmatprep.subr.bf16.mxu0 %v4360_v10  ;;  %1435 = vmatprep.subr.bf16.mxu1 %v4425_v21 }
 0x156   :  { %1393 = vmatpush1.bf16.msra.mxu0 %v4379_v14  ;;  %1436 = vmatpush1.bf16.msra.mxu1 %v4418_v20 }
 0x157   :  { %1394 = vmatprep.subr.bf16.mxu0 %v4387_v15  ;;  %1437 = vmatprep.subr.bf16.mxu1 %v4445_v25 }
 0x15a   :  { %1395 = vmatpush1.bf16.msra.mxu0 %v4406_v18  ;;  %1438 = vmatpush1.bf16.msra.mxu1 %v4452_v26 }
 0x15b   :  { %1396 = vmatprep.subr.bf16.mxu0 %v4411_v19  ;;  %1439 = vmatprep.subr.bf16.mxu1 %v4468_v28 }
 0x15e   :  { %1397 = vmatpush1.bf16.msra.mxu0 %v4433_v23  ;;  %1440 = vmatpush1.bf16.msra.mxu1 %v4480_v30 }
 0x15f   :  { %1398 = vmatprep.subr.bf16.mxu0 %v4440_v24  ;;  %1441 = vmatprep.subr.bf16.mxu1 %v4495_v33 }
 0x162   :  { %1399 = vmatpush1.bf16.msra.mxu0 %v4462_v27  ;;  %1442 = vmatpush1.bf16.msra.mxu1 %v4502_v34 }
 0x163   :  { %1400 = vmatprep.subr.bf16.mxu0 %v4475_v29  ;;  %1443 = vmatprep.subr.bf16.mxu1 %v4514_v36 }
 0x166   :  { %1401 = vmatpush1.bf16.msra.mxu0 %v4489_v32  ;;  %1444 = vmatpush1.bf16.msra.mxu1 %v4531_v39  ;;  %v5441_v32 = vld [vmem:[#allocation5_spill] sm:$0xff] }
 0x167   :  { %1402 = vmatprep.subr.bf16.mxu0 %v4507_v35  ;;  %1445 = vmatprep.subr.bf16.mxu1 %v4539_v40 }
 0x16a   :  { %1403 = vmatpush1.bf16.msra.mxu0 %v4521_v37  ;;  %1446 = vmatpush1.bf16.msra.mxu1 %v4544_v41 }
 0x16b   :  { %1756 = vmatprep.subr.bf16.mxu0 %v4887_v43  ;;  %1799 = vmatprep.subr.bf16.mxu1 %v4892_v44 }
 0x20d   :  { %v1054_v6 = vpop.f32.mrf.mxu0  ;;  %v1097_v9 = vpop.f32.mrf.mxu1 }
 0x20e   :  { %v1106_v8 = vadd.f32 %v1054_v6, %v4639_v4  ;;  %v1108_v27 = vadd.f32 %v1097_v9, %v4642_v5  ;;  %v4935_v6 = vld [vmem:[%s5386_s2 + $0xa4] ss:$16 sps:$4 sm:$0xff]   ;;  %v4945_v9 = vld [vmem:[%s5386_s2 + $0xa0] ss:$16 sps:$4 sm:$0xff]  }
 0x20f   :  { %v1056_v10 = vpop.f32.mrf.mxu0  ;;  %v1099_v17 = vpop.f32.mrf.mxu1 }
 0x210   :  { %v3491_v11 = vmul.f32 -1.442695, %v1106_v8  ;;  %v1107_v14 = vadd.f32 %v1056_v10, %v4645_v13  ;;  %v1109_v25 = vadd.f32 %v1099_v17, %v4648_v22  ;;  %v4940_v8 = vld [vmem:[%s5386_s2 + $0xac] ss:$16 sps:$4 sm:$0xff]   ;;  %v4950_v10 = vld [vmem:[%s5386_s2 + $0xa8] ss:$16 sps:$4 sm:$0xff]  }
 0x211   :  { %v1058_v15 = vpop.f32.mrf.mxu0  ;;  %v1101_v23 = vpop.f32.mrf.mxu1  ;;  %v4983_v17 = vld [vmem:[%s5386_s2 + $0x64] ss:$16 sps:$4 sm:$0xff]  }
 0x212   :  { %4061 = vpow2.f32 %v3491_v11  ;;  %v3493_v16 = vmul.f32 -1.442695, %v1107_v14  ;;  %v1110_v18 = vadd.f32 %v1058_v15, %v4651_v42  ;;  %v3495_v28 = vmul.f32 -1.442695, %v1109_v25  ;;  %v4959_v11 = vld [vmem:[%s5386_s2 + $0x84] ss:$16 sps:$4 sm:$0xff]  }
 0x213   :  { %v1060_v19 = vpop.f32.mrf.mxu0  ;;  %v1103_v26 = vpop.f32.mrf.mxu1  ;;  %v1112_v33 = vadd.f32 %v1101_v23, %v5441_v32  ;;  %v4964_v14 = vld [vmem:[%s5386_s2 + $0x8c] ss:$16 sps:$4 sm:$0xff]   ;;  %v4969_v15 = vld [vmem:[%s5386_s2 + $0x80] ss:$16 sps:$4 sm:$0xff]   ;;  %v5022_v25 = vld [vmem:[%s5386_s2 + $0x48] ss:$16 sps:$4 sm:$0xff]  }
 0x214   :  { %4063 = vpow2.f32 %v3493_v16  ;;  %v3492_v20 = vmul.f32 -1.442695, %v1110_v18  ;;  %v1111_v21 = vadd.f32 %v1060_v19, %v4657_v46  ;;  %v1113_v29 = vadd.f32 %v1103_v26, %v4660_v47  ;;  %v4974_v16 = vld [vmem:[%s5386_s2 + $0x88] ss:$16 sps:$4 sm:$0xff]   ;;  %v4988_v18 = vld [vmem:[%s5386_s2 + $0x6c] ss:$16 sps:$4 sm:$0xff]  }
 0x215   :  { %v4993_v19 = vld [vmem:[%s5386_s2 + $0x60] ss:$16 sps:$4 sm:$0xff]   ;;  %v5012_v23 = vld [vmem:[%s5386_s2 + $0x4c] ss:$16 sps:$4 sm:$0xff]   ;;  %v5029_v26 = vld [vmem:[%s5386_s2 + $0x24] ss:$16 sps:$4 sm:$0xff]  }
 0x216   :  { %4065 = vpow2.f32 %v3492_v20  ;;  %v3494_v24 = vmul.f32 -1.442695, %v1111_v21  ;;  %v3496_v36 = vmul.f32 -1.442695, %v1113_v29  ;;  %v4998_v20 = vld [vmem:[%s5386_s2 + $0x68] ss:$16 sps:$4 sm:$0xff]  }
 0x217   :  { %v5007_v21 = vld [vmem:[%s5386_s2 + $0x44] ss:$16 sps:$4 sm:$0xff]   ;;  %v5046_v29 = vld [vmem:[%s5386_s2 + $0x2c] ss:$16 sps:$4 sm:$0xff]  }
 0x218   :  { %4067 = vpow2.f32 %v3494_v24  ;;  %v5017_v24 = vld [vmem:[%s5386_s2 + $0x40] ss:$16 sps:$4 sm:$0xff]   ;;  %v5057_v32 = vld [vmem:[%s5386_s2 + $0xc] ss:$16 sps:$4 sm:$0xff]  }
 0x219   :  { %4069 = vtanh.f32 %v1108_v27  ;;  %v5036_v27 = vld [vmem:[%s5386_s2 + $0x20] ss:$16 sps:$4 sm:$0xff]  }
 0x21a   :  { %4071 = vpow2.f32 %v3495_v28  ;;  %v5041_v28 = vld [vmem:[%s5386_s2 + $0x28] ss:$16 sps:$4 sm:$0xff]  }
 0x21f   :  { %v4062_v30 = vpop.eup %4061 }
 0x220   :  { %v1120_v34 = vadd.f32 1.0, %v4062_v30  ;;  %v5052_v30 = vld [vmem:[%s5386_s2 + $0x4] ss:$16 sps:$4 sm:$0xff]  }
 0x221   :  { %v4064_v35 = vpop.eup %4063 }
 0x222   :  { %4073 = vrcp.f32 %v1120_v34  ;;  %v1132_v37 = vadd.f32 1.0, %v4064_v35  ;;  %v5070_v34 = vld [vmem:[%s5386_s2 + $0x8] ss:$16 sps:$4 sm:$0xff]  }
 0x223   :  { %v4066_v39 = vpop.eup %4065  ;;  %4075 = vtanh.f32 %v1112_v33  ;;  %v5065_v33 = vld [vmem:[%s5386_s2] ss:$16 sps:$4 sm:$0xff]  }
 0x224   :  { %4077 = vrcp.f32 %v1132_v37  ;;  %v1121_v40 = vadd.f32 1.0, %v4066_v39 }
 0x225   :  { %v4068_v41 = vpop.eup %4067  ;;  %4079 = vpow2.f32 %v3496_v36  ;;  %v5442_v36 = vld [vmem:[#allocation6_spill] sm:$0xff] }
 0x226   :  { %4081 = vrcp.f32 %v1121_v40  ;;  %v1133_v4 = vadd.f32 1.0, %v4068_v41  ;;  %v4070_v5 = vpop.eup %4069 }
 0x227   :  { %v4072_v13 = vpop.eup %4071 }
 0x228   :  { %4083 = vrcp.f32 %v1133_v4  ;;  %v1146_v62 = vadd.f32 1.0, %v4072_v13  ;;  %v5443_v4 = vld [vmem:[#allocation8_spill] sm:$0xff] }
 0x22a   :  { %4085 = vrcp.f32 %v1146_v62 }
 0x22f   :  { %v4074_v22 = vpop.eup %4073 }
 0x230   :  { %v4076_v42 = vpop.eup %4075  ;;  %v1154_v46 = vmul.f32 %v4074_v22, %v4070_v5 }
 0x231   :  { %v4078_v47 = vpop.eup %4077 }
 0x232   :  { %v4080_v60 = vpop.eup %4079  ;;  %v1152_v3 = vmul.f32 %v4078_v47, %v4822_v61 }
 0x233   :  { %v4082_v56 = vpop.eup %4081  ;;  %v1147_v50 = vadd.f32 1.0, %v4080_v60 }
 0x234   :  { %v4872_v63 = vadd.f32 %v1154_v46, %v1152_v3  ;;  %v1155_v12 = vmul.f32 %v4082_v56, %v4076_v42  ;;  %v5444_v46 = vld [vmem:[#allocation10_spill] sm:$0xff]  ;;  %v5445_v56 = vld [vmem:[#allocation12_spill] sm:$0xff] }
 0x235   :  { %v4084_v38 = vpop.eup %4083 }
 0x236   :  { %v1153_v31 = vmul.f32 %v4084_v38, %v4825_v7  ;;  %4087 = vtanh.f32 %v4872_v63 }
 0x237   :  { %4089 = vrcp.f32 %v1147_v50  ;;  %v4086_v55 = vpop.eup %4085  ;;  %v5446_v50 = vld [vmem:[#allocation9_spill] sm:$0xff] }
 0x238   :  { %v4876_v52 = vadd.f32 %v1155_v12, %v1153_v31 }
 0x23a   :  { %4091 = vtanh.f32 %v4876_v52 }
 0x243   :  { %v4088_v1 = vpop.eup %4087 }
 0x244   :  { %v4090_v61 = vpop.eup %4089  ;;  %v1160_v2 = vmul.f32 %v4088_v1, %v4086_v55  ;;  %v5447_v1 = vld [vmem:[#allocation7_spill] sm:$0xff] }
 0x247   :  { %v4092_v59 = vpop.eup %4091 }
 0x248   :  { %v1161_v54 = vmul.f32 %v4092_v59, %v4090_v61 }
 0x24a   :  { %v3788_v0 = vpack.c.bf16 %v1161_v54, %v1160_v2  ;;  %v5448_v2 = vld [vmem:[#allocation13_spill] sm:$0xff] }
 0x24c   :  { %3789 = vst [vmem:[#allocation3] sm:$0xff] %v3788_v0   ;;  %3855 = vst [vmem:[%s5388_s4 + $0x8] sm:$0xff] %v3788_v0  }
 0x253   :  { %v3927_v7 = vld [vmem:[#allocation3] sm:$0xff]  }
 0x254   :  { %1421 = vmatmul.mubr.bf16.vlgmr.msra.gmra.mxu0 %v3927_v7  ;;  %1464 = vmatmul.mubr.bf16.vlgmr.msra.gmra.mxu1 %v3927_v7  ;;  %v5449_v7 = vld [vmem:[#allocation11_spill] sm:$0xff] }
 0x255   :  { %1788 = vmatprep.mubr.bf16.mxu0 %v5440_v48  ;;  %1831 = vmatprep.mubr.bf16.mxu1 %v5440_v48 }
 0x256   :  { %1757 = vmatpush1.bf16.msra.mxu0 %v4897_v53  ;;  %1800 = vmatpush1.bf16.msra.mxu1 %v4902_v45 }
 0x257   :  { %1758 = vmatprep.subr.bf16.mxu0 %v4911_v51  ;;  %1801 = vmatprep.subr.bf16.mxu1 %v4916_v58 }
 0x25a   :  { %1759 = vmatpush1.bf16.msra.mxu0 %v4921_v57  ;;  %1802 = vmatpush1.bf16.msra.mxu1 %v4926_v49 }
 0x25b   :  { %1760 = vmatprep.subr.bf16.mxu0 %v4935_v6  ;;  %1803 = vmatprep.subr.bf16.mxu1 %v4940_v8 }
 0x25e   :  { %1761 = vmatpush1.bf16.msra.mxu0 %v4945_v9  ;;  %1804 = vmatpush1.bf16.msra.mxu1 %v4950_v10 }
 0x25f   :  { %1762 = vmatprep.subr.bf16.mxu0 %v4959_v11  ;;  %1805 = vmatprep.subr.bf16.mxu1 %v4964_v14 }
 0x262   :  { %1763 = vmatpush1.bf16.msra.mxu0 %v4969_v15  ;;  %1806 = vmatpush1.bf16.msra.mxu1 %v4974_v16 }
 0x263   :  { %1764 = vmatprep.subr.bf16.mxu0 %v4983_v17  ;;  %1807 = vmatprep.subr.bf16.mxu1 %v4988_v18 }
 0x266   :  { %1765 = vmatpush1.bf16.msra.mxu0 %v4993_v19  ;;  %1808 = vmatpush1.bf16.msra.mxu1 %v4998_v20 }
 0x267   :  { %1766 = vmatprep.subr.bf16.mxu0 %v5007_v21  ;;  %1809 = vmatprep.subr.bf16.mxu1 %v5012_v23 }
 0x26a   :  { %1767 = vmatpush1.bf16.msra.mxu0 %v5017_v24  ;;  %1810 = vmatpush1.bf16.msra.mxu1 %v5022_v25 }
 0x26b   :  { %1768 = vmatprep.subr.bf16.mxu0 %v5029_v26  ;;  %1811 = vmatprep.subr.bf16.mxu1 %v5046_v29 }
 0x26e   :  { %1769 = vmatpush1.bf16.msra.mxu0 %v5036_v27  ;;  %1812 = vmatpush1.bf16.msra.mxu1 %v5041_v28 }
 0x26f   :  { %1770 = vmatprep.subr.bf16.mxu0 %v5052_v30  ;;  %1813 = vmatprep.subr.bf16.mxu1 %v5057_v32 }
 0x272   :  { %1771 = vmatpush1.bf16.msra.mxu0 %v5065_v33  ;;  %1814 = vmatpush1.bf16.msra.mxu1 %v5070_v34 }
 0x273   :  { %2124 = vmatprep.subr.bf16.mxu0 %v4887_v43  ;;  %2167 = vmatprep.subr.bf16.mxu1 %v4892_v44 }
 0x314   :  { %v1422_v35 = vpop.f32.mrf.mxu0  ;;  %v1465_v39 = vpop.f32.mrf.mxu1 }
 0x315   :  { %v1474_v37 = vadd.f32 %v1422_v35, %v5442_v36  ;;  %v1476_v61 = vadd.f32 %v1465_v39, %v5447_v1 }
 0x316   :  { %v1424_v40 = vpop.f32.mrf.mxu0  ;;  %v1467_v42 = vpop.f32.mrf.mxu1 }
 0x317   :  { %v3534_v41 = vmul.f32 -1.442695, %v1474_v37  ;;  %v1475_v5 = vadd.f32 %v1424_v40, %v5443_v4  ;;  %v1477_v31 = vadd.f32 %v1467_v42, %v5446_v50 }
 0x318   :  { %v1426_v13 = vpop.f32.mrf.mxu0  ;;  %v1469_v12 = vpop.f32.mrf.mxu1 }
 0x319   :  { %4093 = vpow2.f32 %v3534_v41  ;;  %v3536_v22 = vmul.f32 -1.442695, %v1475_v5  ;;  %v1478_v47 = vadd.f32 %v1426_v13, %v5444_v46  ;;  %v3538_v59 = vmul.f32 -1.442695, %v1477_v31 }
 0x31a   :  { %v1428_v60 = vpop.f32.mrf.mxu0  ;;  %v1471_v55 = vpop.f32.mrf.mxu1  ;;  %v1480_v35 = vadd.f32 %v1469_v12, %v5449_v7 }
 0x31b   :  { %4095 = vpow2.f32 %v3536_v22  ;;  %v3535_v3 = vmul.f32 -1.442695, %v1478_v47  ;;  %v1479_v62 = vadd.f32 %v1428_v60, %v5445_v56  ;;  %v1481_v54 = vadd.f32 %v1471_v55, %v5448_v2 }
 0x31d   :  { %4097 = vpow2.f32 %v3535_v3  ;;  %v3537_v38 = vmul.f32 -1.442695, %v1479_v62  ;;  %v3539_v40 = vmul.f32 -1.442695, %v1481_v54 }
 0x31f   :  { %4099 = vpow2.f32 %v3537_v38 }
 0x320   :  { %4101 = vtanh.f32 %v1476_v61 }
 0x321   :  { %4103 = vpow2.f32 %v3538_v59 }
 0x326   :  { %v4094_v0 = vpop.eup %4093 }
 0x327   :  { %v1488_v36 = vadd.f32 1.0, %v4094_v0 }
 0x328   :  { %v4096_v37 = vpop.eup %4095 }
 0x329   :  { %4105 = vrcp.f32 %v1488_v36  ;;  %v1500_v41 = vadd.f32 1.0, %v4096_v37 }
 0x32a   :  { %v4098_v4 = vpop.eup %4097  ;;  %4107 = vtanh.f32 %v1480_v35 }
 0x32b   :  { %4109 = vrcp.f32 %v1500_v41  ;;  %v1489_v5 = vadd.f32 1.0, %v4098_v4 }
 0x32c   :  { %v4100_v13 = vpop.eup %4099  ;;  %4111 = vpow2.f32 %v3539_v40  ;;  %v5450_v40 = vld [vmem:[#allocation14_spill] sm:$0xff] }
 0x32d   :  { %4113 = vrcp.f32 %v1489_v5  ;;  %v1501_v39 = vadd.f32 1.0, %v4100_v13  ;;  %v4102_v22 = vpop.eup %4101 }
 0x32e   :  { %v4104_v42 = vpop.eup %4103 }
 0x32f   :  { %4115 = vrcp.f32 %v1501_v39  ;;  %v1514_v38 = vadd.f32 1.0, %v4104_v42  ;;  %v5451_v39 = vld [vmem:[#allocation16_spill] sm:$0xff] }
 0x331   :  { %4117 = vrcp.f32 %v1514_v38 }
 0x336   :  { %v4106_v46 = vpop.eup %4105 }
 0x337   :  { %v4108_v47 = vpop.eup %4107  ;;  %v1522_v60 = vmul.f32 %v4106_v46, %v4102_v22 }
 0x338   :  { %v4110_v3 = vpop.eup %4109 }
 0x339   :  { %v4112_v56 = vpop.eup %4111  ;;  %v1520_v62 = vmul.f32 %v4110_v3, %v4872_v63 }
 0x33a   :  { %v4114_v12 = vpop.eup %4113  ;;  %v1515_v1 = vadd.f32 1.0, %v4112_v56 }
 0x33b   :  { %v5087_v50 = vadd.f32 %v1522_v60, %v1520_v62  ;;  %v1523_v31 = vmul.f32 %v4114_v12, %v4108_v47  ;;  %v5452_v60 = vld [vmem:[#allocation18_spill] sm:$0xff]  ;;  %v5453_v12 = vld [vmem:[#allocation20_spill] sm:$0xff] }
 0x33c   :  { %v4116_v55 = vpop.eup %4115 }
 0x33d   :  { %v1521_v61 = vmul.f32 %v4116_v55, %v4876_v52  ;;  %4119 = vtanh.f32 %v5087_v50 }
 0x33e   :  { %4121 = vrcp.f32 %v1515_v1  ;;  %v4118_v2 = vpop.eup %4117  ;;  %v5454_v1 = vld [vmem:[#allocation17_spill] sm:$0xff] }
 0x33f   :  { %v5091_v59 = vadd.f32 %v1523_v31, %v1521_v61 }
 0x341   :  { %4123 = vtanh.f32 %v5091_v59 }
 0x34a   :  { %v4120_v54 = vpop.eup %4119 }
 0x34b   :  { %v4122_v63 = vpop.eup %4121  ;;  %v1528_v7 = vmul.f32 %v4120_v54, %v4118_v2  ;;  %v5455_v54 = vld [vmem:[#allocation15_spill] sm:$0xff] }
 0x34e   :  { %v4124_v0 = vpop.eup %4123 }
 0x34f   :  { %v1529_v35 = vmul.f32 %v4124_v0, %v4122_v63 }
 0x351   :  { %v3798_v36 = vpack.c.bf16 %v1529_v35, %v1528_v7  ;;  %v5456_v7 = vld [vmem:[#allocation21_spill] sm:$0xff] }
 0x353   :  { %3799 = vst [vmem:[#allocation3] sm:$0xff] %v3798_v36   ;;  %3856 = vst [vmem:[%s5388_s4 + $0x10] sm:$0xff] %v3798_v36  }
 0x35a   :  { %v3976_v52 = vld [vmem:[#allocation3] sm:$0xff]  }
 0x35b   :  { %1789 = vmatmul.mubr.bf16.vlgmr.msra.gmra.mxu0 %v3976_v52  ;;  %1832 = vmatmul.mubr.bf16.vlgmr.msra.gmra.mxu1 %v3976_v52  ;;  %v5457_v52 = vld [vmem:[#allocation19_spill] sm:$0xff] }
 0x35c   :  { %2125 = vmatpush1.bf16.msra.mxu0 %v4897_v53  ;;  %2168 = vmatpush1.bf16.msra.mxu1 %v4902_v45 }
 0x35d   :  { %2126 = vmatprep.subr.bf16.mxu0 %v4911_v51  ;;  %2169 = vmatprep.subr.bf16.mxu1 %v4916_v58 }
 0x35e   :  { %2156 = vmatprep.mubr.bf16.mxu0 %v5440_v48  ;;  %2199 = vmatprep.mubr.bf16.mxu1 %v5440_v48 }
 0x360   :  { %2127 = vmatpush1.bf16.msra.mxu0 %v4921_v57  ;;  %2170 = vmatpush1.bf16.msra.mxu1 %v4926_v49 }
 0x361   :  { %2128 = vmatprep.subr.bf16.mxu0 %v4935_v6  ;;  %2171 = vmatprep.subr.bf16.mxu1 %v4940_v8 }
 0x364   :  { %2129 = vmatpush1.bf16.msra.mxu0 %v4945_v9  ;;  %2172 = vmatpush1.bf16.msra.mxu1 %v4950_v10 }
 0x365   :  { %2130 = vmatprep.subr.bf16.mxu0 %v4959_v11  ;;  %2173 = vmatprep.subr.bf16.mxu1 %v4964_v14 }
 0x368   :  { %2131 = vmatpush1.bf16.msra.mxu0 %v4969_v15  ;;  %2174 = vmatpush1.bf16.msra.mxu1 %v4974_v16 }
 0x369   :  { %2132 = vmatprep.subr.bf16.mxu0 %v4983_v17  ;;  %2175 = vmatprep.subr.bf16.mxu1 %v4988_v18 }
 0x36c   :  { %2133 = vmatpush1.bf16.msra.mxu0 %v4993_v19  ;;  %2176 = vmatpush1.bf16.msra.mxu1 %v4998_v20 }
 0x36d   :  { %2134 = vmatprep.subr.bf16.mxu0 %v5007_v21  ;;  %2177 = vmatprep.subr.bf16.mxu1 %v5012_v23 }
 0x370   :  { %2135 = vmatpush1.bf16.msra.mxu0 %v5017_v24  ;;  %2178 = vmatpush1.bf16.msra.mxu1 %v5022_v25 }
 0x371   :  { %2136 = vmatprep.subr.bf16.mxu0 %v5029_v26  ;;  %2179 = vmatprep.subr.bf16.mxu1 %v5046_v29 }
 0x374   :  { %2137 = vmatpush1.bf16.msra.mxu0 %v5036_v27  ;;  %2180 = vmatpush1.bf16.msra.mxu1 %v5041_v28 }
 0x375   :  { %2138 = vmatprep.subr.bf16.mxu0 %v5052_v30  ;;  %2181 = vmatprep.subr.bf16.mxu1 %v5057_v32 }
 0x378   :  { %2139 = vmatpush1.bf16.msra.mxu0 %v5065_v33  ;;  %2182 = vmatpush1.bf16.msra.mxu1 %v5070_v34 }
 0x379   :  { %2492 = vmatprep.subr.bf16.mxu0 %v4887_v43  ;;  %2535 = vmatprep.subr.bf16.mxu1 %v4892_v44 }
 0x41b   :  { %v1790_v37 = vpop.f32.mrf.mxu0  ;;  %v1833_v4 = vpop.f32.mrf.mxu1 }
 0x41c   :  { %v1842_v41 = vadd.f32 %v1790_v37, %v5450_v40  ;;  %v1844_v63 = vadd.f32 %v1833_v4, %v5455_v54 }
 0x41d   :  { %v1792_v5 = vpop.f32.mrf.mxu0  ;;  %v1835_v47 = vpop.f32.mrf.mxu1 }
 0x41e   :  { %v3577_v13 = vmul.f32 -1.442695, %v1842_v41  ;;  %v1843_v22 = vadd.f32 %v1792_v5, %v5451_v39  ;;  %v1845_v61 = vadd.f32 %v1835_v47, %v5454_v1 }
 0x41f   :  { %v1794_v42 = vpop.f32.mrf.mxu0  ;;  %v1837_v31 = vpop.f32.mrf.mxu1 }
 0x420   :  { %4125 = vpow2.f32 %v3577_v13  ;;  %v3579_v46 = vmul.f32 -1.442695, %v1843_v22  ;;  %v1846_v3 = vadd.f32 %v1794_v42, %v5452_v60  ;;  %v3581_v0 = vmul.f32 -1.442695, %v1845_v61 }
 0x421   :  { %v1796_v56 = vpop.f32.mrf.mxu0  ;;  %v1839_v2 = vpop.f32.mrf.mxu1  ;;  %v1848_v37 = vadd.f32 %v1837_v31, %v5457_v52 }
 0x422   :  { %4127 = vpow2.f32 %v3579_v46  ;;  %v3578_v62 = vmul.f32 -1.442695, %v1846_v3  ;;  %v1847_v38 = vadd.f32 %v1796_v56, %v5453_v12  ;;  %v1849_v35 = vadd.f32 %v1839_v2, %v5456_v7 }
 0x424   :  { %4129 = vpow2.f32 %v3578_v62  ;;  %v3580_v55 = vmul.f32 -1.442695, %v1847_v38  ;;  %v3582_v5 = vmul.f32 -1.442695, %v1849_v35 }
 0x426   :  { %4131 = vpow2.f32 %v3580_v55 }
 0x427   :  { %4133 = vtanh.f32 %v1844_v63 }
 0x428   :  { %4135 = vpow2.f32 %v3581_v0 }
 0x42d   :  { %v4126_v36 = vpop.eup %4125 }
 0x42e   :  { %v1856_v40 = vadd.f32 1.0, %v4126_v36 }
 0x42f   :  { %v4128_v41 = vpop.eup %4127 }
 0x430   :  { %4137 = vrcp.f32 %v1856_v40  ;;  %v1868_v13 = vadd.f32 1.0, %v4128_v41 }
 0x431   :  { %v4130_v39 = vpop.eup %4129  ;;  %4139 = vtanh.f32 %v1848_v37 }
 0x432   :  { %4141 = vrcp.f32 %v1868_v13  ;;  %v1857_v22 = vadd.f32 1.0, %v4130_v39 }
 0x433   :  { %v4132_v42 = vpop.eup %4131  ;;  %4143 = vpow2.f32 %v3582_v5  ;;  %v5458_v5 = vld [vmem:[#allocation22_spill] sm:$0xff] }
 0x434   :  { %4145 = vrcp.f32 %v1857_v22  ;;  %v1869_v4 = vadd.f32 1.0, %v4132_v42  ;;  %v4134_v46 = vpop.eup %4133 }
 0x435   :  { %v4136_v47 = vpop.eup %4135 }
 0x436   :  { %4147 = vrcp.f32 %v1869_v4  ;;  %v1882_v55 = vadd.f32 1.0, %v4136_v47  ;;  %v5459_v4 = vld [vmem:[#allocation24_spill] sm:$0xff] }
 0x438   :  { %4149 = vrcp.f32 %v1882_v55 }
 0x43d   :  { %v4138_v60 = vpop.eup %4137 }
 0x43e   :  { %v4140_v3 = vpop.eup %4139  ;;  %v1890_v56 = vmul.f32 %v4138_v60, %v4134_v46 }
 0x43f   :  { %v4142_v62 = vpop.eup %4141 }
 0x440   :  { %v4144_v12 = vpop.eup %4143  ;;  %v1888_v38 = vmul.f32 %v4142_v62, %v5087_v50 }
 0x441   :  { %v4146_v31 = vpop.eup %4145  ;;  %v1883_v54 = vadd.f32 1.0, %v4144_v12 }
 0x442   :  { %v5140_v1 = vadd.f32 %v1890_v56, %v1888_v38  ;;  %v1891_v61 = vmul.f32 %v4146_v31, %v4140_v3  ;;  %v5460_v56 = vld [vmem:[#allocation26_spill] sm:$0xff] }
 0x443   :  { %v4148_v2 = vpop.eup %4147 }
 0x444   :  { %v1889_v63 = vmul.f32 %v4148_v2, %v5091_v59  ;;  %4151 = vtanh.f32 %v5140_v1 }
 0x445   :  { %4153 = vrcp.f32 %v1883_v54  ;;  %v4150_v7 = vpop.eup %4149 }
 0x446   :  { %v5144_v0 = vadd.f32 %v1891_v61, %v1889_v63  ;;  %v5462_v61 = vld [vmem:[#allocation25_spill] sm:$0xff]  ;;  %v5463_v63 = vld [vmem:[#allocation23_spill] sm:$0xff] }
 0x448   :  { %4155 = vtanh.f32 %v5144_v0 }
 0x451   :  { %v4152_v35 = vpop.eup %4151 }
 0x452   :  { %v4154_v50 = vpop.eup %4153  ;;  %v1896_v52 = vmul.f32 %v4152_v35, %v4150_v7 }
 0x455   :  { %v4156_v36 = vpop.eup %4155 }
 0x456   :  { %v1897_v37 = vmul.f32 %v4156_v36, %v4154_v50  ;;  %v5464_v50 = vld [vmem:[#allocation29_spill] sm:$0xff] }
 0x458   :  { %v3808_v40 = vpack.c.bf16 %v1897_v37, %v1896_v52  ;;  %v5465_v37 = vld [vmem:[#allocation27_spill] sm:$0xff] }
 0x45a   :  { %3857 = vst [vmem:[%s5388_s4 + $0x18] sm:$0xff] %v3808_v40   ;;  %3809 = vst [vmem:[#allocation3] sm:$0xff] %v3808_v40  }
 0x461   :  { %v3977_v59 = vld [vmem:[#allocation3] sm:$0xff]  }
 0x462   :  { %2157 = vmatmul.mubr.bf16.vlgmr.msra.gmra.mxu0 %v3977_v59  ;;  %2200 = vmatmul.mubr.bf16.vlgmr.msra.gmra.mxu1 %v3977_v59 }
 0x463   :  { %2493 = vmatpush1.bf16.msra.mxu0 %v4897_v53  ;;  %2536 = vmatpush1.bf16.msra.mxu1 %v4902_v45 }
 0x464   :  { %2494 = vmatprep.subr.bf16.mxu0 %v4911_v51  ;;  %2537 = vmatprep.subr.bf16.mxu1 %v4916_v58 }
 0x465   :  { %2524 = vmatprep.mubr.bf16.mxu0 %v5440_v48  ;;  %2567 = vmatprep.mubr.bf16.mxu1 %v5440_v48 }
 0x467   :  { %2495 = vmatpush1.bf16.msra.mxu0 %v4921_v57  ;;  %2538 = vmatpush1.bf16.msra.mxu1 %v4926_v49 }
 0x468   :  { %2496 = vmatprep.subr.bf16.mxu0 %v4935_v6  ;;  %2539 = vmatprep.subr.bf16.mxu1 %v4940_v8 }
 0x46b   :  { %2497 = vmatpush1.bf16.msra.mxu0 %v4945_v9  ;;  %2540 = vmatpush1.bf16.msra.mxu1 %v4950_v10 }
 0x46c   :  { %2498 = vmatprep.subr.bf16.mxu0 %v4959_v11  ;;  %2541 = vmatprep.subr.bf16.mxu1 %v4964_v14 }
 0x46f   :  { %2499 = vmatpush1.bf16.msra.mxu0 %v4969_v15  ;;  %2542 = vmatpush1.bf16.msra.mxu1 %v4974_v16 }
 0x470   :  { %2500 = vmatprep.subr.bf16.mxu0 %v4983_v17  ;;  %2543 = vmatprep.subr.bf16.mxu1 %v4988_v18 }
 0x473   :  { %2501 = vmatpush1.bf16.msra.mxu0 %v4993_v19  ;;  %2544 = vmatpush1.bf16.msra.mxu1 %v4998_v20 }
 0x474   :  { %2502 = vmatprep.subr.bf16.mxu0 %v5007_v21  ;;  %2545 = vmatprep.subr.bf16.mxu1 %v5012_v23 }
 0x477   :  { %2503 = vmatpush1.bf16.msra.mxu0 %v5017_v24  ;;  %2546 = vmatpush1.bf16.msra.mxu1 %v5022_v25 }
 0x478   :  { %2504 = vmatprep.subr.bf16.mxu0 %v5029_v26  ;;  %2547 = vmatprep.subr.bf16.mxu1 %v5046_v29 }
 0x47b   :  { %2505 = vmatpush1.bf16.msra.mxu0 %v5036_v27  ;;  %2548 = vmatpush1.bf16.msra.mxu1 %v5041_v28 }
 0x47c   :  { %2506 = vmatprep.subr.bf16.mxu0 %v5052_v30  ;;  %2549 = vmatprep.subr.bf16.mxu1 %v5057_v32 }
 0x47f   :  { %2507 = vmatpush1.bf16.msra.mxu0 %v5065_v33  ;;  %2550 = vmatpush1.bf16.msra.mxu1 %v5070_v34 }
 0x480   :  { %2860 = vmatprep.subr.bf16.mxu0 %v4887_v43  ;;  %2903 = vmatprep.subr.bf16.mxu1 %v4892_v44  ;;  %v5461_v43 = vld [vmem:[#allocation28_spill] sm:$0xff] }
 0x522   :  { %v2158_v41 = vpop.f32.mrf.mxu0  ;;  %v2201_v39 = vpop.f32.mrf.mxu1 }
 0x523   :  { %v2210_v13 = vadd.f32 %v2158_v41, %v5458_v5  ;;  %v2212_v7 = vadd.f32 %v2201_v39, %v5463_v63 }
 0x524   :  { %v2160_v22 = vpop.f32.mrf.mxu0  ;;  %v2203_v3 = vpop.f32.mrf.mxu1 }
 0x525   :  { %v3620_v42 = vmul.f32 -1.442695, %v2210_v13  ;;  %v2211_v46 = vadd.f32 %v2160_v22, %v5459_v4  ;;  %v2213_v2 = vadd.f32 %v2203_v3, %v5462_v61 }
 0x526   :  { %v2162_v47 = vpop.f32.mrf.mxu0  ;;  %v2205_v44 = vpop.f32.mrf.mxu1 }
 0x527   :  { %4157 = vpow2.f32 %v3620_v42  ;;  %v3622_v60 = vmul.f32 -1.442695, %v2211_v46  ;;  %v2214_v62 = vadd.f32 %v2162_v47, %v5460_v56  ;;  %v3624_v35 = vmul.f32 -1.442695, %v2213_v2 }
 0x528   :  { %v2164_v12 = vpop.f32.mrf.mxu0  ;;  %v2207_v54 = vpop.f32.mrf.mxu1  ;;  %v2216_v40 = vadd.f32 %v2205_v44, %v5465_v37 }
 0x529   :  { %4159 = vpow2.f32 %v3622_v60  ;;  %v3621_v38 = vmul.f32 -1.442695, %v2214_v62  ;;  %v2215_v31 = vadd.f32 %v2164_v12, %v5461_v43  ;;  %v2217_v36 = vadd.f32 %v2207_v54, %v5464_v50 }
 0x52b   :  { %4161 = vpow2.f32 %v3621_v38  ;;  %v3623_v55 = vmul.f32 -1.442695, %v2215_v31  ;;  %v3625_v5 = vmul.f32 -1.442695, %v2217_v36 }
 0x52d   :  { %4163 = vpow2.f32 %v3623_v55 }
 0x52e   :  { %4165 = vtanh.f32 %v2212_v7 }
 0x52f   :  { %4167 = vpow2.f32 %v3624_v35 }
 0x534   :  { %v4158_v52 = vpop.eup %4157 }
 0x535   :  { %v2224_v59 = vadd.f32 1.0, %v4158_v52 }
 0x536   :  { %v4160_v41 = vpop.eup %4159 }
 0x537   :  { %4169 = vrcp.f32 %v2224_v59  ;;  %v2236_v13 = vadd.f32 1.0, %v4160_v41 }
 0x538   :  { %v4162_v22 = vpop.eup %4161  ;;  %4171 = vtanh.f32 %v2216_v40 }
 0x539   :  { %4173 = vrcp.f32 %v2236_v13  ;;  %v2225_v42 = vadd.f32 1.0, %v4162_v22 }
 0x53a   :  { %v4164_v4 = vpop.eup %4163  ;;  %4175 = vpow2.f32 %v3625_v5 }
 0x53b   :  { %4177 = vrcp.f32 %v2225_v42  ;;  %v2237_v39 = vadd.f32 1.0, %v4164_v4  ;;  %v4166_v46 = vpop.eup %4165 }
 0x53c   :  { %v4168_v47 = vpop.eup %4167 }
 0x53d   :  { %4179 = vrcp.f32 %v2237_v39  ;;  %v2250_v31 = vadd.f32 1.0, %v4168_v47 }
 0x53f   :  { %4181 = vrcp.f32 %v2250_v31 }
 0x544   :  { %v4170_v60 = vpop.eup %4169 }
 0x545   :  { %v4172_v3 = vpop.eup %4171  ;;  %v2258_v56 = vmul.f32 %v4170_v60, %v4166_v46 }
 0x546   :  { %v4174_v62 = vpop.eup %4173 }
 0x547   :  { %v4176_v12 = vpop.eup %4175  ;;  %v2256_v38 = vmul.f32 %v4174_v62, %v5140_v1 }
 0x548   :  { %v4178_v43 = vpop.eup %4177  ;;  %v2251_v2 = vadd.f32 1.0, %v4176_v12 }
 0x549   :  { %v5193_v44 = vadd.f32 %v2258_v56, %v2256_v38  ;;  %v2259_v55 = vmul.f32 %v4178_v43, %v4172_v3 }
 0x54a   :  { %v4180_v61 = vpop.eup %4179 }
 0x54b   :  { %v2257_v54 = vmul.f32 %v4180_v61, %v5144_v0  ;;  %4183 = vtanh.f32 %v5193_v44 }
 0x54c   :  { %4185 = vrcp.f32 %v2251_v2  ;;  %v4182_v7 = vpop.eup %4181 }
 0x54d   :  { %v5197_v63 = vadd.f32 %v2259_v55, %v2257_v54 }
 0x54f   :  { %4187 = vtanh.f32 %v5197_v63 }
 0x558   :  { %v4184_v35 = vpop.eup %4183 }
 0x559   :  { %v4186_v1 = vpop.eup %4185  ;;  %v2264_v36 = vmul.f32 %v4184_v35, %v4182_v7 }
 0x55c   :  { %v4188_v50 = vpop.eup %4187 }
 0x55d   :  { %v2265_v52 = vmul.f32 %v4188_v50, %v4186_v1 }
 0x55f   :  { %v3818_v37 = vpack.c.bf16 %v2265_v52, %v2264_v36 }
 0x561   :  { %3858 = vst [vmem:[%s5388_s4 + $0x20] sm:$0xff] %v3818_v37   ;;  %3819 = vst [vmem:[#allocation3] sm:$0xff] %v3818_v37  }
 0x568   :  { %v3978_v0 = vld [vmem:[#allocation3] sm:$0xff]  }
 0x569   :  { %2525 = vmatmul.mubr.bf16.vlgmr.msra.gmra.mxu0 %v3978_v0  ;;  %2568 = vmatmul.mubr.bf16.vlgmr.msra.gmra.mxu1 %v3978_v0  ;;  %v3982_v0 = vld [vmem:[%s5386_s2 + $0xe4] ss:$16 sps:$4 sm:$0xff]  }
 0x56a   :  { %2861 = vmatpush1.bf16.msra.mxu0 %v4897_v53  ;;  %2904 = vmatpush1.bf16.msra.mxu1 %v4902_v45  ;;  %v5466_v45 = vld [vmem:[#allocation30_spill] sm:$0xff] }
 0x56b   :  { %2862 = vmatprep.subr.bf16.mxu0 %v4911_v51  ;;  %2905 = vmatprep.subr.bf16.mxu1 %v4916_v58 }
 0x56c   :  { %2892 = vmatprep.mubr.bf16.mxu0 %v5440_v48  ;;  %2935 = vmatprep.mubr.bf16.mxu1 %v5440_v48 }
 0x56e   :  { %2863 = vmatpush1.bf16.msra.mxu0 %v4921_v57  ;;  %2906 = vmatpush1.bf16.msra.mxu1 %v4926_v49 }
 0x56f   :  { %2864 = vmatprep.subr.bf16.mxu0 %v4935_v6  ;;  %2907 = vmatprep.subr.bf16.mxu1 %v4940_v8  ;;  %v5467_v6 = vld [vmem:[#allocation32_spill] sm:$0xff] }
 0x572   :  { %2865 = vmatpush1.bf16.msra.mxu0 %v4945_v9  ;;  %2908 = vmatpush1.bf16.msra.mxu1 %v4950_v10 }
 0x573   :  { %2866 = vmatprep.subr.bf16.mxu0 %v4959_v11  ;;  %2909 = vmatprep.subr.bf16.mxu1 %v4964_v14  ;;  %v5468_v14 = vld [vmem:[#allocation34_spill] sm:$0xff] }
 0x576   :  { %2867 = vmatpush1.bf16.msra.mxu0 %v4969_v15  ;;  %2910 = vmatpush1.bf16.msra.mxu1 %v4974_v16 }
 0x577   :  { %2868 = vmatprep.subr.bf16.mxu0 %v4983_v17  ;;  %2911 = vmatprep.subr.bf16.mxu1 %v4988_v18  ;;  %v5469_v18 = vld [vmem:[#allocation36_spill] sm:$0xff] }
 0x57a   :  { %2869 = vmatpush1.bf16.msra.mxu0 %v4993_v19  ;;  %2912 = vmatpush1.bf16.msra.mxu1 %v4998_v20 }
 0x57b   :  { %2870 = vmatprep.subr.bf16.mxu0 %v5007_v21  ;;  %2913 = vmatprep.subr.bf16.mxu1 %v5012_v23  ;;  %v5470_v23 = vld [vmem:[#allocation33_spill] sm:$0xff] }
 0x57e   :  { %2871 = vmatpush1.bf16.msra.mxu0 %v5017_v24  ;;  %2914 = vmatpush1.bf16.msra.mxu1 %v5022_v25 }
 0x57f   :  { %2872 = vmatprep.subr.bf16.mxu0 %v5029_v26  ;;  %2915 = vmatprep.subr.bf16.mxu1 %v5046_v29  ;;  %v5471_v26 = vld [vmem:[#allocation31_spill] sm:$0xff]  ;;  %v5472_v29 = vld [vmem:[#allocation37_spill] sm:$0xff] }
 0x582   :  { %2873 = vmatpush1.bf16.msra.mxu0 %v5036_v27  ;;  %2916 = vmatpush1.bf16.msra.mxu1 %v5041_v28 }
 0x583   :  { %2874 = vmatprep.subr.bf16.mxu0 %v5052_v30  ;;  %2917 = vmatprep.subr.bf16.mxu1 %v5057_v32 }
 0x586   :  { %2875 = vmatpush1.bf16.msra.mxu0 %v5065_v33  ;;  %2918 = vmatpush1.bf16.msra.mxu1 %v5070_v34  ;;  %v5473_v33 = vld [vmem:[#allocation35_spill] sm:$0xff] }
 0x587   :  { %3228 = vmatprep.subr.bf16.mxu0 %v3982_v0 }
 0x629   :  { %v2526_v53 = vpop.f32.mrf.mxu0  ;;  %v2569_v58 = vpop.f32.mrf.mxu1 }
 0x62a   :  { %v2578_v51 = vadd.f32 %v2526_v53, %v5466_v45  ;;  %v2580_v27 = vadd.f32 %v2569_v58, %v5471_v26  ;;  %v3985_v53 = vld [vmem:[%s5386_s2 + $0xec] ss:$16 sps:$4 sm:$0xff]   ;;  %v3980_v45 = vld [vmem:[%s5386_s2 + $0xe0] ss:$16 sps:$4 sm:$0xff]   ;;  %v4018_v26 = vld [vmem:[%s5386_s2 + $0x24] ss:$16 sps:$4 sm:$0xff]  }
 0x62b   :  { %v2528_v57 = vpop.f32.mrf.mxu0  ;;  %v2571_v11 = vpop.f32.mrf.mxu1  ;;  %3271 = vmatprep.subr.bf16.mxu1 %v3985_v53  ;;  %v3991_v58 = vld [vmem:[%s5386_s2 + $0xcc] ss:$16 sps:$4 sm:$0xff]  }
 0x62c   :  { %v3663_v49 = vmul.f32 -1.442695, %v2578_v51  ;;  %v2579_v8 = vadd.f32 %v2528_v57, %v5467_v6  ;;  %v2581_v24 = vadd.f32 %v2571_v11, %v5470_v23  ;;  %v3983_v51 = vld [vmem:[%s5386_s2 + $0xe8] ss:$16 sps:$4 sm:$0xff]   ;;  %v3986_v57 = vld [vmem:[%s5386_s2 + $0xc0] ss:$16 sps:$4 sm:$0xff]  }
 0x62d   :  { %v2530_v9 = vpop.f32.mrf.mxu0  ;;  %v2573_v20 = vpop.f32.mrf.mxu1  ;;  %v3994_v6 = vld [vmem:[%s5386_s2 + $0xa4] ss:$16 sps:$4 sm:$0xff]   ;;  %v4015_v23 = vld [vmem:[%s5386_s2 + $0x4c] ss:$16 sps:$4 sm:$0xff]  }
 0x62e   :  { %4189 = vpow2.f32 %v3663_v49  ;;  %v3665_v10 = vmul.f32 -1.442695, %v2579_v8  ;;  %v2582_v15 = vadd.f32 %v2530_v9, %v5468_v14  ;;  %v3667_v28 = vmul.f32 -1.442695, %v2581_v24  ;;  %v3989_v49 = vld [vmem:[%s5386_s2 + $0xc8] ss:$16 sps:$4 sm:$0xff]  }
 0x62f   :  { %v2532_v16 = vpop.f32.mrf.mxu0  ;;  %v2575_v25 = vpop.f32.mrf.mxu1  ;;  %v2584_v34 = vadd.f32 %v2573_v20, %v5473_v33  ;;  %v3997_v8 = vld [vmem:[%s5386_s2 + $0xac] ss:$16 sps:$4 sm:$0xff]   ;;  %v3992_v9 = vld [vmem:[%s5386_s2 + $0xa0] ss:$16 sps:$4 sm:$0xff]   ;;  %v4000_v11 = vld [vmem:[%s5386_s2 + $0x84] ss:$16 sps:$4 sm:$0xff]  }
 0x630   :  { %4191 = vpow2.f32 %v3665_v10  ;;  %v3664_v17 = vmul.f32 -1.442695, %v2582_v15  ;;  %v2583_v19 = vadd.f32 %v2532_v16, %v5469_v18  ;;  %v2585_v30 = vadd.f32 %v2575_v25, %v5472_v29  ;;  %v3995_v10 = vld [vmem:[%s5386_s2 + $0xa8] ss:$16 sps:$4 sm:$0xff]   ;;  %v4003_v14 = vld [vmem:[%s5386_s2 + $0x8c] ss:$16 sps:$4 sm:$0xff]  }
 0x631   :  { %v3998_v15 = vld [vmem:[%s5386_s2 + $0x80] ss:$16 sps:$4 sm:$0xff]   ;;  %v4001_v16 = vld [vmem:[%s5386_s2 + $0x88] ss:$16 sps:$4 sm:$0xff]   ;;  %v4009_v18 = vld [vmem:[%s5386_s2 + $0x6c] ss:$16 sps:$4 sm:$0xff]  }
 0x632   :  { %4193 = vpow2.f32 %v3664_v17  ;;  %v3666_v21 = vmul.f32 -1.442695, %v2583_v19  ;;  %v3668_v41 = vmul.f32 -1.442695, %v2585_v30  ;;  %v4006_v17 = vld [vmem:[%s5386_s2 + $0x64] ss:$16 sps:$4 sm:$0xff]  }
 0x633   :  { %v4004_v19 = vld [vmem:[%s5386_s2 + $0x60] ss:$16 sps:$4 sm:$0xff]   ;;  %v4007_v20 = vld [vmem:[%s5386_s2 + $0x68] ss:$16 sps:$4 sm:$0xff]   ;;  %v4021_v29 = vld [vmem:[%s5386_s2 + $0x2c] ss:$16 sps:$4 sm:$0xff]  }
 0x634   :  { %4195 = vpow2.f32 %v3666_v21  ;;  %v4012_v21 = vld [vmem:[%s5386_s2 + $0x44] ss:$16 sps:$4 sm:$0xff]   ;;  %v4010_v24 = vld [vmem:[%s5386_s2 + $0x40] ss:$16 sps:$4 sm:$0xff]   ;;  %v4013_v25 = vld [vmem:[%s5386_s2 + $0x48] ss:$16 sps:$4 sm:$0xff]  }
 0x635   :  { %4197 = vtanh.f32 %v2580_v27  ;;  %v4016_v27 = vld [vmem:[%s5386_s2 + $0x20] ss:$16 sps:$4 sm:$0xff]   ;;  %v4024_v30 = vld [vmem:[%s5386_s2 + $0x4] ss:$16 sps:$4 sm:$0xff]  }
 0x636   :  { %4199 = vpow2.f32 %v3667_v28  ;;  %v4019_v28 = vld [vmem:[%s5386_s2 + $0x28] ss:$16 sps:$4 sm:$0xff]   ;;  %v4022_v33 = vld [vmem:[%s5386_s2] ss:$16 sps:$4 sm:$0xff]  }
 0x63b   :  { %v4190_v32 = vpop.eup %4189 }
 0x63c   :  { %v2592_v40 = vadd.f32 1.0, %v4190_v32  ;;  %v4027_v32 = vld [vmem:[%s5386_s2 + $0xc] ss:$16 sps:$4 sm:$0xff]  }
 0x63d   :  { %v4192_v59 = vpop.eup %4191 }
 0x63e   :  { %4201 = vrcp.f32 %v2592_v40  ;;  %v2604_v5 = vadd.f32 1.0, %v4192_v59  ;;  %v5474_v59 = vld [vmem:[#allocation38_spill] sm:$0xff] }
 0x63f   :  { %v4194_v13 = vpop.eup %4193  ;;  %4203 = vtanh.f32 %v2584_v34  ;;  %v4025_v34 = vld [vmem:[%s5386_s2 + $0x8] ss:$16 sps:$4 sm:$0xff]  }
 0x640   :  { %4205 = vrcp.f32 %v2604_v5  ;;  %v2593_v22 = vadd.f32 1.0, %v4194_v13 }
 0x641   :  { %v4196_v42 = vpop.eup %4195  ;;  %4207 = vpow2.f32 %v3668_v41 }
 0x642   :  { %4209 = vrcp.f32 %v2593_v22  ;;  %v2605_v4 = vadd.f32 1.0, %v4196_v42  ;;  %v4198_v39 = vpop.eup %4197  ;;  %v5475_v42 = vld [vmem:[#allocation40_spill] sm:$0xff] }
 0x643   :  { %v4200_v46 = vpop.eup %4199 }
 0x644   :  { %4211 = vrcp.f32 %v2605_v4  ;;  %v2618_v43 = vadd.f32 1.0, %v4200_v46 }
 0x646   :  { %4213 = vrcp.f32 %v2618_v43 }
 0x64b   :  { %v4202_v47 = vpop.eup %4201 }
 0x64c   :  { %v4204_v60 = vpop.eup %4203  ;;  %v2626_v3 = vmul.f32 %v4202_v47, %v4198_v39 }
 0x64d   :  { %v4206_v56 = vpop.eup %4205 }
 0x64e   :  { %v4208_v62 = vpop.eup %4207  ;;  %v2624_v12 = vmul.f32 %v4206_v56, %v5193_v44 }
 0x64f   :  { %v4210_v38 = vpop.eup %4209  ;;  %v2619_v2 = vadd.f32 1.0, %v4208_v62 }
 0x650   :  { %v5244_v31 = vadd.f32 %v2626_v3, %v2624_v12  ;;  %v2627_v55 = vmul.f32 %v4210_v38, %v4204_v60  ;;  %v5476_v60 = vld [vmem:[#allocation42_spill] sm:$0xff]  ;;  %v5477_v12 = vld [vmem:[#allocation44_spill] sm:$0xff] }
 0x651   :  { %v4212_v61 = vpop.eup %4211 }
 0x652   :  { %v2625_v54 = vmul.f32 %v4212_v61, %v5197_v63  ;;  %4215 = vtanh.f32 %v5244_v31  ;;  %v5478_v61 = vld [vmem:[#allocation41_spill] sm:$0xff] }
 0x653   :  { %4217 = vrcp.f32 %v2619_v2  ;;  %v4214_v35 = vpop.eup %4213 }
 0x654   :  { %v5248_v7 = vadd.f32 %v2627_v55, %v2625_v54 }
 0x656   :  { %4219 = vtanh.f32 %v5248_v7 }
 0x65f   :  { %v4216_v1 = vpop.eup %4215 }
 0x660   :  { %v4218_v44 = vpop.eup %4217  ;;  %v2632_v36 = vmul.f32 %v4216_v1, %v4214_v35  ;;  %v5479_v35 = vld [vmem:[#allocation39_spill] sm:$0xff] }
 0x663   :  { %v4220_v50 = vpop.eup %4219 }
 0x664   :  { %v2633_v52 = vmul.f32 %v4220_v50, %v4218_v44  ;;  %v5480_v50 = vld [vmem:[#allocation45_spill] sm:$0xff] }
 0x666   :  { %v3828_v37 = vpack.c.bf16 %v2633_v52, %v2632_v36 }
 0x668   :  { %3859 = vst [vmem:[%s5388_s4 + $0x28] sm:$0xff] %v3828_v37   ;;  %3829 = vst [vmem:[#allocation3] sm:$0xff] %v3828_v37   ;;  %v5481_v37 = vld [vmem:[#allocation43_spill] sm:$0xff] }
 0x66f   :  { %v3979_v63 = vld [vmem:[#allocation3] sm:$0xff]  }
 0x670   :  { %2893 = vmatmul.mubr.bf16.vlgmr.msra.gmra.mxu0 %v3979_v63  ;;  %2936 = vmatmul.mubr.bf16.vlgmr.msra.gmra.mxu1 %v3979_v63 }
 0x671   :  { %3260 = vmatprep.mubr.bf16.mxu0 %v5440_v48  ;;  %3303 = vmatprep.mubr.bf16.mxu1 %v5440_v48  ;;  %v3988_v48 = vld [vmem:[%s5386_s2 + $0xc4] ss:$16 sps:$4 sm:$0xff]  }
 0x672   :  { %3229 = vmatpush1.bf16.msra.mxu0 %v3980_v45  ;;  %3272 = vmatpush1.bf16.msra.mxu1 %v3983_v51 }
 0x673   :  { %3230 = vmatprep.subr.bf16.mxu0 %v3988_v48  ;;  %3273 = vmatprep.subr.bf16.mxu1 %v3991_v58 }
 0x676   :  { %3231 = vmatpush1.bf16.msra.mxu0 %v3986_v57  ;;  %3274 = vmatpush1.bf16.msra.mxu1 %v3989_v49 }
 0x677   :  { %3232 = vmatprep.subr.bf16.mxu0 %v3994_v6  ;;  %3275 = vmatprep.subr.bf16.mxu1 %v3997_v8 }
 0x67a   :  { %3233 = vmatpush1.bf16.msra.mxu0 %v3992_v9  ;;  %3276 = vmatpush1.bf16.msra.mxu1 %v3995_v10 }
 0x67b   :  { %3234 = vmatprep.subr.bf16.mxu0 %v4000_v11  ;;  %3277 = vmatprep.subr.bf16.mxu1 %v4003_v14 }
 0x67e   :  { %3235 = vmatpush1.bf16.msra.mxu0 %v3998_v15  ;;  %3278 = vmatpush1.bf16.msra.mxu1 %v4001_v16 }
 0x67f   :  { %3236 = vmatprep.subr.bf16.mxu0 %v4006_v17  ;;  %3279 = vmatprep.subr.bf16.mxu1 %v4009_v18 }
 0x682   :  { %3237 = vmatpush1.bf16.msra.mxu0 %v4004_v19  ;;  %3280 = vmatpush1.bf16.msra.mxu1 %v4007_v20 }
 0x683   :  { %3238 = vmatprep.subr.bf16.mxu0 %v4012_v21  ;;  %3281 = vmatprep.subr.bf16.mxu1 %v4015_v23 }
 0x686   :  { %3239 = vmatpush1.bf16.msra.mxu0 %v4010_v24  ;;  %3282 = vmatpush1.bf16.msra.mxu1 %v4013_v25 }
 0x687   :  { %3240 = vmatprep.subr.bf16.mxu0 %v4018_v26  ;;  %3283 = vmatprep.subr.bf16.mxu1 %v4021_v29 }
 0x68a   :  { %3241 = vmatpush1.bf16.msra.mxu0 %v4016_v27  ;;  %3284 = vmatpush1.bf16.msra.mxu1 %v4019_v28 }
 0x68b   :  { %3242 = vmatprep.subr.bf16.mxu0 %v4024_v30  ;;  %3285 = vmatprep.subr.bf16.mxu1 %v4027_v32 }
 0x68e   :  { %3243 = vmatpush1.bf16.msra.mxu0 %v4022_v33  ;;  %3286 = vmatpush1.bf16.msra.mxu1 %v4025_v34  ;;  %v5482_v34 = vld [vmem:[#allocation46_spill] sm:$0xff] }
 0x730   :  { %v2894_v40 = vpop.f32.mrf.mxu0  ;;  %v2937_v5 = vpop.f32.mrf.mxu1 }
 0x731   :  { %v2946_v41 = vadd.f32 %v2894_v40, %v5474_v59  ;;  %v2948_v1 = vadd.f32 %v2937_v5, %v5479_v35 }
 0x732   :  { %v2896_v13 = vpop.f32.mrf.mxu0  ;;  %v2939_v47 = vpop.f32.mrf.mxu1 }
 0x733   :  { %v3706_v22 = vmul.f32 -1.442695, %v2946_v41  ;;  %v2947_v4 = vadd.f32 %v2896_v13, %v5475_v42  ;;  %v2949_v2 = vadd.f32 %v2939_v47, %v5478_v61  ;;  %v5483_v13 = vld [vmem:[#allocation48_spill] sm:$0xff] }
 0x734   :  { %v2898_v39 = vpop.f32.mrf.mxu0  ;;  %v2941_v43 = vpop.f32.mrf.mxu1 }
 0x735   :  { %4221 = vpow2.f32 %v3706_v22  ;;  %v3708_v46 = vmul.f32 -1.442695, %v2947_v4  ;;  %v2950_v3 = vadd.f32 %v2898_v39, %v5476_v60  ;;  %v3710_v44 = vmul.f32 -1.442695, %v2949_v2  ;;  %v5487_v2 = vld [vmem:[#allocation47_spill] sm:$0xff] }
 0x736   :  { %v2900_v56 = vpop.f32.mrf.mxu0  ;;  %v2943_v54 = vpop.f32.mrf.mxu1  ;;  %v2952_v63 = vadd.f32 %v2941_v43, %v5481_v37  ;;  %v5486_v43 = vld [vmem:[#allocation49_spill] sm:$0xff] }
 0x737   :  { %4223 = vpow2.f32 %v3708_v46  ;;  %v3707_v62 = vmul.f32 -1.442695, %v2950_v3  ;;  %v2951_v38 = vadd.f32 %v2900_v56, %v5477_v12  ;;  %v2953_v36 = vadd.f32 %v2943_v54, %v5480_v50  ;;  %v5484_v46 = vld [vmem:[#allocation50_spill] sm:$0xff]  ;;  %v5485_v56 = vld [vmem:[#allocation52_spill] sm:$0xff] }
 0x739   :  { %4225 = vpow2.f32 %v3707_v62  ;;  %v3709_v55 = vmul.f32 -1.442695, %v2951_v38  ;;  %v3711_v45 = vmul.f32 -1.442695, %v2953_v36  ;;  %v5489_v36 = vld [vmem:[#allocation51_spill] sm:$0xff] }
 0x73b   :  { %4227 = vpow2.f32 %v3709_v55 }
 0x73c   :  { %4229 = vtanh.f32 %v2948_v1  ;;  %v5488_v1 = vld [vmem:[#allocation53_spill] sm:$0xff] }
 0x73d   :  { %4231 = vpow2.f32 %v3710_v44 }
 0x742   :  { %v4222_v52 = vpop.eup %4221 }
 0x743   :  { %v2960_v0 = vadd.f32 1.0, %v4222_v52 }
 0x744   :  { %v4224_v53 = vpop.eup %4223 }
 0x745   :  { %4233 = vrcp.f32 %v2960_v0  ;;  %v2972_v51 = vadd.f32 1.0, %v4224_v53 }
 0x746   :  { %v4226_v48 = vpop.eup %4225  ;;  %4235 = vtanh.f32 %v2952_v63 }
 0x747   :  { %4237 = vrcp.f32 %v2972_v51  ;;  %v2961_v58 = vadd.f32 1.0, %v4226_v48 }
 0x748   :  { %v4228_v57 = vpop.eup %4227  ;;  %4239 = vpow2.f32 %v3711_v45 }
 0x749   :  { %4241 = vrcp.f32 %v2961_v58  ;;  %v2973_v49 = vadd.f32 1.0, %v4228_v57  ;;  %v4230_v6 = vpop.eup %4229 }
 0x74a   :  { %v4232_v8 = vpop.eup %4231 }
 0x74b   :  { %4243 = vrcp.f32 %v2973_v49  ;;  %v2986_v18 = vadd.f32 1.0, %v4232_v8 }
 0x74d   :  { %4245 = vrcp.f32 %v2986_v18 }
 0x752   :  { %v4234_v9 = vpop.eup %4233 }
 0x753   :  { %v4236_v10 = vpop.eup %4235  ;;  %v2994_v11 = vmul.f32 %v4234_v9, %v4230_v6 }
 0x754   :  { %v4238_v14 = vpop.eup %4237 }
 0x755   :  { %v4240_v15 = vpop.eup %4239  ;;  %v2992_v16 = vmul.f32 %v4238_v14, %v5244_v31 }
 0x756   :  { %v4242_v17 = vpop.eup %4241  ;;  %v2987_v23 = vadd.f32 1.0, %v4240_v15 }
 0x757   :  { %v5361_v19 = vadd.f32 %v2994_v11, %v2992_v16  ;;  %v2995_v20 = vmul.f32 %v4242_v17, %v4236_v10 }
 0x758   :  { %v4244_v21 = vpop.eup %4243 }
 0x759   :  { %v2993_v24 = vmul.f32 %v4244_v21, %v5248_v7  ;;  %4247 = vtanh.f32 %v5361_v19 }
 0x75a   :  { %4249 = vrcp.f32 %v2987_v23  ;;  %v4246_v26 = vpop.eup %4245 }
 0x75b   :  { %v5365_v25 = vadd.f32 %v2995_v20, %v2993_v24 }
 0x75d   :  { %4251 = vtanh.f32 %v5365_v25 }
 0x766   :  { %v4248_v27 = vpop.eup %4247 }
 0x767   :  { %v4250_v31 = vpop.eup %4249  ;;  %v3000_v29 = vmul.f32 %v4248_v27, %v4246_v26 }
 0x76a   :  { %v4252_v28 = vpop.eup %4251 }
 0x76b   :  { %v3001_v30 = vmul.f32 %v4252_v28, %v4250_v31 }
 0x76d   :  { %v3838_v32 = vpack.c.bf16 %v3001_v30, %v3000_v29 }
 0x76f   :  { %3860 = vst [vmem:[%s5388_s4 + $0x30] sm:$0xff] %v3838_v32   ;;  %3839 = vst [vmem:[#allocation3] sm:$0xff] %v3838_v32  }
 0x776   :  { %v4028_v7 = vld [vmem:[#allocation3] sm:$0xff]  }
 0x777   :  { %3261 = vmatmul.mubr.bf16.vlgmr.msra.gmra.mxu0 %v4028_v7  ;;  %3304 = vmatmul.mubr.bf16.vlgmr.msra.gmra.mxu1 %v4028_v7 }
 0x837   :  { %v3262_v33 = vpop.f32.mrf.mxu0  ;;  %v3305_v59 = vpop.f32.mrf.mxu1 }
 0x838   :  { %v3314_v40 = vadd.f32 %v3262_v33, %v5482_v34  ;;  %v3316_v54 = vadd.f32 %v3305_v59, %v5487_v2 }
 0x839   :  { %v3264_v41 = vpop.f32.mrf.mxu0  ;;  %v3307_v39 = vpop.f32.mrf.mxu1 }
 0x83a   :  { %v3749_v5 = vmul.f32 -1.442695, %v3314_v40  ;;  %v3315_v22 = vadd.f32 %v3264_v41, %v5483_v13  ;;  %v3317_v55 = vadd.f32 %v3307_v39, %v5486_v43 }
 0x83b   :  { %v3266_v42 = vpop.f32.mrf.mxu0  ;;  %v3309_v12 = vpop.f32.mrf.mxu1 }
 0x83c   :  { %4253 = vpow2.f32 %v3749_v5  ;;  %v3751_v4 = vmul.f32 -1.442695, %v3315_v22  ;;  %v3318_v47 = vadd.f32 %v3266_v42, %v5484_v46  ;;  %v3753_v35 = vmul.f32 -1.442695, %v3317_v55 }
 0x83d   :  { %v3268_v60 = vpop.f32.mrf.mxu0  ;;  %v3311_v61 = vpop.f32.mrf.mxu1  ;;  %v3320_v52 = vadd.f32 %v3309_v12, %v5489_v36 }
 0x83e   :  { %4255 = vpow2.f32 %v3751_v4  ;;  %v3750_v3 = vmul.f32 -1.442695, %v3318_v47  ;;  %v3319_v62 = vadd.f32 %v3268_v60, %v5485_v56  ;;  %v3321_v44 = vadd.f32 %v3311_v61, %v5488_v1 }
 0x840   :  { %4257 = vpow2.f32 %v3750_v3  ;;  %v3752_v38 = vmul.f32 -1.442695, %v3319_v62  ;;  %v3754_v0 = vmul.f32 -1.442695, %v3321_v44 }
 0x842   :  { %4259 = vpow2.f32 %v3752_v38 }
 0x843   :  { %4261 = vtanh.f32 %v3316_v54 }
 0x844   :  { %4263 = vpow2.f32 %v3753_v35 }
 0x849   :  { %v4254_v50 = vpop.eup %4253 }
 0x84a   :  { %v3328_v37 = vadd.f32 1.0, %v4254_v50 }
 0x84b   :  { %v4256_v63 = vpop.eup %4255 }
 0x84c   :  { %4265 = vrcp.f32 %v3328_v37  ;;  %v3340_v53 = vadd.f32 1.0, %v4256_v63 }
 0x84d   :  { %v4258_v45 = vpop.eup %4257  ;;  %4267 = vtanh.f32 %v3320_v52 }
 0x84e   :  { %4269 = vrcp.f32 %v3340_v53  ;;  %v3329_v51 = vadd.f32 1.0, %v4258_v45 }
 0x84f   :  { %v4260_v48 = vpop.eup %4259  ;;  %4271 = vpow2.f32 %v3754_v0 }
 0x850   :  { %4273 = vrcp.f32 %v3329_v51  ;;  %v3341_v58 = vadd.f32 1.0, %v4260_v48  ;;  %v4262_v57 = vpop.eup %4261 }
 0x851   :  { %v4264_v49 = vpop.eup %4263 }
 0x852   :  { %4275 = vrcp.f32 %v3341_v58  ;;  %v3354_v11 = vadd.f32 1.0, %v4264_v49 }
 0x854   :  { %4277 = vrcp.f32 %v3354_v11 }
 0x859   :  { %v4266_v6 = vpop.eup %4265 }
 0x85a   :  { %v4268_v8 = vpop.eup %4267  ;;  %v3362_v9 = vmul.f32 %v4266_v6, %v4262_v57 }
 0x85b   :  { %v4270_v10 = vpop.eup %4269 }
 0x85c   :  { %v4272_v14 = vpop.eup %4271  ;;  %v3360_v15 = vmul.f32 %v4270_v10, %v5361_v19 }
 0x85d   :  { %v4274_v16 = vpop.eup %4273  ;;  %v3355_v21 = vadd.f32 1.0, %v4272_v14 }
 0x85e   :  { %v3364_v17 = vadd.f32 %v3362_v9, %v3360_v15  ;;  %v3363_v18 = vmul.f32 %v4274_v16, %v4268_v8 }
 0x85f   :  { %v4276_v20 = vpop.eup %4275 }
 0x860   :  { %4279 = vtanh.f32 %v3364_v17  ;;  %v3361_v23 = vmul.f32 %v4276_v20, %v5365_v25 }
 0x861   :  { %4281 = vrcp.f32 %v3355_v21  ;;  %v4278_v26 = vpop.eup %4277 }
 0x862   :  { %v3365_v24 = vadd.f32 %v3363_v18, %v3361_v23 }
 0x864   :  { %4283 = vtanh.f32 %v3365_v24 }
 0x86d   :  { %v4280_v27 = vpop.eup %4279 }
 0x86e   :  { %v3368_v31 = vmul.f32 %v4280_v27, %v4278_v26  ;;  %v4282_v28 = vpop.eup %4281 }
 0x871   :  { %v4284_v29 = vpop.eup %4283 }
 0x872   :  { %v3369_v30 = vmul.f32 %v4284_v29, %v4282_v28 }
 0x874   :  { %v3848_v32 = vpack.c.bf16 %v3369_v30, %v3368_v31 }
 0x876   :  { %3849 = vst [vmem:[#allocation3] sm:$0xff] %v3848_v32   ;;  %3861 = vst [vmem:[%s5388_s4 + $0x38] sm:$0xff] %v3848_v32  }

// kernel: lstm_cluster_forward.3
= control target key start
LH: loop header
LB: loop body
LE: loop exit
PB: predicated region body
PF: predicated region fallthrough
CT: control target
= control target key end

     0   :  { %v5841_v1 = vmov 0   ;;  %vm4630_vm0 = vmmov 0   ;;  %s5832_s1 = inlined_call_operand.vmem [shape: bf16[128,512], index: 1, kind: input, shape index: {}]   ;;  %s5833_s0 = inlined_call_operand.vmem [shape: bf16[8,16,128], index: 0, kind: input, shape index: {}]   ;;  %s5834_s2 = inlined_call_operand.vmem [shape: bf16[128,512], index: 2, kind: input, shape index: {}]   ;;  %s5835_s3 = inlined_call_operand.vmem [shape: f32[1,512], index: 3, kind: input, shape index: {}]   ;;  %s5836_s6 = inlined_call_operand.vmem [shape: bf16[128,128], index: 6, kind: input, shape index: {}]   ;;  %s5837_s4 = inlined_call_operand.vmem [shape: f32[1,128], index: 4, kind: input, shape index: {}]   ;;  %s5838_s5 = inlined_call_operand.vmem [shape: f32[1,128], index: 5, kind: input, shape index: {}]   ;;  %s5839_s7 = inlined_call_operand.vmem [shape: f32[1,128], index: 7, kind: input, shape index: {}]   ;;  %s5840_s8 = inlined_call_operand.vmem [shape: f32[16,128], index: 8, kind: output, shape index: {}]  }
   0x1   :  { %v4156_v0 = vld [vmem:[%s5832_s1 + $0xe4] ss:$16 sps:$4 sm:$0xff]   ;;  %352 = vmatprep.mubr.bf16.mxu0 %v5841_v1  ;;  %34 = vst [vmem:[#allocation3] sm:$0xf] %v5841_v1  ;;  %35 = vst [vmem:[#allocation3 + $0x4] sm:$0xf] %v5841_v1  ;;  %465 = vmatprep.mubr.bf16.mxu1 %v5841_v1 }
   0x2   :  { %v4158_v2 = vld [vmem:[%s5832_s1 + $0xec] ss:$16 sps:$4 sm:$0xff]   ;;  %320 = vmatprep.subr.bf16.mxu0 %v4156_v0  ;;  %v4160_v3 = vld [vmem:[%s5832_s1 + $0xe0] ss:$16 sps:$4 sm:$0xff]   ;;  %v4161_v4 = vld [vmem:[%s5832_s1 + $0xe8] ss:$16 sps:$4 sm:$0xff]  }
   0x3   :  { %433 = vmatprep.subr.bf16.mxu1 %v4158_v2  ;;  %v4162_v5 = vld [vmem:[%s5832_s1 + $0xc4] ss:$16 sps:$4 sm:$0xff]   ;;  %321 = vmatpush1.bf16.msra.mxu0 %v4160_v3  ;;  %v4164_v6 = vld [vmem:[%s5832_s1 + $0xcc] ss:$16 sps:$4 sm:$0xff]   ;;  %v4166_v7 = vld [vmem:[%s5832_s1 + $0xc0] ss:$16 sps:$4 sm:$0xff]  }
   0x4   :  { %434 = vmatpush1.bf16.msra.mxu1 %v4161_v4  ;;  %322 = vmatprep.subr.bf16.mxu0 %v4162_v5  ;;  %v4167_v8 = vld [vmem:[%s5832_s1 + $0xc8] ss:$16 sps:$4 sm:$0xff]   ;;  %v4168_v9 = vld [vmem:[%s5832_s1 + $0xa4] ss:$16 sps:$4 sm:$0xff]   ;;  %v4170_v10 = vld [vmem:[%s5832_s1 + $0xac] ss:$16 sps:$4 sm:$0xff]  }
   0x5   :  { %435 = vmatprep.subr.bf16.mxu1 %v4164_v6  ;;  %v4172_v11 = vld [vmem:[%s5832_s1 + $0xa0] ss:$16 sps:$4 sm:$0xff]   ;;  %v4173_v12 = vld [vmem:[%s5832_s1 + $0xa8] ss:$16 sps:$4 sm:$0xff]   ;;  %v4174_v13 = vld [vmem:[%s5832_s1 + $0x84] ss:$16 sps:$4 sm:$0xff]  }
   0x6   :  { %v4176_v14 = vld [vmem:[%s5832_s1 + $0x8c] ss:$16 sps:$4 sm:$0xff]   ;;  %v4178_v15 = vld [vmem:[%s5832_s1 + $0x80] ss:$16 sps:$4 sm:$0xff]   ;;  %v4179_v16 = vld [vmem:[%s5832_s1 + $0x88] ss:$16 sps:$4 sm:$0xff]  }
   0x7   :  { %323 = vmatpush1.bf16.msra.mxu0 %v4166_v7  ;;  %v4180_v17 = vld [vmem:[%s5832_s1 + $0x64] ss:$16 sps:$4 sm:$0xff]   ;;  %v4182_v18 = vld [vmem:[%s5832_s1 + $0x6c] ss:$16 sps:$4 sm:$0xff]   ;;  %v4184_v19 = vld [vmem:[%s5832_s1 + $0x60] ss:$16 sps:$4 sm:$0xff]  }
   0x8   :  { %436 = vmatpush1.bf16.msra.mxu1 %v4167_v8  ;;  %324 = vmatprep.subr.bf16.mxu0 %v4168_v9  ;;  %v4185_v20 = vld [vmem:[%s5832_s1 + $0x68] ss:$16 sps:$4 sm:$0xff]   ;;  %v4186_v21 = vld [vmem:[%s5832_s1 + $0x44] ss:$16 sps:$4 sm:$0xff]   ;;  %v4188_v22 = vld [vmem:[%s5832_s1 + $0x4c] ss:$16 sps:$4 sm:$0xff]  }
   0x9   :  { %437 = vmatprep.subr.bf16.mxu1 %v4170_v10  ;;  %v4190_v23 = vld [vmem:[%s5832_s1 + $0x40] ss:$16 sps:$4 sm:$0xff]   ;;  %v4191_v24 = vld [vmem:[%s5832_s1 + $0x48] ss:$16 sps:$4 sm:$0xff]   ;;  %v4192_v25 = vld [vmem:[%s5832_s1 + $0x24] ss:$16 sps:$4 sm:$0xff]  }
   0xa   :  { %v4194_v26 = vld [vmem:[%s5832_s1 + $0x2c] ss:$16 sps:$4 sm:$0xff]   ;;  %v4196_v27 = vld [vmem:[%s5832_s1 + $0x20] ss:$16 sps:$4 sm:$0xff]   ;;  %v4197_v28 = vld [vmem:[%s5832_s1 + $0x28] ss:$16 sps:$4 sm:$0xff]  }
   0xb   :  { %325 = vmatpush1.bf16.msra.mxu0 %v4172_v11  ;;  %v4198_v29 = vld [vmem:[%s5832_s1 + $0x4] ss:$16 sps:$4 sm:$0xff]   ;;  %v4200_v30 = vld [vmem:[%s5832_s1 + $0xc] ss:$16 sps:$4 sm:$0xff]   ;;  %v4202_v31 = vld [vmem:[%s5832_s1] ss:$16 sps:$4 sm:$0xff]   ;;  %v92_v11 = vlaneseq }
   0xc   :  { %438 = vmatpush1.bf16.msra.mxu1 %v4173_v12  ;;  %326 = vmatprep.subr.bf16.mxu0 %v4174_v13  ;;  %v4203_v32 = vld [vmem:[%s5832_s1 + $0x8] ss:$16 sps:$4 sm:$0xff]   ;;  %v4779_v33 = vld [vmem:[%s5834_s2 + $0xe4] ss:$16 sps:$4 sm:$0xff]   ;;  %v4784_v34 = vld [vmem:[%s5834_s2 + $0xec] ss:$16 sps:$4 sm:$0xff]  }
   0xd   :  { %439 = vmatprep.subr.bf16.mxu1 %v4176_v14  ;;  %v4204_v35 = vld [vmem:[%s5833_s0] sm:$0xff]   ;;  %v4804_v38 = vld [vmem:[%s5834_s2 + $0xe8] ss:$16 sps:$4 sm:$0xff]   ;;  %v4809_v39 = vld [vmem:[%s5834_s2 + $0xcc] ss:$16 sps:$4 sm:$0xff]   ;;  %v93_v12 = vshrl.u32 %v92_v11, 7 }
   0xe   :  { %v4792_v36 = vld [vmem:[%s5834_s2 + $0xe0] ss:$16 sps:$4 sm:$0xff]   ;;  %v4798_v37 = vld [vmem:[%s5834_s2 + $0xc4] ss:$16 sps:$4 sm:$0xff]   ;;  %v4829_v42 = vld [vmem:[%s5834_s2 + $0xc8] ss:$16 sps:$4 sm:$0xff]  }
   0xf   :  { %327 = vmatpush1.bf16.msra.mxu0 %v4178_v15  ;;  %v4816_v40 = vld [vmem:[%s5834_s2 + $0xc0] ss:$16 sps:$4 sm:$0xff]   ;;  %v4823_v41 = vld [vmem:[%s5834_s2 + $0xa4] ss:$16 sps:$4 sm:$0xff]   ;;  %v4208_v43 = vld [vmem:[%s5833_s0 + $0x8] sm:$0xff]  }
  0x10   :  { %440 = vmatpush1.bf16.msra.mxu1 %v4179_v16  ;;  %328 = vmatprep.subr.bf16.mxu0 %v4180_v17  ;;  %v4839_v44 = vld [vmem:[%s5834_s2 + $0xa0] ss:$16 sps:$4 sm:$0xff]   ;;  %v4845_v45 = vld [vmem:[%s5834_s2 + $0xac] ss:$16 sps:$4 sm:$0xff]   ;;  %v4850_v46 = vld [vmem:[%s5834_s2 + $0x84] ss:$16 sps:$4 sm:$0xff]  }
  0x11   :  { %441 = vmatprep.subr.bf16.mxu1 %v4182_v18  ;;  %v4856_v47 = vld [vmem:[%s5834_s2 + $0xa8] ss:$16 sps:$4 sm:$0xff]   ;;  %v4861_v48 = vld [vmem:[%s5834_s2 + $0x8c] ss:$16 sps:$4 sm:$0xff]   ;;  %v4869_v49 = vld [vmem:[%s5834_s2 + $0x80] ss:$16 sps:$4 sm:$0xff]  }
  0x12   :  { %v4874_v50 = vld [vmem:[%s5834_s2 + $0x64] ss:$16 sps:$4 sm:$0xff]   ;;  %v4882_v51 = vld [vmem:[%s5834_s2 + $0x88] ss:$16 sps:$4 sm:$0xff]   ;;  %v4891_v53 = vld [vmem:[%s5834_s2 + $0x60] ss:$16 sps:$4 sm:$0xff]  }
  0x13   :  { %329 = vmatpush1.bf16.msra.mxu0 %v4184_v19  ;;  %v4212_v52 = vld [vmem:[%s5833_s0 + $0x10] sm:$0xff]   ;;  %v4897_v54 = vld [vmem:[%s5834_s2 + $0x6c] ss:$16 sps:$4 sm:$0xff]   ;;  %v4909_v56 = vld [vmem:[%s5834_s2 + $0x68] ss:$16 sps:$4 sm:$0xff]   ;;  %v94_v17 = vsub.s32 0, %v93_v12 }
  0x14   :  { %442 = vmatpush1.bf16.msra.mxu1 %v4185_v20  ;;  %330 = vmatprep.subr.bf16.mxu0 %v4186_v21  ;;  %v4903_v55 = vld [vmem:[%s5834_s2 + $0x44] ss:$16 sps:$4 sm:$0xff]   ;;  %v4914_v57 = vld [vmem:[%s5834_s2 + $0x40] ss:$16 sps:$4 sm:$0xff]   ;;  %v4919_v58 = vld [vmem:[%s5834_s2 + $0x4c] ss:$16 sps:$4 sm:$0xff]  }
  0x15   :  { %443 = vmatprep.subr.bf16.mxu1 %v4188_v22  ;;  %v4926_v59 = vld [vmem:[%s5834_s2 + $0x24] ss:$16 sps:$4 sm:$0xff]   ;;  %v4931_v60 = vld [vmem:[%s5834_s2 + $0x48] ss:$16 sps:$4 sm:$0xff]   ;;  %v4943_v62 = vld [vmem:[%s5834_s2 + $0x20] ss:$16 sps:$4 sm:$0xff]  }
  0x16   :  { %v4219_v61 = vld [vmem:[%s5833_s0 + $0x18] sm:$0xff]   ;;  %v4954_v0 = vld [vmem:[%s5834_s2 + $0x4] ss:$16 sps:$4 sm:$0xff]   ;;  %v4972_v4 = vld [vmem:[%s5834_s2] ss:$16 sps:$4 sm:$0xff]   ;;  %v102_v18 = vsub.s32 2, %v93_v12 }
  0x17   :  { %331 = vmatpush1.bf16.msra.mxu0 %v4190_v23  ;;  %v4949_v63 = vld [vmem:[%s5834_s2 + $0x2c] ss:$16 sps:$4 sm:$0xff]   ;;  %v4959_v2 = vld [vmem:[%s5834_s2 + $0x28] ss:$16 sps:$4 sm:$0xff]   ;;  %v4226_v6 = vld [vmem:[%s5833_s0 + $0x20] sm:$0xff]   ;;  %v98_v22 = vsub.s32 1, %v93_v12 }
  0x18   :  { %444 = vmatpush1.bf16.msra.mxu1 %v4191_v24  ;;  %332 = vmatprep.subr.bf16.mxu0 %v4192_v25  ;;  %v4965_v3 = vld [vmem:[%s5834_s2 + $0xc] ss:$16 sps:$4 sm:$0xff]   ;;  %v4979_v5 = vld [vmem:[%s5834_s2 + $0x8] ss:$16 sps:$4 sm:$0xff]   ;;  %v4240_v8 = vld [vmem:[%s5833_s0 + $0x30] sm:$0xff]   ;;  %v106_v23 = vsub.s32 3, %v93_v12 }
  0x19   :  { %445 = vmatprep.subr.bf16.mxu1 %v4194_v26  ;;  %v4233_v7 = vld [vmem:[%s5833_s0 + $0x28] sm:$0xff]   ;;  %v4250_v9 = vld [vmem:[%s5833_s0 + $0x38] sm:$0xff]   ;;  %v4260_v10 = vld [vmem:[#allocation3] sm:$0xff]  }
  0x1a   :  { %v90_v19 = vld [vmem:[%s5835_s3] sm:$0xf] }
  0x1b   :  { %333 = vmatpush1.bf16.msra.mxu0 %v4196_v27  ;;  %v5063_v26 = vrot.slane %v90_v19, %v94_v17  ;;  %v5065_v27 = vrot.slane %v90_v19, %v102_v18 }
  0x1c   :  { %446 = vmatpush1.bf16.msra.mxu1 %v4197_v28  ;;  %334 = vmatprep.subr.bf16.mxu0 %v4198_v29 }
  0x1d   :  { %447 = vmatprep.subr.bf16.mxu1 %v4200_v30  ;;  %v5067_v30 = vrot.slane %v90_v19, %v98_v22 }
  0x1f   :  { %335 = vmatpush1.bf16.msra.mxu0 %v4202_v31  ;;  %v5069_v31 = vrot.slane %v90_v19, %v106_v23 }
  0x20   :  { %448 = vmatpush1.bf16.msra.mxu1 %v4203_v32  ;;  %820 = vmatprep.subr.bf16.mxu0 %v4779_v33 }
  0x21   :  { %863 = vmatprep.subr.bf16.mxu1 %v4784_v34 }
  0x22   :  { %353 = vmatmul.mubr.bf16.vlgmr.msra.gmra.mxu0 %v4204_v35 }
  0x23   :  { %466 = vmatmul.mubr.bf16.vlgmr.msra.gmra.mxu1 %v4204_v35  ;;  %821 = vmatpush1.bf16.msra.mxu0 %v4792_v36 }
  0x24   :  { %362 = vmatprep.mubr.bf16.mxu0 %v5841_v1  ;;  %475 = vmatprep.mubr.bf16.mxu1 %v5841_v1 }
  0x25   :  { %822 = vmatprep.subr.bf16.mxu0 %v4798_v37  ;;  %864 = vmatpush1.bf16.msra.mxu1 %v4804_v38 }
  0x26   :  { %865 = vmatprep.subr.bf16.mxu1 %v4809_v39 }
  0x27   :  { %823 = vmatpush1.bf16.msra.mxu0 %v4816_v40 }
  0x28   :  { %824 = vmatprep.subr.bf16.mxu0 %v4823_v41 }
  0x29   :  { %866 = vmatpush1.bf16.msra.mxu1 %v4829_v42 }
  0x2a   :  { %363 = vmatmul.mubr.bf16.gmra.mxu0 %v4208_v43  ;;  %867 = vmatprep.subr.bf16.mxu1 %v4845_v45 }
  0x2b   :  { %476 = vmatmul.mubr.bf16.gmra.mxu1 %v4208_v43  ;;  %372 = vmatprep.mubr.bf16.mxu0 %v5841_v1 }
  0x2c   :  { %485 = vmatprep.mubr.bf16.mxu1 %v5841_v1  ;;  %825 = vmatpush1.bf16.msra.mxu0 %v4839_v44 }
  0x2d   :  { %826 = vmatprep.subr.bf16.mxu0 %v4850_v46  ;;  %868 = vmatpush1.bf16.msra.mxu1 %v4856_v47 }
  0x2e   :  { %869 = vmatprep.subr.bf16.mxu1 %v4861_v48 }
  0x30   :  { %827 = vmatpush1.bf16.msra.mxu0 %v4869_v49 }
  0x31   :  { %828 = vmatprep.subr.bf16.mxu0 %v4874_v50  ;;  %870 = vmatpush1.bf16.msra.mxu1 %v4882_v51 }
  0x32   :  { %373 = vmatmul.mubr.bf16.gmra.mxu0 %v4212_v52  ;;  %871 = vmatprep.subr.bf16.mxu1 %v4897_v54 }
  0x33   :  { %486 = vmatmul.mubr.bf16.gmra.mxu1 %v4212_v52  ;;  %382 = vmatprep.mubr.bf16.mxu0 %v5841_v1 }
  0x34   :  { %495 = vmatprep.mubr.bf16.mxu1 %v5841_v1  ;;  %829 = vmatpush1.bf16.msra.mxu0 %v4891_v53 }
  0x35   :  { %830 = vmatprep.subr.bf16.mxu0 %v4903_v55  ;;  %872 = vmatpush1.bf16.msra.mxu1 %v4909_v56 }
  0x36   :  { %873 = vmatprep.subr.bf16.mxu1 %v4919_v58 }
  0x38   :  { %831 = vmatpush1.bf16.msra.mxu0 %v4914_v57 }
  0x39   :  { %832 = vmatprep.subr.bf16.mxu0 %v4926_v59  ;;  %874 = vmatpush1.bf16.msra.mxu1 %v4931_v60 }
  0x3a   :  { %383 = vmatmul.mubr.bf16.gmra.mxu0 %v4219_v61  ;;  %875 = vmatprep.subr.bf16.mxu1 %v4949_v63 }
  0x3b   :  { %496 = vmatmul.mubr.bf16.gmra.mxu1 %v4219_v61  ;;  %392 = vmatprep.mubr.bf16.mxu0 %v5841_v1 }
  0x3c   :  { %505 = vmatprep.mubr.bf16.mxu1 %v5841_v1  ;;  %833 = vmatpush1.bf16.msra.mxu0 %v4943_v62 }
  0x3d   :  { %834 = vmatprep.subr.bf16.mxu0 %v4954_v0  ;;  %876 = vmatpush1.bf16.msra.mxu1 %v4959_v2 }
  0x3e   :  { %877 = vmatprep.subr.bf16.mxu1 %v4965_v3 }
  0x40   :  { %835 = vmatpush1.bf16.msra.mxu0 %v4972_v4 }
  0x41   :  { %878 = vmatpush1.bf16.msra.mxu1 %v4979_v5  ;;  %1187 = vmatprep.subr.bf16.mxu0 %v4779_v33 }
  0x42   :  { %393 = vmatmul.mubr.bf16.gmra.mxu0 %v4226_v6  ;;  %1230 = vmatprep.subr.bf16.mxu1 %v4784_v34 }
  0x43   :  { %506 = vmatmul.mubr.bf16.gmra.mxu1 %v4226_v6  ;;  %402 = vmatprep.mubr.bf16.mxu0 %v5841_v1 }
  0x44   :  { %515 = vmatprep.mubr.bf16.mxu1 %v5841_v1 }
  0x4a   :  { %403 = vmatmul.mubr.bf16.gmra.mxu0 %v4233_v7 }
  0x4b   :  { %516 = vmatmul.mubr.bf16.gmra.mxu1 %v4233_v7  ;;  %412 = vmatprep.mubr.bf16.mxu0 %v5841_v1 }
  0x4c   :  { %525 = vmatprep.mubr.bf16.mxu1 %v5841_v1 }
  0x52   :  { %413 = vmatmul.mubr.bf16.gmra.mxu0 %v4240_v8 }
  0x53   :  { %526 = vmatmul.mubr.bf16.gmra.mxu1 %v4240_v8  ;;  %422 = vmatprep.mubr.bf16.mxu0 %v5841_v1 }
  0x54   :  { %535 = vmatprep.mubr.bf16.mxu1 %v5841_v1 }
  0x5a   :  { %423 = vmatmul.mubr.bf16.gmra.mxu0 %v4250_v9 }
  0x5b   :  { %536 = vmatmul.mubr.bf16.gmra.mxu1 %v4250_v9  ;;  %852 = vmatprep.mubr.bf16.mxu0 %v5841_v1 }
  0x5c   :  { %895 = vmatprep.mubr.bf16.mxu1 %v5841_v1 }
  0x62   :  { %853 = vmatmul.mubr.bf16.vlgmr.msra.gmra.mxu0 %v4260_v10 }
  0x63   :  { %896 = vmatmul.mubr.bf16.vlgmr.msra.gmra.mxu1 %v4260_v10  ;;  %1188 = vmatpush1.bf16.msra.mxu0 %v4792_v36 }
  0x64   :  { %1231 = vmatpush1.bf16.msra.mxu1 %v4804_v38  ;;  %1189 = vmatprep.subr.bf16.mxu0 %v4798_v37 }
  0x65   :  { %1232 = vmatprep.subr.bf16.mxu1 %v4809_v39  ;;  %1219 = vmatprep.mubr.bf16.mxu0 %v5841_v1 }
  0x66   :  { %1262 = vmatprep.mubr.bf16.mxu1 %v5841_v1 }
  0x67   :  { %1190 = vmatpush1.bf16.msra.mxu0 %v4816_v40 }
  0x68   :  { %1233 = vmatpush1.bf16.msra.mxu1 %v4829_v42  ;;  %1191 = vmatprep.subr.bf16.mxu0 %v4823_v41 }
  0x69   :  { %1234 = vmatprep.subr.bf16.mxu1 %v4845_v45 }
  0x6b   :  { %1192 = vmatpush1.bf16.msra.mxu0 %v4839_v44 }
  0x6c   :  { %1235 = vmatpush1.bf16.msra.mxu1 %v4856_v47  ;;  %1193 = vmatprep.subr.bf16.mxu0 %v4850_v46 }
  0x6d   :  { %1236 = vmatprep.subr.bf16.mxu1 %v4861_v48 }
  0x6f   :  { %1194 = vmatpush1.bf16.msra.mxu0 %v4869_v49 }
  0x70   :  { %1237 = vmatpush1.bf16.msra.mxu1 %v4882_v51  ;;  %1195 = vmatprep.subr.bf16.mxu0 %v4874_v50 }
  0x71   :  { %1238 = vmatprep.subr.bf16.mxu1 %v4897_v54 }
  0x73   :  { %1196 = vmatpush1.bf16.msra.mxu0 %v4891_v53 }
  0x74   :  { %1239 = vmatpush1.bf16.msra.mxu1 %v4909_v56  ;;  %1197 = vmatprep.subr.bf16.mxu0 %v4903_v55 }
  0x75   :  { %1240 = vmatprep.subr.bf16.mxu1 %v4919_v58 }
  0x77   :  { %1198 = vmatpush1.bf16.msra.mxu0 %v4914_v57 }
  0x78   :  { %1241 = vmatpush1.bf16.msra.mxu1 %v4931_v60  ;;  %1199 = vmatprep.subr.bf16.mxu0 %v4926_v59 }
  0x79   :  { %1242 = vmatprep.subr.bf16.mxu1 %v4949_v63 }
  0x7b   :  { %1200 = vmatpush1.bf16.msra.mxu0 %v4943_v62 }
  0x7c   :  { %1243 = vmatpush1.bf16.msra.mxu1 %v4959_v2  ;;  %1201 = vmatprep.subr.bf16.mxu0 %v4954_v0 }
  0x7d   :  { %1244 = vmatprep.subr.bf16.mxu1 %v4965_v3 }
  0x7f   :  { %1202 = vmatpush1.bf16.msra.mxu0 %v4972_v4 }
  0x80   :  { %1245 = vmatpush1.bf16.msra.mxu1 %v4979_v5  ;;  %1554 = vmatprep.subr.bf16.mxu0 %v4779_v33 }
  0x81   :  { %1597 = vmatprep.subr.bf16.mxu1 %v4784_v34 }
  0xe2   :  { %v5044_v13 = vpop.f32.mrf.mxu0 }
  0xe3   :  { %v5046_v14 = vpop.f32.mrf.mxu1 }
  0xe4   :  { %v5048_v15 = vpop.f32.mrf.mxu0 }
  0xe5   :  { %v5050_v16 = vpop.f32.mrf.mxu1 }
  0xe6   :  { %v5055_v20 = vpop.f32.mrf.mxu0 }
  0xe7   :  { %v5057_v21 = vpop.f32.mrf.mxu1 }
  0xe8   :  { %v5059_v24 = vpop.f32.mrf.mxu0 }
  0xe9   :  { %v5061_v25 = vpop.f32.mrf.mxu1 }
  0xea   :  { %v364_v28 = vpop.f32.mrf.mxu0 }
  0xeb   :  { %v477_v29 = vpop.f32.mrf.mxu1  ;;  %v5072_v32 = vadd.f32 %v364_v28, %v5063_v26 }
  0xec   :  { %v5075_v33 = vadd.f32 %v477_v29, %v5065_v27  ;;  %v366_v34 = vpop.f32.mrf.mxu0 }
  0xed   :  { %v479_v35 = vpop.f32.mrf.mxu1  ;;  %v5078_v43 = vadd.f32 %v366_v34, %v5067_v30 }
  0xee   :  { %v5081_v52 = vadd.f32 %v479_v35, %v5069_v31  ;;  %v368_v61 = vpop.f32.mrf.mxu0 }
  0xef   :  { %v481_v6 = vpop.f32.mrf.mxu1  ;;  %v5084_v7 = vadd.f32 %v368_v61, %v5063_v26 }
  0xf0   :  { %v5087_v8 = vadd.f32 %v481_v6, %v5065_v27  ;;  %v370_v9 = vpop.f32.mrf.mxu0 }
  0xf1   :  { %v483_v10 = vpop.f32.mrf.mxu1  ;;  %v5090_v11 = vadd.f32 %v370_v9, %v5067_v30 }
  0xf2   :  { %5843 = vst [vmem:[#allocation6_spill] sm:$0xff] %v5087_v8  ;;  %v5093_v12 = vadd.f32 %v483_v10, %v5069_v31  ;;  %v374_v17 = vpop.f32.mrf.mxu0 }
  0xf3   :  { %v487_v18 = vpop.f32.mrf.mxu1  ;;  %v5096_v19 = vadd.f32 %v374_v17, %v5063_v26 }
  0xf4   :  { %v5099_v22 = vadd.f32 %v487_v18, %v5065_v27  ;;  %v376_v23 = vpop.f32.mrf.mxu0 }
  0xf5   :  { %5844 = vst [vmem:[#allocation7_spill] sm:$0xff] %v5096_v19  ;;  %v489_v28 = vpop.f32.mrf.mxu1  ;;  %v5102_v29 = vadd.f32 %v376_v23, %v5067_v30 }
  0xf6   :  { %5845 = vst [vmem:[#allocation8_spill] sm:$0xff] %v5099_v22  ;;  %v5105_v34 = vadd.f32 %v489_v28, %v5069_v31  ;;  %v378_v35 = vpop.f32.mrf.mxu0 }
  0xf7   :  { %5846 = vst [vmem:[#allocation9_spill] sm:$0xff] %v5102_v29  ;;  %v491_v61 = vpop.f32.mrf.mxu1  ;;  %v5108_v6 = vadd.f32 %v378_v35, %v5063_v26 }
  0xf8   :  { %5847 = vst [vmem:[#allocation10_spill] sm:$0xff] %v5105_v34  ;;  %v5111_v9 = vadd.f32 %v491_v61, %v5065_v27  ;;  %v380_v10 = vpop.f32.mrf.mxu0 }
  0xf9   :  { %5848 = vst [vmem:[#allocation11_spill] sm:$0xff] %v5108_v6  ;;  %v493_v17 = vpop.f32.mrf.mxu1  ;;  %v5114_v18 = vadd.f32 %v380_v10, %v5067_v30 }
  0xfa   :  { %5849 = vst [vmem:[#allocation12_spill] sm:$0xff] %v5111_v9  ;;  %v5117_v1 = vadd.f32 %v493_v17, %v5069_v31  ;;  %v384_v23 = vpop.f32.mrf.mxu0 }
  0xfb   :  { %5850 = vst [vmem:[#allocation13_spill] sm:$0xff] %v5114_v18  ;;  %v497_v22 = vpop.f32.mrf.mxu1  ;;  %v5120_v28 = vadd.f32 %v384_v23, %v5063_v26 }
  0xfc   :  { %5851 = vst [vmem:[#allocation14_spill] sm:$0xff] %v5117_v1  ;;  %v5123_v34 = vadd.f32 %v497_v22, %v5065_v27  ;;  %v386_v35 = vpop.f32.mrf.mxu0 }
  0xfd   :  { %5852 = vst [vmem:[#allocation15_spill] sm:$0xff] %v5120_v28  ;;  %v499_v6 = vpop.f32.mrf.mxu1  ;;  %v5126_v61 = vadd.f32 %v386_v35, %v5067_v30 }
  0xfe   :  { %5853 = vst [vmem:[#allocation16_spill] sm:$0xff] %v5123_v34  ;;  %v5129_v9 = vadd.f32 %v499_v6, %v5069_v31  ;;  %v388_v10 = vpop.f32.mrf.mxu0 }
  0xff   :  { %5854 = vst [vmem:[#allocation17_spill] sm:$0xff] %v5126_v61  ;;  %v501_v18 = vpop.f32.mrf.mxu1  ;;  %v5132_v17 = vadd.f32 %v388_v10, %v5063_v26 }
 0x100   :  { %5855 = vst [vmem:[#allocation18_spill] sm:$0xff] %v5129_v9  ;;  %v5135_v1 = vadd.f32 %v501_v18, %v5065_v27  ;;  %v390_v23 = vpop.f32.mrf.mxu0 }
 0x101   :  { %5856 = vst [vmem:[#allocation19_spill] sm:$0xff] %v5132_v17  ;;  %v503_v28 = vpop.f32.mrf.mxu1  ;;  %v5138_v22 = vadd.f32 %v390_v23, %v5067_v30 }
 0x102   :  { %5857 = vst [vmem:[#allocation20_spill] sm:$0xff] %v5135_v1  ;;  %v5141_v34 = vadd.f32 %v503_v28, %v5069_v31  ;;  %v394_v35 = vpop.f32.mrf.mxu0 }
 0x103   :  { %5858 = vst [vmem:[#allocation21_spill] sm:$0xff] %v5138_v22  ;;  %v507_v61 = vpop.f32.mrf.mxu1  ;;  %v5144_v6 = vadd.f32 %v394_v35, %v5063_v26 }
 0x104   :  { %5859 = vst [vmem:[#allocation22_spill] sm:$0xff] %v5141_v34  ;;  %v5147_v9 = vadd.f32 %v507_v61, %v5065_v27  ;;  %v396_v10 = vpop.f32.mrf.mxu0 }
 0x105   :  { %5860 = vst [vmem:[#allocation23_spill] sm:$0xff] %v5144_v6  ;;  %v509_v17 = vpop.f32.mrf.mxu1  ;;  %v5150_v18 = vadd.f32 %v396_v10, %v5067_v30 }
 0x106   :  { %5861 = vst [vmem:[#allocation24_spill] sm:$0xff] %v5147_v9  ;;  %v5153_v1 = vadd.f32 %v509_v17, %v5069_v31  ;;  %v398_v23 = vpop.f32.mrf.mxu0 }
 0x107   :  { %5862 = vst [vmem:[#allocation25_spill] sm:$0xff] %v5150_v18  ;;  %v511_v22 = vpop.f32.mrf.mxu1  ;;  %v5156_v28 = vadd.f32 %v398_v23, %v5063_v26 }
 0x108   :  { %5863 = vst [vmem:[#allocation26_spill] sm:$0xff] %v5153_v1  ;;  %v5159_v34 = vadd.f32 %v511_v22, %v5065_v27  ;;  %v400_v35 = vpop.f32.mrf.mxu0 }
 0x109   :  { %5864 = vst [vmem:[#allocation27_spill] sm:$0xff] %v5156_v28  ;;  %v513_v6 = vpop.f32.mrf.mxu1  ;;  %v5162_v61 = vadd.f32 %v400_v35, %v5067_v30 }
 0x10a   :  { %5865 = vst [vmem:[#allocation28_spill] sm:$0xff] %v5159_v34  ;;  %v5165_v9 = vadd.f32 %v513_v6, %v5069_v31  ;;  %v404_v10 = vpop.f32.mrf.mxu0 }
 0x10b   :  { %5866 = vst [vmem:[#allocation29_spill] sm:$0xff] %v5162_v61  ;;  %v517_v18 = vpop.f32.mrf.mxu1  ;;  %v5168_v17 = vadd.f32 %v404_v10, %v5063_v26 }
 0x10c   :  { %5867 = vst [vmem:[#allocation30_spill] sm:$0xff] %v5165_v9  ;;  %v5171_v1 = vadd.f32 %v517_v18, %v5065_v27  ;;  %v406_v23 = vpop.f32.mrf.mxu0 }
 0x10d   :  { %5868 = vst [vmem:[#allocation31_spill] sm:$0xff] %v5168_v17  ;;  %v519_v28 = vpop.f32.mrf.mxu1  ;;  %v5174_v22 = vadd.f32 %v406_v23, %v5067_v30 }
 0x10e   :  { %5869 = vst [vmem:[#allocation32_spill] sm:$0xff] %v5171_v1  ;;  %v5177_v34 = vadd.f32 %v519_v28, %v5069_v31  ;;  %v408_v35 = vpop.f32.mrf.mxu0 }
 0x10f   :  { %5870 = vst [vmem:[#allocation33_spill] sm:$0xff] %v5174_v22  ;;  %v521_v61 = vpop.f32.mrf.mxu1  ;;  %v5180_v6 = vadd.f32 %v408_v35, %v5063_v26 }
 0x110   :  { %5871 = vst [vmem:[#allocation34_spill] sm:$0xff] %v5177_v34  ;;  %v5183_v9 = vadd.f32 %v521_v61, %v5065_v27  ;;  %v410_v10 = vpop.f32.mrf.mxu0 }
 0x111   :  { %5872 = vst [vmem:[#allocation35_spill] sm:$0xff] %v5180_v6  ;;  %v523_v17 = vpop.f32.mrf.mxu1  ;;  %v5186_v18 = vadd.f32 %v410_v10, %v5067_v30 }
 0x112   :  { %5873 = vst [vmem:[#allocation36_spill] sm:$0xff] %v5183_v9  ;;  %v5189_v1 = vadd.f32 %v523_v17, %v5069_v31  ;;  %v414_v23 = vpop.f32.mrf.mxu0 }
 0x113   :  { %5874 = vst [vmem:[#allocation37_spill] sm:$0xff] %v5186_v18  ;;  %v527_v22 = vpop.f32.mrf.mxu1  ;;  %v5192_v28 = vadd.f32 %v414_v23, %v5063_v26 }
 0x114   :  { %5875 = vst [vmem:[#allocation38_spill] sm:$0xff] %v5189_v1  ;;  %v5195_v34 = vadd.f32 %v527_v22, %v5065_v27  ;;  %v416_v35 = vpop.f32.mrf.mxu0 }
 0x115   :  { %5876 = vst [vmem:[#allocation39_spill] sm:$0xff] %v5192_v28  ;;  %v529_v6 = vpop.f32.mrf.mxu1  ;;  %v5198_v61 = vadd.f32 %v416_v35, %v5067_v30 }
 0x116   :  { %5877 = vst [vmem:[#allocation40_spill] sm:$0xff] %v5195_v34  ;;  %v5201_v9 = vadd.f32 %v529_v6, %v5069_v31  ;;  %v418_v10 = vpop.f32.mrf.mxu0 }
 0x117   :  { %5878 = vst [vmem:[#allocation41_spill] sm:$0xff] %v5198_v61  ;;  %v531_v18 = vpop.f32.mrf.mxu1  ;;  %v5204_v17 = vadd.f32 %v418_v10, %v5063_v26 }
 0x118   :  { %5879 = vst [vmem:[#allocation42_spill] sm:$0xff] %v5201_v9  ;;  %v5207_v1 = vadd.f32 %v531_v18, %v5065_v27  ;;  %v420_v23 = vpop.f32.mrf.mxu0 }
 0x119   :  { %5880 = vst [vmem:[#allocation43_spill] sm:$0xff] %v5204_v17  ;;  %v533_v28 = vpop.f32.mrf.mxu1  ;;  %v5210_v22 = vadd.f32 %v420_v23, %v5067_v30 }
 0x11a   :  { %5881 = vst [vmem:[#allocation44_spill] sm:$0xff] %v5207_v1  ;;  %v5213_v34 = vadd.f32 %v533_v28, %v5069_v31  ;;  %v424_v35 = vpop.f32.mrf.mxu0 }
 0x11b   :  { %5882 = vst [vmem:[#allocation45_spill] sm:$0xff] %v5210_v22  ;;  %v537_v61 = vpop.f32.mrf.mxu1  ;;  %v5216_v6 = vadd.f32 %v424_v35, %v5063_v26 }
 0x11c   :  { %5883 = vst [vmem:[#allocation46_spill] sm:$0xff] %v5213_v34  ;;  %v5219_v9 = vadd.f32 %v537_v61, %v5065_v27  ;;  %v426_v10 = vpop.f32.mrf.mxu0  ;;  %v355_v61 = vadd.f32 %v5044_v13, %v5063_v26  ;;  %v361_v13 = vadd.f32 %v5059_v24, %v5067_v30 }
 0x11d   :  { %5884 = vst [vmem:[#allocation47_spill] sm:$0xff] %v5216_v6  ;;  %v539_v17 = vpop.f32.mrf.mxu1  ;;  %v5222_v18 = vadd.f32 %v426_v10, %v5067_v30 }
 0x11e   :  { %5885 = vst [vmem:[#allocation48_spill] sm:$0xff] %v5219_v9  ;;  %v5225_v1 = vadd.f32 %v539_v17, %v5069_v31  ;;  %v428_v23 = vpop.f32.mrf.mxu0 }
 0x11f   :  { %5886 = vst [vmem:[#allocation49_spill] sm:$0xff] %v5222_v18  ;;  %v541_v22 = vpop.f32.mrf.mxu1  ;;  %v5228_v28 = vadd.f32 %v428_v23, %v5063_v26 }
 0x120   :  { %5887 = vst [vmem:[#allocation50_spill] sm:$0xff] %v5225_v1  ;;  %v5231_v34 = vadd.f32 %v541_v22, %v5065_v27  ;;  %v430_v35 = vpop.f32.mrf.mxu0  ;;  %v357_v1 = vadd.f32 %v5048_v15, %v5067_v30  ;;  %v359_v22 = vadd.f32 %v5055_v20, %v5063_v26  ;;  %v470_v20 = vadd.f32 %v5050_v16, %v5069_v31 }
 0x121   :  { %5888 = vst [vmem:[#allocation51_spill] sm:$0xff] %v5228_v28  ;;  %v543_v6 = vpop.f32.mrf.mxu1  ;;  %v5236_v9 = vadd.f32 %v430_v35, %v5067_v30  ;;  %v468_v26 = vadd.f32 %v5046_v14, %v5065_v27  ;;  %v474_v30 = vadd.f32 %v5061_v25, %v5069_v31 }
 0x122   :  { %5889 = vst [vmem:[#allocation52_spill] sm:$0xff] %v5231_v34  ;;  %v5239_v10 = vadd.f32 %v543_v6, %v5069_v31  ;;  %v854_v17 = vpop.f32.mrf.mxu0 }
 0x123   :  { %5890 = vst [vmem:[#allocation53_spill] sm:$0xff] %v5236_v9  ;;  %v906_v23 = vadd.f32 %v854_v17, %v355_v61  ;;  %v897_v28 = vpop.f32.mrf.mxu1 }
 0x124   :  { %5891 = vst [vmem:[#allocation54_spill] sm:$0xff] %v5239_v10  ;;  %v856_v18 = vpop.f32.mrf.mxu0 }
 0x125   :  { %v3762_v34 = vmul.f32 -1.442695, %v906_v23  ;;  %v907_v29 = vadd.f32 %v856_v18, %v357_v1  ;;  %v899_v6 = vpop.f32.mrf.mxu1 }
 0x126   :  { %v858_v19 = vpop.f32.mrf.mxu0  ;;  %v909_v1 = vadd.f32 %v899_v6, %v470_v20 }
 0x127   :  { %4372 = vpow2.f32 %v3762_v34  ;;  %v3764_v35 = vmul.f32 -1.442695, %v907_v29  ;;  %v910_v10 = vadd.f32 %v858_v19, %v359_v22  ;;  %v901_v61 = vpop.f32.mrf.mxu1  ;;  %v908_v19 = vadd.f32 %v897_v28, %v468_v26 }
 0x128   :  { %v860_v9 = vpop.f32.mrf.mxu0  ;;  %v472_v29 = vadd.f32 %v5057_v21, %v5065_v27  ;;  %v3766_v34 = vmul.f32 -1.442695, %v909_v1 }
 0x129   :  { %4374 = vpow2.f32 %v3764_v35  ;;  %v3763_v8 = vmul.f32 -1.442695, %v910_v10  ;;  %v911_v15 = vadd.f32 %v860_v9, %v361_v13  ;;  %v903_v24 = vpop.f32.mrf.mxu1 }
 0x12a   :  { %v912_v18 = vadd.f32 %v901_v61, %v472_v29 }
 0x12b   :  { %4376 = vpow2.f32 %v3763_v8  ;;  %v3765_v17 = vmul.f32 -1.442695, %v911_v15  ;;  %v913_v8 = vadd.f32 %v903_v24, %v474_v30 }
 0x12d   :  { %4378 = vpow2.f32 %v3765_v17  ;;  %v3767_v23 = vmul.f32 -1.442695, %v913_v8 }
 0x12e   :  { %4380 = vtanh.f32 %v908_v19 }
 0x12f   :  { %4382 = vpow2.f32 %v3766_v34 }
 0x134   :  { %v4373_v9 = vpop.eup %4372 }
 0x135   :  { %v920_v10 = vadd.f32 1.0, %v4373_v9 }
 0x136   :  { %v4375_v16 = vpop.eup %4374 }
 0x137   :  { %4384 = vrcp.f32 %v920_v10  ;;  %v932_v22 = vadd.f32 1.0, %v4375_v16 }
 0x138   :  { %v4377_v14 = vpop.eup %4376  ;;  %4386 = vtanh.f32 %v912_v18 }
 0x139   :  { %4388 = vrcp.f32 %v932_v22  ;;  %v921_v13 = vadd.f32 1.0, %v4377_v14 }
 0x13a   :  { %v4379_v25 = vpop.eup %4378  ;;  %4390 = vpow2.f32 %v3767_v23 }
 0x13b   :  { %4392 = vrcp.f32 %v921_v13  ;;  %v933_v31 = vadd.f32 1.0, %v4379_v25  ;;  %v4381_v21 = vpop.eup %4380  ;;  %v5892_v13 = vmov 0  }
 0x13c   :  { %v4383_v27 = vpop.eup %4382 }
 0x13d   :  { %4394 = vrcp.f32 %v933_v31  ;;  %v946_v1 = vadd.f32 1.0, %v4383_v27 }
 0x13f   :  { %4396 = vrcp.f32 %v946_v1 }
 0x144   :  { %v4385_v28 = vpop.eup %4384 }
 0x145   :  { %v4387_v35 = vpop.eup %4386  ;;  %v954_v6 = vmul.f32 %v4385_v28, %v4381_v21 }
 0x146   :  { %v4389_v15 = vpop.eup %4388 }
 0x147   :  { %v4391_v61 = vpop.eup %4390  ;;  %v952_v17 = vmul.f32 0.0, %v4389_v15 }
 0x148   :  { %v4393_v20 = vpop.eup %4392  ;;  %v947_v19 = vadd.f32 1.0, %v4391_v61 }
 0x149   :  { %v5255_v26 = vadd.f32 %v954_v6, %v952_v17  ;;  %v955_v24 = vmul.f32 %v4393_v20, %v4387_v35 }
 0x14a   :  { %v4395_v30 = vpop.eup %4394 }
 0x14b   :  { %v953_v29 = vmul.f32 0.0, %v4395_v30  ;;  %4398 = vtanh.f32 %v5255_v26 }
 0x14c   :  { %4400 = vrcp.f32 %v947_v19  ;;  %v4397_v8 = vpop.eup %4396 }
 0x14d   :  { %v5258_v34 = vadd.f32 %v955_v24, %v953_v29 }
 0x14f   :  { %4402 = vtanh.f32 %v5258_v34 }
 0x158   :  { %v4399_v9 = vpop.eup %4398 }
 0x159   :  { %v4401_v18 = vpop.eup %4400  ;;  %v960_v16 = vmul.f32 %v4399_v9, %v4397_v8  ;;  %v5319_v9 = vld [vmem:[%s5834_s2 + $0xec] ss:$16 sps:$4 sm:$0xff]  }
 0x15c   :  { %v4403_v10 = vpop.eup %4402 }
 0x15d   :  { %v961_v23 = vmul.f32 %v4403_v10, %v4401_v18  ;;  %v5324_v18 = vld [vmem:[%s5834_s2 + $0xe0] ss:$16 sps:$4 sm:$0xff]   ;;  %v5329_v10 = vld [vmem:[%s5834_s2 + $0xe8] ss:$16 sps:$4 sm:$0xff]  }
 0x15f   :  { %v4087_v22 = vpack.c.bf16 %v961_v23, %v960_v16  ;;  %v5338_v16 = vld [vmem:[%s5834_s2 + $0xc4] ss:$16 sps:$4 sm:$0xff]   ;;  %v5343_v23 = vld [vmem:[%s5834_s2 + $0xcc] ss:$16 sps:$4 sm:$0xff]  }
 0x161   :  { %4088 = vst [vmem:[#allocation3] sm:$0xff] %v4087_v22   ;;  %v5348_v22 = vld [vmem:[%s5834_s2 + $0xc0] ss:$16 sps:$4 sm:$0xff]  }
 0x168   :  { %v4261_v14 = vld [vmem:[#allocation3] sm:$0xff]  }
 0x169   :  { %1220 = vmatmul.mubr.bf16.vlgmr.msra.gmra.mxu0 %v4261_v14  ;;  %1263 = vmatmul.mubr.bf16.vlgmr.msra.gmra.mxu1 %v4261_v14  ;;  %v5353_v14 = vld [vmem:[%s5834_s2 + $0xc8] ss:$16 sps:$4 sm:$0xff]  }
 0x16a   :  { %1555 = vmatpush1.bf16.msra.mxu0 %v4792_v36  ;;  %1598 = vmatpush1.bf16.msra.mxu1 %v4804_v38 }
 0x16b   :  { %1556 = vmatprep.subr.bf16.mxu0 %v4798_v37  ;;  %1599 = vmatprep.subr.bf16.mxu1 %v4809_v39 }
 0x16c   :  { %1586 = vmatprep.mubr.bf16.mxu0 %v5892_v13  ;;  %1629 = vmatprep.mubr.bf16.mxu1 %v5892_v13 }
 0x16e   :  { %1557 = vmatpush1.bf16.msra.mxu0 %v4816_v40  ;;  %1600 = vmatpush1.bf16.msra.mxu1 %v4829_v42 }
 0x16f   :  { %1558 = vmatprep.subr.bf16.mxu0 %v4823_v41  ;;  %1601 = vmatprep.subr.bf16.mxu1 %v4845_v45 }
 0x172   :  { %1559 = vmatpush1.bf16.msra.mxu0 %v4839_v44  ;;  %1602 = vmatpush1.bf16.msra.mxu1 %v4856_v47 }
 0x173   :  { %1560 = vmatprep.subr.bf16.mxu0 %v4850_v46  ;;  %1603 = vmatprep.subr.bf16.mxu1 %v4861_v48 }
 0x176   :  { %1561 = vmatpush1.bf16.msra.mxu0 %v4869_v49  ;;  %1604 = vmatpush1.bf16.msra.mxu1 %v4882_v51 }
 0x177   :  { %1562 = vmatprep.subr.bf16.mxu0 %v4874_v50  ;;  %1605 = vmatprep.subr.bf16.mxu1 %v4897_v54 }
 0x17a   :  { %1563 = vmatpush1.bf16.msra.mxu0 %v4891_v53  ;;  %1606 = vmatpush1.bf16.msra.mxu1 %v4909_v56 }
 0x17b   :  { %1564 = vmatprep.subr.bf16.mxu0 %v4903_v55  ;;  %1607 = vmatprep.subr.bf16.mxu1 %v4919_v58 }
 0x17e   :  { %1565 = vmatpush1.bf16.msra.mxu0 %v4914_v57  ;;  %1608 = vmatpush1.bf16.msra.mxu1 %v4931_v60 }
 0x17f   :  { %1566 = vmatprep.subr.bf16.mxu0 %v4926_v59  ;;  %1609 = vmatprep.subr.bf16.mxu1 %v4949_v63  ;;  %v5893_v59 = vld [vmem:[#allocation6_spill] sm:$0xff] }
 0x182   :  { %1567 = vmatpush1.bf16.msra.mxu0 %v4943_v62  ;;  %1610 = vmatpush1.bf16.msra.mxu1 %v4959_v2 }
 0x183   :  { %1568 = vmatprep.subr.bf16.mxu0 %v4954_v0  ;;  %1611 = vmatprep.subr.bf16.mxu1 %v4965_v3 }
 0x186   :  { %1569 = vmatpush1.bf16.msra.mxu0 %v4972_v4  ;;  %1612 = vmatpush1.bf16.msra.mxu1 %v4979_v5 }
 0x187   :  { %1964 = vmatprep.subr.bf16.mxu1 %v5319_v9 }
 0x229   :  { %v1221_v36 = vpop.f32.mrf.mxu0  ;;  %v1264_v38 = vpop.f32.mrf.mxu1 }
 0x22a   :  { %v1273_v37 = vadd.f32 %v1221_v36, %v5072_v32  ;;  %v1275_v55 = vadd.f32 %v1264_v38, %v5075_v33  ;;  %v5362_v36 = vld [vmem:[%s5834_s2 + $0xa4] ss:$16 sps:$4 sm:$0xff]   ;;  %v5372_v38 = vld [vmem:[%s5834_s2 + $0xa0] ss:$16 sps:$4 sm:$0xff]  }
 0x22b   :  { %v1223_v39 = vpop.f32.mrf.mxu0  ;;  %v1266_v45 = vpop.f32.mrf.mxu1 }
 0x22c   :  { %v3803_v40 = vmul.f32 -1.442695, %v1273_v37  ;;  %v1274_v41 = vadd.f32 %v1223_v39, %v5078_v43  ;;  %v1276_v53 = vadd.f32 %v1266_v45, %v5081_v52  ;;  %v5367_v37 = vld [vmem:[%s5834_s2 + $0xac] ss:$16 sps:$4 sm:$0xff]   ;;  %v5377_v39 = vld [vmem:[%s5834_s2 + $0xa8] ss:$16 sps:$4 sm:$0xff]  }
 0x22d   :  { %v1225_v42 = vpop.f32.mrf.mxu0  ;;  %v1268_v50 = vpop.f32.mrf.mxu1  ;;  %v5410_v45 = vld [vmem:[%s5834_s2 + $0x64] ss:$16 sps:$4 sm:$0xff]  }
 0x22e   :  { %4404 = vpow2.f32 %v3803_v40  ;;  %v3805_v44 = vmul.f32 -1.442695, %v1274_v41  ;;  %v1277_v46 = vadd.f32 %v1225_v42, %v5084_v7  ;;  %v3807_v56 = vmul.f32 -1.442695, %v1276_v53  ;;  %v5386_v40 = vld [vmem:[%s5834_s2 + $0x84] ss:$16 sps:$4 sm:$0xff]  }
 0x22f   :  { %v1227_v47 = vpop.f32.mrf.mxu0  ;;  %v1270_v54 = vpop.f32.mrf.mxu1  ;;  %v1279_v60 = vadd.f32 %v1268_v50, %v5893_v59  ;;  %v5391_v41 = vld [vmem:[%s5834_s2 + $0x8c] ss:$16 sps:$4 sm:$0xff]   ;;  %v5396_v42 = vld [vmem:[%s5834_s2 + $0x80] ss:$16 sps:$4 sm:$0xff]   ;;  %v5449_v53 = vld [vmem:[%s5834_s2 + $0x48] ss:$16 sps:$4 sm:$0xff]  }
 0x230   :  { %4406 = vpow2.f32 %v3805_v44  ;;  %v3804_v48 = vmul.f32 -1.442695, %v1277_v46  ;;  %v1278_v49 = vadd.f32 %v1227_v47, %v5090_v11  ;;  %v1280_v57 = vadd.f32 %v1270_v54, %v5093_v12  ;;  %v5401_v44 = vld [vmem:[%s5834_s2 + $0x88] ss:$16 sps:$4 sm:$0xff]   ;;  %v5415_v46 = vld [vmem:[%s5834_s2 + $0x6c] ss:$16 sps:$4 sm:$0xff]  }
 0x231   :  { %v5420_v47 = vld [vmem:[%s5834_s2 + $0x60] ss:$16 sps:$4 sm:$0xff]   ;;  %v5439_v50 = vld [vmem:[%s5834_s2 + $0x4c] ss:$16 sps:$4 sm:$0xff]   ;;  %v5456_v54 = vld [vmem:[%s5834_s2 + $0x24] ss:$16 sps:$4 sm:$0xff]  }
 0x232   :  { %4408 = vpow2.f32 %v3804_v48  ;;  %v3806_v51 = vmul.f32 -1.442695, %v1278_v49  ;;  %v3808_v0 = vmul.f32 -1.442695, %v1280_v57  ;;  %v5425_v48 = vld [vmem:[%s5834_s2 + $0x68] ss:$16 sps:$4 sm:$0xff]  }
 0x233   :  { %v5434_v49 = vld [vmem:[%s5834_s2 + $0x44] ss:$16 sps:$4 sm:$0xff]   ;;  %v5473_v57 = vld [vmem:[%s5834_s2 + $0x2c] ss:$16 sps:$4 sm:$0xff]  }
 0x234   :  { %4410 = vpow2.f32 %v3806_v51  ;;  %v5444_v51 = vld [vmem:[%s5834_s2 + $0x40] ss:$16 sps:$4 sm:$0xff]   ;;  %v5484_v59 = vld [vmem:[%s5834_s2 + $0xc] ss:$16 sps:$4 sm:$0xff]  }
 0x235   :  { %4412 = vtanh.f32 %v1275_v55  ;;  %v5463_v55 = vld [vmem:[%s5834_s2 + $0x20] ss:$16 sps:$4 sm:$0xff]  }
 0x236   :  { %4414 = vpow2.f32 %v3807_v56  ;;  %v5468_v56 = vld [vmem:[%s5834_s2 + $0x28] ss:$16 sps:$4 sm:$0xff]  }
 0x23b   :  { %v4405_v58 = vpop.eup %4404 }
 0x23c   :  { %v1287_v62 = vadd.f32 1.0, %v4405_v58  ;;  %v5479_v58 = vld [vmem:[%s5834_s2 + $0x4] ss:$16 sps:$4 sm:$0xff]  }
 0x23d   :  { %v4407_v63 = vpop.eup %4406 }
 0x23e   :  { %4416 = vrcp.f32 %v1287_v62  ;;  %v1299_v2 = vadd.f32 1.0, %v4407_v63  ;;  %v5497_v62 = vld [vmem:[%s5834_s2 + $0x8] ss:$16 sps:$4 sm:$0xff]  }
 0x23f   :  { %v4409_v3 = vpop.eup %4408  ;;  %4418 = vtanh.f32 %v1279_v60  ;;  %v5492_v60 = vld [vmem:[%s5834_s2] ss:$16 sps:$4 sm:$0xff]  }
 0x240   :  { %4420 = vrcp.f32 %v1299_v2  ;;  %v1288_v4 = vadd.f32 1.0, %v4409_v3 }
 0x241   :  { %v4411_v5 = vpop.eup %4410  ;;  %4422 = vpow2.f32 %v3808_v0  ;;  %v5894_v0 = vld [vmem:[#allocation7_spill] sm:$0xff] }
 0x242   :  { %4424 = vrcp.f32 %v1288_v4  ;;  %v1300_v32 = vadd.f32 1.0, %v4411_v5  ;;  %v4413_v33 = vpop.eup %4412 }
 0x243   :  { %v4415_v43 = vpop.eup %4414 }
 0x244   :  { %4426 = vrcp.f32 %v1300_v32  ;;  %v1313_v27 = vadd.f32 1.0, %v4415_v43  ;;  %v5895_v32 = vld [vmem:[#allocation9_spill] sm:$0xff] }
 0x246   :  { %4428 = vrcp.f32 %v1313_v27 }
 0x24b   :  { %v4417_v52 = vpop.eup %4416 }
 0x24c   :  { %v4419_v7 = vpop.eup %4418  ;;  %v1321_v11 = vmul.f32 %v4417_v52, %v4413_v33 }
 0x24d   :  { %v4421_v12 = vpop.eup %4420 }
 0x24e   :  { %v4423_v25 = vpop.eup %4422  ;;  %v1319_v31 = vmul.f32 %v4421_v12, %v5255_v26 }
 0x24f   :  { %v4425_v21 = vpop.eup %4424  ;;  %v1314_v15 = vadd.f32 1.0, %v4423_v25 }
 0x250   :  { %v5302_v28 = vadd.f32 %v1321_v11, %v1319_v31  ;;  %v1322_v35 = vmul.f32 %v4425_v21, %v4419_v7  ;;  %v5896_v11 = vld [vmem:[#allocation11_spill] sm:$0xff]  ;;  %v5897_v21 = vld [vmem:[#allocation13_spill] sm:$0xff] }
 0x251   :  { %v4427_v6 = vpop.eup %4426 }
 0x252   :  { %v1320_v61 = vmul.f32 %v4427_v6, %v5258_v34  ;;  %4430 = vtanh.f32 %v5302_v28  ;;  %v5314_v34 = vld [vmem:[%s5834_s2 + $0xe4] ss:$16 sps:$4 sm:$0xff]  }
 0x253   :  { %4432 = vrcp.f32 %v1314_v15  ;;  %v4429_v20 = vpop.eup %4428  ;;  %1921 = vmatprep.subr.bf16.mxu0 %v5314_v34  ;;  %v5898_v15 = vld [vmem:[#allocation10_spill] sm:$0xff] }
 0x254   :  { %v5306_v17 = vadd.f32 %v1322_v35, %v1320_v61 }
 0x256   :  { %4434 = vtanh.f32 %v5306_v17 }
 0x25f   :  { %v4431_v1 = vpop.eup %4430 }
 0x260   :  { %v4433_v26 = vpop.eup %4432  ;;  %v1327_v30 = vmul.f32 %v4431_v1, %v4429_v20  ;;  %v5899_v1 = vld [vmem:[#allocation8_spill] sm:$0xff] }
 0x263   :  { %v4435_v24 = vpop.eup %4434 }
 0x264   :  { %v1328_v19 = vmul.f32 %v4435_v24, %v4433_v26 }
 0x266   :  { %v4092_v29 = vpack.c.bf16 %v1328_v19, %v1327_v30  ;;  %v5900_v30 = vld [vmem:[#allocation14_spill] sm:$0xff] }
 0x268   :  { %4093 = vst [vmem:[#allocation3] sm:$0xff] %v4092_v29  }
 0x26f   :  { %v4262_v8 = vld [vmem:[#allocation3] sm:$0xff]  }
 0x270   :  { %1587 = vmatmul.mubr.bf16.vlgmr.msra.gmra.mxu0 %v4262_v8  ;;  %1630 = vmatmul.mubr.bf16.vlgmr.msra.gmra.mxu1 %v4262_v8  ;;  %v5901_v8 = vld [vmem:[#allocation12_spill] sm:$0xff] }
 0x271   :  { %1953 = vmatprep.mubr.bf16.mxu0 %v5892_v13  ;;  %1996 = vmatprep.mubr.bf16.mxu1 %v5892_v13 }
 0x272   :  { %1922 = vmatpush1.bf16.msra.mxu0 %v5324_v18  ;;  %1965 = vmatpush1.bf16.msra.mxu1 %v5329_v10 }
 0x273   :  { %1923 = vmatprep.subr.bf16.mxu0 %v5338_v16  ;;  %1966 = vmatprep.subr.bf16.mxu1 %v5343_v23 }
 0x276   :  { %1924 = vmatpush1.bf16.msra.mxu0 %v5348_v22  ;;  %1967 = vmatpush1.bf16.msra.mxu1 %v5353_v14 }
 0x277   :  { %1925 = vmatprep.subr.bf16.mxu0 %v5362_v36  ;;  %1968 = vmatprep.subr.bf16.mxu1 %v5367_v37 }
 0x27a   :  { %1926 = vmatpush1.bf16.msra.mxu0 %v5372_v38  ;;  %1969 = vmatpush1.bf16.msra.mxu1 %v5377_v39 }
 0x27b   :  { %1927 = vmatprep.subr.bf16.mxu0 %v5386_v40  ;;  %1970 = vmatprep.subr.bf16.mxu1 %v5391_v41 }
 0x27e   :  { %1928 = vmatpush1.bf16.msra.mxu0 %v5396_v42  ;;  %1971 = vmatpush1.bf16.msra.mxu1 %v5401_v44 }
 0x27f   :  { %1929 = vmatprep.subr.bf16.mxu0 %v5410_v45  ;;  %1972 = vmatprep.subr.bf16.mxu1 %v5415_v46 }
 0x282   :  { %1930 = vmatpush1.bf16.msra.mxu0 %v5420_v47  ;;  %1973 = vmatpush1.bf16.msra.mxu1 %v5425_v48 }
 0x283   :  { %1931 = vmatprep.subr.bf16.mxu0 %v5434_v49  ;;  %1974 = vmatprep.subr.bf16.mxu1 %v5439_v50 }
 0x286   :  { %1932 = vmatpush1.bf16.msra.mxu0 %v5444_v51  ;;  %1975 = vmatpush1.bf16.msra.mxu1 %v5449_v53 }
 0x287   :  { %1933 = vmatprep.subr.bf16.mxu0 %v5456_v54  ;;  %1976 = vmatprep.subr.bf16.mxu1 %v5473_v57 }
 0x28a   :  { %1934 = vmatpush1.bf16.msra.mxu0 %v5463_v55  ;;  %1977 = vmatpush1.bf16.msra.mxu1 %v5468_v56 }
 0x28b   :  { %1935 = vmatprep.subr.bf16.mxu0 %v5479_v58  ;;  %1978 = vmatprep.subr.bf16.mxu1 %v5484_v59 }
 0x28e   :  { %1936 = vmatpush1.bf16.msra.mxu0 %v5492_v60  ;;  %1979 = vmatpush1.bf16.msra.mxu1 %v5497_v62 }
 0x28f   :  { %2288 = vmatprep.subr.bf16.mxu0 %v5314_v34  ;;  %2331 = vmatprep.subr.bf16.mxu1 %v5319_v9 }
 0x330   :  { %v1588_v63 = vpop.f32.mrf.mxu0  ;;  %v1631_v3 = vpop.f32.mrf.mxu1 }
 0x331   :  { %v1640_v2 = vadd.f32 %v1588_v63, %v5894_v0  ;;  %v1642_v26 = vadd.f32 %v1631_v3, %v5899_v1 }
 0x332   :  { %v1590_v4 = vpop.f32.mrf.mxu0  ;;  %v1633_v7 = vpop.f32.mrf.mxu1 }
 0x333   :  { %v3844_v5 = vmul.f32 -1.442695, %v1640_v2  ;;  %v1641_v33 = vadd.f32 %v1590_v4, %v5895_v32  ;;  %v1643_v61 = vadd.f32 %v1633_v7, %v5898_v15 }
 0x334   :  { %v1592_v43 = vpop.f32.mrf.mxu0  ;;  %v1635_v35 = vpop.f32.mrf.mxu1 }
 0x335   :  { %4436 = vpow2.f32 %v3844_v5  ;;  %v3846_v52 = vmul.f32 -1.442695, %v1641_v33  ;;  %v1644_v12 = vadd.f32 %v1592_v43, %v5896_v11  ;;  %v3848_v24 = vmul.f32 -1.442695, %v1643_v61 }
 0x336   :  { %v1594_v25 = vpop.f32.mrf.mxu0  ;;  %v1637_v20 = vpop.f32.mrf.mxu1  ;;  %v1646_v63 = vadd.f32 %v1635_v35, %v5901_v8 }
 0x337   :  { %4438 = vpow2.f32 %v3846_v52  ;;  %v3845_v31 = vmul.f32 -1.442695, %v1644_v12  ;;  %v1645_v27 = vadd.f32 %v1594_v25, %v5897_v21  ;;  %v1647_v19 = vadd.f32 %v1637_v20, %v5900_v30 }
 0x339   :  { %4440 = vpow2.f32 %v3845_v31  ;;  %v3847_v6 = vmul.f32 -1.442695, %v1645_v27  ;;  %v3849_v4 = vmul.f32 -1.442695, %v1647_v19 }
 0x33b   :  { %4442 = vpow2.f32 %v3847_v6 }
 0x33c   :  { %4444 = vtanh.f32 %v1642_v26 }
 0x33d   :  { %4446 = vpow2.f32 %v3848_v24 }
 0x342   :  { %v4437_v29 = vpop.eup %4436 }
 0x343   :  { %v1654_v0 = vadd.f32 1.0, %v4437_v29 }
 0x344   :  { %v4439_v2 = vpop.eup %4438 }
 0x345   :  { %4448 = vrcp.f32 %v1654_v0  ;;  %v1666_v5 = vadd.f32 1.0, %v4439_v2 }
 0x346   :  { %v4441_v32 = vpop.eup %4440  ;;  %4450 = vtanh.f32 %v1646_v63 }
 0x347   :  { %4452 = vrcp.f32 %v1666_v5  ;;  %v1655_v33 = vadd.f32 1.0, %v4441_v32 }
 0x348   :  { %v4443_v43 = vpop.eup %4442  ;;  %4454 = vpow2.f32 %v3849_v4  ;;  %v5902_v4 = vld [vmem:[#allocation15_spill] sm:$0xff] }
 0x349   :  { %4456 = vrcp.f32 %v1655_v33  ;;  %v1667_v3 = vadd.f32 1.0, %v4443_v43  ;;  %v4445_v52 = vpop.eup %4444 }
 0x34a   :  { %v4447_v7 = vpop.eup %4446 }
 0x34b   :  { %4458 = vrcp.f32 %v1667_v3  ;;  %v1680_v6 = vadd.f32 1.0, %v4447_v7  ;;  %v5903_v3 = vld [vmem:[#allocation17_spill] sm:$0xff] }
 0x34d   :  { %4460 = vrcp.f32 %v1680_v6 }
 0x352   :  { %v4449_v11 = vpop.eup %4448 }
 0x353   :  { %v4451_v12 = vpop.eup %4450  ;;  %v1688_v25 = vmul.f32 %v4449_v11, %v4445_v52 }
 0x354   :  { %v4453_v31 = vpop.eup %4452 }
 0x355   :  { %v4455_v21 = vpop.eup %4454  ;;  %v1686_v27 = vmul.f32 %v4453_v31, %v5302_v28 }
 0x356   :  { %v4457_v35 = vpop.eup %4456  ;;  %v1681_v1 = vadd.f32 1.0, %v4455_v21 }
 0x357   :  { %v5514_v15 = vadd.f32 %v1688_v25, %v1686_v27  ;;  %v1689_v61 = vmul.f32 %v4457_v35, %v4451_v12  ;;  %v5904_v25 = vld [vmem:[#allocation19_spill] sm:$0xff]  ;;  %v5905_v35 = vld [vmem:[#allocation21_spill] sm:$0xff] }
 0x358   :  { %v4459_v20 = vpop.eup %4458 }
 0x359   :  { %v1687_v26 = vmul.f32 %v4459_v20, %v5306_v17  ;;  %4462 = vtanh.f32 %v5514_v15 }
 0x35a   :  { %4464 = vrcp.f32 %v1681_v1  ;;  %v4461_v30 = vpop.eup %4460  ;;  %v5906_v1 = vld [vmem:[#allocation18_spill] sm:$0xff] }
 0x35b   :  { %v5518_v24 = vadd.f32 %v1689_v61, %v1687_v26 }
 0x35d   :  { %4466 = vtanh.f32 %v5518_v24 }
 0x366   :  { %v4463_v19 = vpop.eup %4462 }
 0x367   :  { %v4465_v28 = vpop.eup %4464  ;;  %v1694_v8 = vmul.f32 %v4463_v19, %v4461_v30  ;;  %v5907_v19 = vld [vmem:[#allocation16_spill] sm:$0xff] }
 0x36a   :  { %v4467_v29 = vpop.eup %4466 }
 0x36b   :  { %v1695_v63 = vmul.f32 %v4467_v29, %v4465_v28 }
 0x36d   :  { %v4097_v0 = vpack.c.bf16 %v1695_v63, %v1694_v8  ;;  %v5908_v8 = vld [vmem:[#allocation22_spill] sm:$0xff] }
 0x36f   :  { %4098 = vst [vmem:[#allocation3] sm:$0xff] %v4097_v0  }
 0x376   :  { %v4311_v2 = vld [vmem:[#allocation3] sm:$0xff]  }
 0x377   :  { %1954 = vmatmul.mubr.bf16.vlgmr.msra.gmra.mxu0 %v4311_v2  ;;  %1997 = vmatmul.mubr.bf16.vlgmr.msra.gmra.mxu1 %v4311_v2  ;;  %v5909_v2 = vld [vmem:[#allocation20_spill] sm:$0xff] }
 0x378   :  { %2289 = vmatpush1.bf16.msra.mxu0 %v5324_v18  ;;  %2332 = vmatpush1.bf16.msra.mxu1 %v5329_v10 }
 0x379   :  { %2290 = vmatprep.subr.bf16.mxu0 %v5338_v16  ;;  %2333 = vmatprep.subr.bf16.mxu1 %v5343_v23 }
 0x37a   :  { %2320 = vmatprep.mubr.bf16.mxu0 %v5892_v13  ;;  %2363 = vmatprep.mubr.bf16.mxu1 %v5892_v13 }
 0x37c   :  { %2291 = vmatpush1.bf16.msra.mxu0 %v5348_v22  ;;  %2334 = vmatpush1.bf16.msra.mxu1 %v5353_v14 }
 0x37d   :  { %2292 = vmatprep.subr.bf16.mxu0 %v5362_v36  ;;  %2335 = vmatprep.subr.bf16.mxu1 %v5367_v37 }
 0x380   :  { %2293 = vmatpush1.bf16.msra.mxu0 %v5372_v38  ;;  %2336 = vmatpush1.bf16.msra.mxu1 %v5377_v39 }
 0x381   :  { %2294 = vmatprep.subr.bf16.mxu0 %v5386_v40  ;;  %2337 = vmatprep.subr.bf16.mxu1 %v5391_v41 }
 0x384   :  { %2295 = vmatpush1.bf16.msra.mxu0 %v5396_v42  ;;  %2338 = vmatpush1.bf16.msra.mxu1 %v5401_v44 }
 0x385   :  { %2296 = vmatprep.subr.bf16.mxu0 %v5410_v45  ;;  %2339 = vmatprep.subr.bf16.mxu1 %v5415_v46 }
 0x388   :  { %2297 = vmatpush1.bf16.msra.mxu0 %v5420_v47  ;;  %2340 = vmatpush1.bf16.msra.mxu1 %v5425_v48 }
 0x389   :  { %2298 = vmatprep.subr.bf16.mxu0 %v5434_v49  ;;  %2341 = vmatprep.subr.bf16.mxu1 %v5439_v50 }
 0x38c   :  { %2299 = vmatpush1.bf16.msra.mxu0 %v5444_v51  ;;  %2342 = vmatpush1.bf16.msra.mxu1 %v5449_v53 }
 0x38d   :  { %2300 = vmatprep.subr.bf16.mxu0 %v5456_v54  ;;  %2343 = vmatprep.subr.bf16.mxu1 %v5473_v57 }
 0x390   :  { %2301 = vmatpush1.bf16.msra.mxu0 %v5463_v55  ;;  %2344 = vmatpush1.bf16.msra.mxu1 %v5468_v56 }
 0x391   :  { %2302 = vmatprep.subr.bf16.mxu0 %v5479_v58  ;;  %2345 = vmatprep.subr.bf16.mxu1 %v5484_v59 }
 0x394   :  { %2303 = vmatpush1.bf16.msra.mxu0 %v5492_v60  ;;  %2346 = vmatpush1.bf16.msra.mxu1 %v5497_v62 }
 0x395   :  { %2655 = vmatprep.subr.bf16.mxu0 %v5314_v34  ;;  %2698 = vmatprep.subr.bf16.mxu1 %v5319_v9 }
 0x437   :  { %v1955_v17 = vpop.f32.mrf.mxu0  ;;  %v1998_v32 = vpop.f32.mrf.mxu1 }
 0x438   :  { %v2007_v5 = vadd.f32 %v1955_v17, %v5902_v4  ;;  %v2009_v28 = vadd.f32 %v1998_v32, %v5907_v19 }
 0x439   :  { %v1957_v33 = vpop.f32.mrf.mxu0  ;;  %v2000_v12 = vpop.f32.mrf.mxu1 }
 0x43a   :  { %v3885_v43 = vmul.f32 -1.442695, %v2007_v5  ;;  %v2008_v52 = vadd.f32 %v1957_v33, %v5903_v3  ;;  %v2010_v26 = vadd.f32 %v2000_v12, %v5906_v1 }
 0x43b   :  { %v1959_v7 = vpop.f32.mrf.mxu0  ;;  %v2002_v61 = vpop.f32.mrf.mxu1 }
 0x43c   :  { %4468 = vpow2.f32 %v3885_v43  ;;  %v3887_v11 = vmul.f32 -1.442695, %v2008_v52  ;;  %v2011_v31 = vadd.f32 %v1959_v7, %v5904_v25  ;;  %v3889_v29 = vmul.f32 -1.442695, %v2010_v26 }
 0x43d   :  { %v1961_v21 = vpop.f32.mrf.mxu0  ;;  %v2004_v30 = vpop.f32.mrf.mxu1  ;;  %v2013_v17 = vadd.f32 %v2002_v61, %v5909_v2 }
 0x43e   :  { %4470 = vpow2.f32 %v3887_v11  ;;  %v3886_v27 = vmul.f32 -1.442695, %v2011_v31  ;;  %v2012_v6 = vadd.f32 %v1961_v21, %v5905_v35  ;;  %v2014_v63 = vadd.f32 %v2004_v30, %v5908_v8 }
 0x440   :  { %4472 = vpow2.f32 %v3886_v27  ;;  %v3888_v20 = vmul.f32 -1.442695, %v2012_v6  ;;  %v3890_v33 = vmul.f32 -1.442695, %v2014_v63 }
 0x442   :  { %4474 = vpow2.f32 %v3888_v20 }
 0x443   :  { %4476 = vtanh.f32 %v2009_v28 }
 0x444   :  { %4478 = vpow2.f32 %v3889_v29 }
 0x449   :  { %v4469_v0 = vpop.eup %4468 }
 0x44a   :  { %v2021_v4 = vadd.f32 1.0, %v4469_v0 }
 0x44b   :  { %v4471_v5 = vpop.eup %4470 }
 0x44c   :  { %4480 = vrcp.f32 %v2021_v4  ;;  %v2033_v43 = vadd.f32 1.0, %v4471_v5 }
 0x44d   :  { %v4473_v3 = vpop.eup %4472  ;;  %4482 = vtanh.f32 %v2013_v17 }
 0x44e   :  { %4484 = vrcp.f32 %v2033_v43  ;;  %v2022_v52 = vadd.f32 1.0, %v4473_v3 }
 0x44f   :  { %v4475_v7 = vpop.eup %4474  ;;  %4486 = vpow2.f32 %v3890_v33  ;;  %v5910_v33 = vld [vmem:[#allocation23_spill] sm:$0xff] }
 0x450   :  { %4488 = vrcp.f32 %v2022_v52  ;;  %v2034_v32 = vadd.f32 1.0, %v4475_v7  ;;  %v4477_v11 = vpop.eup %4476 }
 0x451   :  { %v4479_v12 = vpop.eup %4478 }
 0x452   :  { %4490 = vrcp.f32 %v2034_v32  ;;  %v2047_v20 = vadd.f32 1.0, %v4479_v12  ;;  %v5911_v32 = vld [vmem:[#allocation25_spill] sm:$0xff] }
 0x454   :  { %4492 = vrcp.f32 %v2047_v20 }
 0x459   :  { %v4481_v25 = vpop.eup %4480 }
 0x45a   :  { %v4483_v31 = vpop.eup %4482  ;;  %v2055_v21 = vmul.f32 %v4481_v25, %v4477_v11 }
 0x45b   :  { %v4485_v27 = vpop.eup %4484 }
 0x45c   :  { %v4487_v35 = vpop.eup %4486  ;;  %v2053_v6 = vmul.f32 %v4485_v27, %v5514_v15 }
 0x45d   :  { %v4489_v61 = vpop.eup %4488  ;;  %v2048_v19 = vadd.f32 1.0, %v4487_v35 }
 0x45e   :  { %v5564_v1 = vadd.f32 %v2055_v21, %v2053_v6  ;;  %v2056_v26 = vmul.f32 %v4489_v61, %v4483_v31  ;;  %v5912_v21 = vld [vmem:[#allocation27_spill] sm:$0xff] }
 0x45f   :  { %v4491_v30 = vpop.eup %4490 }
 0x460   :  { %v2054_v28 = vmul.f32 %v4491_v30, %v5518_v24  ;;  %4494 = vtanh.f32 %v5564_v1 }
 0x461   :  { %4496 = vrcp.f32 %v2048_v19  ;;  %v4493_v8 = vpop.eup %4492 }
 0x462   :  { %v5568_v29 = vadd.f32 %v2056_v26, %v2054_v28  ;;  %v5914_v26 = vld [vmem:[#allocation26_spill] sm:$0xff]  ;;  %v5915_v28 = vld [vmem:[#allocation24_spill] sm:$0xff] }
 0x464   :  { %4498 = vtanh.f32 %v5568_v29 }
 0x46d   :  { %v4495_v63 = vpop.eup %4494 }
 0x46e   :  { %v4497_v15 = vpop.eup %4496  ;;  %v2061_v2 = vmul.f32 %v4495_v63, %v4493_v8 }
 0x471   :  { %v4499_v0 = vpop.eup %4498 }
 0x472   :  { %v2062_v17 = vmul.f32 %v4499_v0, %v4497_v15  ;;  %v5916_v15 = vld [vmem:[#allocation30_spill] sm:$0xff] }
 0x474   :  { %v4102_v4 = vpack.c.bf16 %v2062_v17, %v2061_v2  ;;  %v5917_v17 = vld [vmem:[#allocation28_spill] sm:$0xff] }
 0x476   :  { %4103 = vst [vmem:[#allocation3] sm:$0xff] %v4102_v4  }
 0x47d   :  { %v4312_v5 = vld [vmem:[#allocation3] sm:$0xff]  }
 0x47e   :  { %2321 = vmatmul.mubr.bf16.vlgmr.msra.gmra.mxu0 %v4312_v5  ;;  %2364 = vmatmul.mubr.bf16.vlgmr.msra.gmra.mxu1 %v4312_v5 }
 0x47f   :  { %2656 = vmatpush1.bf16.msra.mxu0 %v5324_v18  ;;  %2699 = vmatpush1.bf16.msra.mxu1 %v5329_v10 }
 0x480   :  { %2657 = vmatprep.subr.bf16.mxu0 %v5338_v16  ;;  %2700 = vmatprep.subr.bf16.mxu1 %v5343_v23 }
 0x481   :  { %2687 = vmatprep.mubr.bf16.mxu0 %v5892_v13  ;;  %2730 = vmatprep.mubr.bf16.mxu1 %v5892_v13 }
 0x483   :  { %2658 = vmatpush1.bf16.msra.mxu0 %v5348_v22  ;;  %2701 = vmatpush1.bf16.msra.mxu1 %v5353_v14 }
 0x484   :  { %2659 = vmatprep.subr.bf16.mxu0 %v5362_v36  ;;  %2702 = vmatprep.subr.bf16.mxu1 %v5367_v37 }
 0x487   :  { %2660 = vmatpush1.bf16.msra.mxu0 %v5372_v38  ;;  %2703 = vmatpush1.bf16.msra.mxu1 %v5377_v39 }
 0x488   :  { %2661 = vmatprep.subr.bf16.mxu0 %v5386_v40  ;;  %2704 = vmatprep.subr.bf16.mxu1 %v5391_v41 }
 0x48b   :  { %2662 = vmatpush1.bf16.msra.mxu0 %v5396_v42  ;;  %2705 = vmatpush1.bf16.msra.mxu1 %v5401_v44 }
 0x48c   :  { %2663 = vmatprep.subr.bf16.mxu0 %v5410_v45  ;;  %2706 = vmatprep.subr.bf16.mxu1 %v5415_v46 }
 0x48f   :  { %2664 = vmatpush1.bf16.msra.mxu0 %v5420_v47  ;;  %2707 = vmatpush1.bf16.msra.mxu1 %v5425_v48 }
 0x490   :  { %2665 = vmatprep.subr.bf16.mxu0 %v5434_v49  ;;  %2708 = vmatprep.subr.bf16.mxu1 %v5439_v50 }
 0x493   :  { %2666 = vmatpush1.bf16.msra.mxu0 %v5444_v51  ;;  %2709 = vmatpush1.bf16.msra.mxu1 %v5449_v53 }
 0x494   :  { %2667 = vmatprep.subr.bf16.mxu0 %v5456_v54  ;;  %2710 = vmatprep.subr.bf16.mxu1 %v5473_v57 }
 0x497   :  { %2668 = vmatpush1.bf16.msra.mxu0 %v5463_v55  ;;  %2711 = vmatpush1.bf16.msra.mxu1 %v5468_v56 }
 0x498   :  { %2669 = vmatprep.subr.bf16.mxu0 %v5479_v58  ;;  %2712 = vmatprep.subr.bf16.mxu1 %v5484_v59 }
 0x49b   :  { %2670 = vmatpush1.bf16.msra.mxu0 %v5492_v60  ;;  %2713 = vmatpush1.bf16.msra.mxu1 %v5497_v62 }
 0x49c   :  { %3022 = vmatprep.subr.bf16.mxu0 %v5314_v34  ;;  %3065 = vmatprep.subr.bf16.mxu1 %v5319_v9  ;;  %v5913_v34 = vld [vmem:[#allocation29_spill] sm:$0xff] }
 0x53e   :  { %v2322_v24 = vpop.f32.mrf.mxu0  ;;  %v2365_v3 = vpop.f32.mrf.mxu1 }
 0x53f   :  { %v2374_v43 = vadd.f32 %v2322_v24, %v5910_v33  ;;  %v2376_v8 = vadd.f32 %v2365_v3, %v5915_v28 }
 0x540   :  { %v2324_v52 = vpop.f32.mrf.mxu0  ;;  %v2367_v31 = vpop.f32.mrf.mxu1 }
 0x541   :  { %v3926_v7 = vmul.f32 -1.442695, %v2374_v43  ;;  %v2375_v11 = vadd.f32 %v2324_v52, %v5911_v32  ;;  %v2377_v30 = vadd.f32 %v2367_v31, %v5914_v26 }
 0x542   :  { %v2326_v12 = vpop.f32.mrf.mxu0  ;;  %v2369_v9 = vpop.f32.mrf.mxu1 }
 0x543   :  { %4500 = vpow2.f32 %v3926_v7  ;;  %v3928_v25 = vmul.f32 -1.442695, %v2375_v11  ;;  %v2378_v27 = vadd.f32 %v2326_v12, %v5912_v21  ;;  %v3930_v63 = vmul.f32 -1.442695, %v2377_v30 }
 0x544   :  { %v2328_v35 = vpop.f32.mrf.mxu0  ;;  %v2371_v19 = vpop.f32.mrf.mxu1  ;;  %v2380_v4 = vadd.f32 %v2369_v9, %v5917_v17 }
 0x545   :  { %4502 = vpow2.f32 %v3928_v25  ;;  %v3927_v6 = vmul.f32 -1.442695, %v2378_v27  ;;  %v2379_v61 = vadd.f32 %v2328_v35, %v5913_v34  ;;  %v2381_v0 = vadd.f32 %v2371_v19, %v5916_v15 }
 0x547   :  { %4504 = vpow2.f32 %v3927_v6  ;;  %v3929_v20 = vmul.f32 -1.442695, %v2379_v61  ;;  %v3931_v33 = vmul.f32 -1.442695, %v2381_v0 }
 0x549   :  { %4506 = vpow2.f32 %v3929_v20 }
 0x54a   :  { %4508 = vtanh.f32 %v2376_v8 }
 0x54b   :  { %4510 = vpow2.f32 %v3930_v63 }
 0x550   :  { %v4501_v2 = vpop.eup %4500 }
 0x551   :  { %v2388_v5 = vadd.f32 1.0, %v4501_v2 }
 0x552   :  { %v4503_v24 = vpop.eup %4502 }
 0x553   :  { %4512 = vrcp.f32 %v2388_v5  ;;  %v2400_v43 = vadd.f32 1.0, %v4503_v24 }
 0x554   :  { %v4505_v52 = vpop.eup %4504  ;;  %4514 = vtanh.f32 %v2380_v4 }
 0x555   :  { %4516 = vrcp.f32 %v2400_v43  ;;  %v2389_v7 = vadd.f32 1.0, %v4505_v52 }
 0x556   :  { %v4507_v32 = vpop.eup %4506  ;;  %4518 = vpow2.f32 %v3931_v33 }
 0x557   :  { %4520 = vrcp.f32 %v2389_v7  ;;  %v2401_v3 = vadd.f32 1.0, %v4507_v32  ;;  %v4509_v11 = vpop.eup %4508 }
 0x558   :  { %v4511_v12 = vpop.eup %4510 }
 0x559   :  { %4522 = vrcp.f32 %v2401_v3  ;;  %v2414_v61 = vadd.f32 1.0, %v4511_v12 }
 0x55b   :  { %4524 = vrcp.f32 %v2414_v61 }
 0x560   :  { %v4513_v25 = vpop.eup %4512 }
 0x561   :  { %v4515_v31 = vpop.eup %4514  ;;  %v2422_v21 = vmul.f32 %v4513_v25, %v4509_v11 }
 0x562   :  { %v4517_v27 = vpop.eup %4516 }
 0x563   :  { %v4519_v35 = vpop.eup %4518  ;;  %v2420_v6 = vmul.f32 %v4517_v27, %v5564_v1 }
 0x564   :  { %v4521_v34 = vpop.eup %4520  ;;  %v2415_v30 = vadd.f32 1.0, %v4519_v35 }
 0x565   :  { %v5614_v9 = vadd.f32 %v2422_v21, %v2420_v6  ;;  %v2423_v20 = vmul.f32 %v4521_v34, %v4515_v31 }
 0x566   :  { %v4523_v26 = vpop.eup %4522 }
 0x567   :  { %v2421_v19 = vmul.f32 %v4523_v26, %v5568_v29  ;;  %4526 = vtanh.f32 %v5614_v9 }
 0x568   :  { %4528 = vrcp.f32 %v2415_v30  ;;  %v4525_v8 = vpop.eup %4524 }
 0x569   :  { %v5618_v28 = vadd.f32 %v2423_v20, %v2421_v19 }
 0x56b   :  { %4530 = vtanh.f32 %v5618_v28 }
 0x574   :  { %v4527_v63 = vpop.eup %4526 }
 0x575   :  { %v4529_v1 = vpop.eup %4528  ;;  %v2428_v0 = vmul.f32 %v4527_v63, %v4525_v8 }
 0x578   :  { %v4531_v15 = vpop.eup %4530 }
 0x579   :  { %v2429_v2 = vmul.f32 %v4531_v15, %v4529_v1 }
 0x57b   :  { %v4107_v17 = vpack.c.bf16 %v2429_v2, %v2428_v0 }
 0x57d   :  { %4108 = vst [vmem:[#allocation3] sm:$0xff] %v4107_v17  }
 0x584   :  { %v4313_v4 = vld [vmem:[#allocation3] sm:$0xff]  }
 0x585   :  { %2688 = vmatmul.mubr.bf16.vlgmr.msra.gmra.mxu0 %v4313_v4  ;;  %2731 = vmatmul.mubr.bf16.vlgmr.msra.gmra.mxu1 %v4313_v4 }
 0x586   :  { %3023 = vmatpush1.bf16.msra.mxu0 %v5324_v18  ;;  %3066 = vmatpush1.bf16.msra.mxu1 %v5329_v10  ;;  %v5918_v10 = vld [vmem:[#allocation31_spill] sm:$0xff] }
 0x587   :  { %3024 = vmatprep.subr.bf16.mxu0 %v5338_v16  ;;  %3067 = vmatprep.subr.bf16.mxu1 %v5343_v23 }
 0x588   :  { %3054 = vmatprep.mubr.bf16.mxu0 %v5892_v13  ;;  %3097 = vmatprep.mubr.bf16.mxu1 %v5892_v13 }
 0x58a   :  { %3025 = vmatpush1.bf16.msra.mxu0 %v5348_v22  ;;  %3068 = vmatpush1.bf16.msra.mxu1 %v5353_v14 }
 0x58b   :  { %3026 = vmatprep.subr.bf16.mxu0 %v5362_v36  ;;  %3069 = vmatprep.subr.bf16.mxu1 %v5367_v37  ;;  %v5919_v36 = vld [vmem:[#allocation33_spill] sm:$0xff] }
 0x58e   :  { %3027 = vmatpush1.bf16.msra.mxu0 %v5372_v38  ;;  %3070 = vmatpush1.bf16.msra.mxu1 %v5377_v39 }
 0x58f   :  { %3028 = vmatprep.subr.bf16.mxu0 %v5386_v40  ;;  %3071 = vmatprep.subr.bf16.mxu1 %v5391_v41  ;;  %v5920_v41 = vld [vmem:[#allocation35_spill] sm:$0xff] }
 0x592   :  { %3029 = vmatpush1.bf16.msra.mxu0 %v5396_v42  ;;  %3072 = vmatpush1.bf16.msra.mxu1 %v5401_v44 }
 0x593   :  { %3030 = vmatprep.subr.bf16.mxu0 %v5410_v45  ;;  %3073 = vmatprep.subr.bf16.mxu1 %v5415_v46  ;;  %v5921_v46 = vld [vmem:[#allocation37_spill] sm:$0xff] }
 0x596   :  { %3031 = vmatpush1.bf16.msra.mxu0 %v5420_v47  ;;  %3074 = vmatpush1.bf16.msra.mxu1 %v5425_v48 }
 0x597   :  { %3032 = vmatprep.subr.bf16.mxu0 %v5434_v49  ;;  %3075 = vmatprep.subr.bf16.mxu1 %v5439_v50  ;;  %v5922_v50 = vld [vmem:[#allocation34_spill] sm:$0xff] }
 0x59a   :  { %3033 = vmatpush1.bf16.msra.mxu0 %v5444_v51  ;;  %3076 = vmatpush1.bf16.msra.mxu1 %v5449_v53 }
 0x59b   :  { %3034 = vmatprep.subr.bf16.mxu0 %v5456_v54  ;;  %3077 = vmatprep.subr.bf16.mxu1 %v5473_v57  ;;  %v5923_v54 = vld [vmem:[#allocation32_spill] sm:$0xff]  ;;  %v5924_v57 = vld [vmem:[#allocation38_spill] sm:$0xff] }
 0x59e   :  { %3035 = vmatpush1.bf16.msra.mxu0 %v5463_v55  ;;  %3078 = vmatpush1.bf16.msra.mxu1 %v5468_v56 }
 0x59f   :  { %3036 = vmatprep.subr.bf16.mxu0 %v5479_v58  ;;  %3079 = vmatprep.subr.bf16.mxu1 %v5484_v59 }
 0x5a2   :  { %3037 = vmatpush1.bf16.msra.mxu0 %v5492_v60  ;;  %3080 = vmatpush1.bf16.msra.mxu1 %v5497_v62  ;;  %v5925_v60 = vld [vmem:[#allocation36_spill] sm:$0xff] }
 0x645   :  { %v2689_v18 = vpop.f32.mrf.mxu0  ;;  %v2732_v23 = vpop.f32.mrf.mxu1 }
 0x646   :  { %v2741_v16 = vadd.f32 %v2689_v18, %v5918_v10  ;;  %v2743_v55 = vadd.f32 %v2732_v23, %v5923_v54  ;;  %v4320_v18 = vld [vmem:[%s5834_s2 + $0xec] ss:$16 sps:$4 sm:$0xff]   ;;  %v4315_v10 = vld [vmem:[%s5834_s2 + $0xe0] ss:$16 sps:$4 sm:$0xff]   ;;  %v4353_v54 = vld [vmem:[%s5834_s2 + $0x24] ss:$16 sps:$4 sm:$0xff]  }
 0x647   :  { %v2691_v22 = vpop.f32.mrf.mxu0  ;;  %v2734_v40 = vpop.f32.mrf.mxu1  ;;  %3432 = vmatprep.subr.bf16.mxu1 %v4320_v18  ;;  %v4326_v23 = vld [vmem:[%s5834_s2 + $0xcc] ss:$16 sps:$4 sm:$0xff]  }
 0x648   :  { %v3967_v14 = vmul.f32 -1.442695, %v2741_v16  ;;  %v2742_v37 = vadd.f32 %v2691_v22, %v5919_v36  ;;  %v2744_v51 = vadd.f32 %v2734_v40, %v5922_v50  ;;  %v4318_v16 = vld [vmem:[%s5834_s2 + $0xe8] ss:$16 sps:$4 sm:$0xff]   ;;  %v4321_v22 = vld [vmem:[%s5834_s2 + $0xc0] ss:$16 sps:$4 sm:$0xff]  }
 0x649   :  { %v2693_v38 = vpop.f32.mrf.mxu0  ;;  %v2736_v48 = vpop.f32.mrf.mxu1  ;;  %v4329_v36 = vld [vmem:[%s5834_s2 + $0xa4] ss:$16 sps:$4 sm:$0xff]   ;;  %v4350_v50 = vld [vmem:[%s5834_s2 + $0x4c] ss:$16 sps:$4 sm:$0xff]  }
 0x64a   :  { %4532 = vpow2.f32 %v3967_v14  ;;  %v3969_v39 = vmul.f32 -1.442695, %v2742_v37  ;;  %v2745_v42 = vadd.f32 %v2693_v38, %v5920_v41  ;;  %v3971_v56 = vmul.f32 -1.442695, %v2744_v51  ;;  %v4324_v14 = vld [vmem:[%s5834_s2 + $0xc8] ss:$16 sps:$4 sm:$0xff]  }
 0x64b   :  { %v2695_v44 = vpop.f32.mrf.mxu0  ;;  %v2738_v53 = vpop.f32.mrf.mxu1  ;;  %v2747_v62 = vadd.f32 %v2736_v48, %v5925_v60  ;;  %v4332_v37 = vld [vmem:[%s5834_s2 + $0xac] ss:$16 sps:$4 sm:$0xff]   ;;  %v4327_v38 = vld [vmem:[%s5834_s2 + $0xa0] ss:$16 sps:$4 sm:$0xff]   ;;  %v4335_v40 = vld [vmem:[%s5834_s2 + $0x84] ss:$16 sps:$4 sm:$0xff]  }
 0x64c   :  { %4534 = vpow2.f32 %v3969_v39  ;;  %v3968_v45 = vmul.f32 -1.442695, %v2745_v42  ;;  %v2746_v47 = vadd.f32 %v2695_v44, %v5921_v46  ;;  %v2748_v58 = vadd.f32 %v2738_v53, %v5924_v57  ;;  %v4330_v39 = vld [vmem:[%s5834_s2 + $0xa8] ss:$16 sps:$4 sm:$0xff]   ;;  %v4338_v41 = vld [vmem:[%s5834_s2 + $0x8c] ss:$16 sps:$4 sm:$0xff]  }
 0x64d   :  { %v4333_v42 = vld [vmem:[%s5834_s2 + $0x80] ss:$16 sps:$4 sm:$0xff]   ;;  %v4336_v44 = vld [vmem:[%s5834_s2 + $0x88] ss:$16 sps:$4 sm:$0xff]   ;;  %v4344_v46 = vld [vmem:[%s5834_s2 + $0x6c] ss:$16 sps:$4 sm:$0xff]  }
 0x64e   :  { %4536 = vpow2.f32 %v3968_v45  ;;  %v3970_v49 = vmul.f32 -1.442695, %v2746_v47  ;;  %v3972_v24 = vmul.f32 -1.442695, %v2748_v58  ;;  %v4341_v45 = vld [vmem:[%s5834_s2 + $0x64] ss:$16 sps:$4 sm:$0xff]  }
 0x64f   :  { %v4339_v47 = vld [vmem:[%s5834_s2 + $0x60] ss:$16 sps:$4 sm:$0xff]   ;;  %v4342_v48 = vld [vmem:[%s5834_s2 + $0x68] ss:$16 sps:$4 sm:$0xff]   ;;  %v4356_v57 = vld [vmem:[%s5834_s2 + $0x2c] ss:$16 sps:$4 sm:$0xff]  }
 0x650   :  { %4538 = vpow2.f32 %v3970_v49  ;;  %v4347_v49 = vld [vmem:[%s5834_s2 + $0x44] ss:$16 sps:$4 sm:$0xff]   ;;  %v4345_v51 = vld [vmem:[%s5834_s2 + $0x40] ss:$16 sps:$4 sm:$0xff]   ;;  %v4348_v53 = vld [vmem:[%s5834_s2 + $0x48] ss:$16 sps:$4 sm:$0xff]  }
 0x651   :  { %4540 = vtanh.f32 %v2743_v55  ;;  %v4351_v55 = vld [vmem:[%s5834_s2 + $0x20] ss:$16 sps:$4 sm:$0xff]   ;;  %v4359_v58 = vld [vmem:[%s5834_s2 + $0x4] ss:$16 sps:$4 sm:$0xff]  }
 0x652   :  { %4542 = vpow2.f32 %v3971_v56  ;;  %v4354_v56 = vld [vmem:[%s5834_s2 + $0x28] ss:$16 sps:$4 sm:$0xff]   ;;  %v4357_v60 = vld [vmem:[%s5834_s2] ss:$16 sps:$4 sm:$0xff]  }
 0x657   :  { %v4533_v59 = vpop.eup %4532 }
 0x658   :  { %v2755_v29 = vadd.f32 1.0, %v4533_v59  ;;  %v4362_v59 = vld [vmem:[%s5834_s2 + $0xc] ss:$16 sps:$4 sm:$0xff]  }
 0x659   :  { %v4535_v5 = vpop.eup %4534 }
 0x65a   :  { %4544 = vrcp.f32 %v2755_v29  ;;  %v2767_v33 = vadd.f32 1.0, %v4535_v5  ;;  %v5926_v5 = vld [vmem:[#allocation39_spill] sm:$0xff] }
 0x65b   :  { %v4537_v43 = vpop.eup %4536  ;;  %4546 = vtanh.f32 %v2747_v62  ;;  %v4360_v62 = vld [vmem:[%s5834_s2 + $0x8] ss:$16 sps:$4 sm:$0xff]  }
 0x65c   :  { %4548 = vrcp.f32 %v2767_v33  ;;  %v2756_v52 = vadd.f32 1.0, %v4537_v43 }
 0x65d   :  { %v4539_v7 = vpop.eup %4538  ;;  %4550 = vpow2.f32 %v3972_v24 }
 0x65e   :  { %4552 = vrcp.f32 %v2756_v52  ;;  %v2768_v32 = vadd.f32 1.0, %v4539_v7  ;;  %v4541_v3 = vpop.eup %4540  ;;  %v5927_v7 = vld [vmem:[#allocation41_spill] sm:$0xff] }
 0x65f   :  { %v4543_v11 = vpop.eup %4542 }
 0x660   :  { %4554 = vrcp.f32 %v2768_v32  ;;  %v2781_v34 = vadd.f32 1.0, %v4543_v11 }
 0x662   :  { %4556 = vrcp.f32 %v2781_v34 }
 0x667   :  { %v4545_v12 = vpop.eup %4544 }
 0x668   :  { %v4547_v25 = vpop.eup %4546  ;;  %v2789_v31 = vmul.f32 %v4545_v12, %v4541_v3 }
 0x669   :  { %v4549_v21 = vpop.eup %4548 }
 0x66a   :  { %v4551_v27 = vpop.eup %4550  ;;  %v2787_v35 = vmul.f32 %v4549_v21, %v5614_v9 }
 0x66b   :  { %v4553_v6 = vpop.eup %4552  ;;  %v2782_v30 = vadd.f32 1.0, %v4551_v27 }
 0x66c   :  { %v5662_v61 = vadd.f32 %v2789_v31, %v2787_v35  ;;  %v2790_v20 = vmul.f32 %v4553_v6, %v4547_v25  ;;  %v5928_v25 = vld [vmem:[#allocation43_spill] sm:$0xff]  ;;  %v5929_v35 = vld [vmem:[#allocation45_spill] sm:$0xff] }
 0x66d   :  { %v4555_v26 = vpop.eup %4554 }
 0x66e   :  { %v2788_v19 = vmul.f32 %v4555_v26, %v5618_v28  ;;  %4558 = vtanh.f32 %v5662_v61  ;;  %v4317_v28 = vld [vmem:[%s5834_s2 + $0xe4] ss:$16 sps:$4 sm:$0xff]   ;;  %v5930_v26 = vld [vmem:[#allocation42_spill] sm:$0xff] }
 0x66f   :  { %4560 = vrcp.f32 %v2782_v30  ;;  %v4557_v63 = vpop.eup %4556  ;;  %3389 = vmatprep.subr.bf16.mxu0 %v4317_v28 }
 0x670   :  { %v5666_v8 = vadd.f32 %v2790_v20, %v2788_v19 }
 0x672   :  { %4562 = vtanh.f32 %v5666_v8 }
 0x67b   :  { %v4559_v1 = vpop.eup %4558 }
 0x67c   :  { %v4561_v9 = vpop.eup %4560  ;;  %v2795_v0 = vmul.f32 %v4559_v1, %v4557_v63  ;;  %v5931_v63 = vld [vmem:[#allocation40_spill] sm:$0xff] }
 0x67f   :  { %v4563_v15 = vpop.eup %4562 }
 0x680   :  { %v2796_v2 = vmul.f32 %v4563_v15, %v4561_v9  ;;  %v5932_v15 = vld [vmem:[#allocation46_spill] sm:$0xff] }
 0x682   :  { %v4112_v17 = vpack.c.bf16 %v2796_v2, %v2795_v0 }
 0x684   :  { %4113 = vst [vmem:[#allocation3] sm:$0xff] %v4112_v17   ;;  %v5933_v17 = vld [vmem:[#allocation44_spill] sm:$0xff] }
 0x68b   :  { %v4314_v4 = vld [vmem:[#allocation3] sm:$0xff]  }
 0x68c   :  { %3055 = vmatmul.mubr.bf16.vlgmr.msra.gmra.mxu0 %v4314_v4  ;;  %3098 = vmatmul.mubr.bf16.vlgmr.msra.gmra.mxu1 %v4314_v4 }
 0x68d   :  { %3421 = vmatprep.mubr.bf16.mxu0 %v5892_v13  ;;  %3464 = vmatprep.mubr.bf16.mxu1 %v5892_v13  ;;  %v4323_v13 = vld [vmem:[%s5834_s2 + $0xc4] ss:$16 sps:$4 sm:$0xff]  }
 0x68e   :  { %3390 = vmatpush1.bf16.msra.mxu0 %v4315_v10  ;;  %3433 = vmatpush1.bf16.msra.mxu1 %v4318_v16 }
 0x68f   :  { %3391 = vmatprep.subr.bf16.mxu0 %v4323_v13  ;;  %3434 = vmatprep.subr.bf16.mxu1 %v4326_v23 }
 0x692   :  { %3392 = vmatpush1.bf16.msra.mxu0 %v4321_v22  ;;  %3435 = vmatpush1.bf16.msra.mxu1 %v4324_v14 }
 0x693   :  { %3393 = vmatprep.subr.bf16.mxu0 %v4329_v36  ;;  %3436 = vmatprep.subr.bf16.mxu1 %v4332_v37 }
 0x696   :  { %3394 = vmatpush1.bf16.msra.mxu0 %v4327_v38  ;;  %3437 = vmatpush1.bf16.msra.mxu1 %v4330_v39 }
 0x697   :  { %3395 = vmatprep.subr.bf16.mxu0 %v4335_v40  ;;  %3438 = vmatprep.subr.bf16.mxu1 %v4338_v41 }
 0x69a   :  { %3396 = vmatpush1.bf16.msra.mxu0 %v4333_v42  ;;  %3439 = vmatpush1.bf16.msra.mxu1 %v4336_v44 }
 0x69b   :  { %3397 = vmatprep.subr.bf16.mxu0 %v4341_v45  ;;  %3440 = vmatprep.subr.bf16.mxu1 %v4344_v46 }
 0x69e   :  { %3398 = vmatpush1.bf16.msra.mxu0 %v4339_v47  ;;  %3441 = vmatpush1.bf16.msra.mxu1 %v4342_v48 }
 0x69f   :  { %3399 = vmatprep.subr.bf16.mxu0 %v4347_v49  ;;  %3442 = vmatprep.subr.bf16.mxu1 %v4350_v50 }
 0x6a2   :  { %3400 = vmatpush1.bf16.msra.mxu0 %v4345_v51  ;;  %3443 = vmatpush1.bf16.msra.mxu1 %v4348_v53 }
 0x6a3   :  { %3401 = vmatprep.subr.bf16.mxu0 %v4353_v54  ;;  %3444 = vmatprep.subr.bf16.mxu1 %v4356_v57 }
 0x6a6   :  { %3402 = vmatpush1.bf16.msra.mxu0 %v4351_v55  ;;  %3445 = vmatpush1.bf16.msra.mxu1 %v4354_v56 }
 0x6a7   :  { %3403 = vmatprep.subr.bf16.mxu0 %v4359_v58  ;;  %3446 = vmatprep.subr.bf16.mxu1 %v4362_v59 }
 0x6aa   :  { %3404 = vmatpush1.bf16.msra.mxu0 %v4357_v60  ;;  %3447 = vmatpush1.bf16.msra.mxu1 %v4360_v62  ;;  %v4629_v62 = vmov 0.0  }
 0x6ab   :  { %4133 = vmatprep.subr.bf16.mxu0 %v4629_v62 }
 0x74c   :  { %v3056_v29 = vpop.f32.mrf.mxu0  ;;  %v3099_v33 = vpop.f32.mrf.mxu1 }
 0x74d   :  { %v3108_v24 = vadd.f32 %v3056_v29, %v5926_v5  ;;  %v3110_v1 = vadd.f32 %v3099_v33, %v5931_v63  ;;  %v4365_v29 = vld [vmem:[%s5836_s6 + $0x30] sm:$0xff]   ;;  %v4366_v5 = vld [vmem:[%s5836_s6 + $0x28] sm:$0xff]   ;;  %v4368_v33 = vld [vmem:[%s5836_s6 + $0x18] sm:$0xff]  }
 0x74e   :  { %v3058_v43 = vpop.f32.mrf.mxu0  ;;  %v3101_v12 = vpop.f32.mrf.mxu1  ;;  %v5937_v63 = vld [vmem:[#allocation53_spill] sm:$0xff] }
 0x74f   :  { %v4008_v52 = vmul.f32 -1.442695, %v3108_v24  ;;  %v3109_v32 = vadd.f32 %v3058_v43, %v5927_v7  ;;  %v3111_v30 = vadd.f32 %v3101_v12, %v5930_v26  ;;  %v4367_v24 = vld [vmem:[%s5836_s6 + $0x20] sm:$0xff]   ;;  %v4369_v43 = vld [vmem:[%s5836_s6 + $0x10] sm:$0xff]  }
 0x750   :  { %v3060_v3 = vpop.f32.mrf.mxu0  ;;  %v3103_v34 = vpop.f32.mrf.mxu1  ;;  %v4371_v7 = vld [vmem:[%s5836_s6] sm:$0xff]  }
 0x751   :  { %4564 = vpow2.f32 %v4008_v52  ;;  %v4010_v11 = vmul.f32 -1.442695, %v3109_v32  ;;  %v3112_v31 = vadd.f32 %v3060_v3, %v5928_v25  ;;  %v4012_v9 = vmul.f32 -1.442695, %v3111_v30  ;;  %v4370_v52 = vld [vmem:[%s5836_s6 + $0x8] sm:$0xff]   ;;  %v5934_v3 = vld [vmem:[#allocation47_spill] sm:$0xff] }
 0x752   :  { %v3062_v21 = vpop.f32.mrf.mxu0  ;;  %v3105_v19 = vpop.f32.mrf.mxu1  ;;  %v3114_v4 = vadd.f32 %v3103_v34, %v5933_v17 }
 0x753   :  { %4566 = vpow2.f32 %v4010_v11  ;;  %v4009_v27 = vmul.f32 -1.442695, %v3112_v31  ;;  %v3113_v6 = vadd.f32 %v3062_v21, %v5929_v35  ;;  %v3115_v0 = vadd.f32 %v3105_v19, %v5932_v15  ;;  %v5935_v21 = vld [vmem:[#allocation49_spill] sm:$0xff] }
 0x755   :  { %4568 = vpow2.f32 %v4009_v27  ;;  %v4011_v20 = vmul.f32 -1.442695, %v3113_v6  ;;  %v4013_v10 = vmul.f32 -1.442695, %v3115_v0  ;;  %v5938_v0 = vld [vmem:[#allocation50_spill] sm:$0xff] }
 0x757   :  { %4570 = vpow2.f32 %v4011_v20  ;;  %v5936_v20 = vld [vmem:[#allocation51_spill] sm:$0xff] }
 0x758   :  { %4572 = vtanh.f32 %v3110_v1 }
 0x759   :  { %4574 = vpow2.f32 %v4012_v9 }
 0x75e   :  { %v4565_v2 = vpop.eup %4564 }
 0x75f   :  { %v3122_v28 = vadd.f32 1.0, %v4565_v2 }
 0x760   :  { %v4567_v18 = vpop.eup %4566 }
 0x761   :  { %4576 = vrcp.f32 %v3122_v28  ;;  %v3134_v16 = vadd.f32 1.0, %v4567_v18 }
 0x762   :  { %v4569_v13 = vpop.eup %4568  ;;  %4578 = vtanh.f32 %v3114_v4  ;;  %v5939_v4 = vld [vmem:[#allocation48_spill] sm:$0xff] }
 0x763   :  { %4580 = vrcp.f32 %v3134_v16  ;;  %v3123_v23 = vadd.f32 1.0, %v4569_v13 }
 0x764   :  { %v4571_v22 = vpop.eup %4570  ;;  %4582 = vpow2.f32 %v4013_v10  ;;  %v5940_v10 = vld [vmem:[#allocation54_spill] sm:$0xff] }
 0x765   :  { %4584 = vrcp.f32 %v3123_v23  ;;  %v3135_v14 = vadd.f32 1.0, %v4571_v22  ;;  %v4573_v36 = vpop.eup %4572  ;;  %v5941_v23 = vld [vmem:[#allocation52_spill] sm:$0xff] }
 0x766   :  { %v4575_v37 = vpop.eup %4574 }
 0x767   :  { %4586 = vrcp.f32 %v3135_v14  ;;  %v3148_v46 = vadd.f32 1.0, %v4575_v37 }
 0x769   :  { %4588 = vrcp.f32 %v3148_v46 }
 0x76e   :  { %v4577_v38 = vpop.eup %4576 }
 0x76f   :  { %v4579_v39 = vpop.eup %4578  ;;  %v3156_v40 = vmul.f32 %v4577_v38, %v4573_v36 }
 0x770   :  { %v4581_v41 = vpop.eup %4580 }
 0x771   :  { %v4583_v42 = vpop.eup %4582  ;;  %v3154_v44 = vmul.f32 %v4581_v41, %v5662_v61 }
 0x772   :  { %v4585_v45 = vpop.eup %4584  ;;  %v3149_v50 = vadd.f32 1.0, %v4583_v42 }
 0x773   :  { %v5776_v47 = vadd.f32 %v3156_v40, %v3154_v44  ;;  %v3157_v48 = vmul.f32 %v4585_v45, %v4579_v39 }
 0x774   :  { %v4587_v49 = vpop.eup %4586 }
 0x775   :  { %v3155_v51 = vmul.f32 %v4587_v49, %v5666_v8  ;;  %4590 = vtanh.f32 %v5776_v47  ;;  %v4364_v8 = vld [vmem:[%s5836_s6 + $0x38] sm:$0xff]  }
 0x776   :  { %4592 = vrcp.f32 %v3149_v50  ;;  %v4589_v54 = vpop.eup %4588 }
 0x777   :  { %v5780_v53 = vadd.f32 %v3157_v48, %v3155_v51 }
 0x779   :  { %4594 = vtanh.f32 %v5780_v53 }
 0x782   :  { %v4591_v55 = vpop.eup %4590 }
 0x783   :  { %v4593_v61 = vpop.eup %4592  ;;  %v3162_v57 = vmul.f32 %v4591_v55, %v4589_v54 }
 0x786   :  { %v4595_v56 = vpop.eup %4594 }
 0x787   :  { %v3163_v58 = vmul.f32 %v4595_v56, %v4593_v61 }
 0x789   :  { %v4117_v59 = vpack.c.bf16 %v3163_v58, %v3162_v57 }
 0x78b   :  { %4118 = vst [vmem:[#allocation3] sm:$0xff] %v4117_v59  }
 0x792   :  { %v4363_v60 = vld [vmem:[#allocation3] sm:$0xff]  }
 0x793   :  { %3422 = vmatmul.mubr.bf16.vlgmr.msra.gmra.mxu0 %v4363_v60  ;;  %3465 = vmatmul.mubr.bf16.vlgmr.msra.gmra.mxu1 %v4363_v60 }
 0x794   :  { %4134 = vmatpush3.bf16.msra.mxu0 %v4364_v8  ;;  %4149 = vmatprep.mubr.msk.bf16.mxu0 %vm4630_vm0, %v4629_v62 }
 0x795   :  { %4135 = vmatprep.subr.bf16.mxu0 %v4629_v62 }
 0x798   :  { %4136 = vmatpush3.bf16.msra.mxu0 %v4365_v29 }
 0x799   :  { %4137 = vmatprep.subr.bf16.mxu0 %v4629_v62 }
 0x79c   :  { %4138 = vmatpush3.bf16.msra.mxu0 %v4366_v5  ;;  %v4057_v5 = vld [vmem:[%s5837_s4] ss:$0 sm:$0xff] }
 0x79d   :  { %4139 = vmatprep.subr.bf16.mxu0 %v4629_v62 }
 0x7a0   :  { %4140 = vmatpush3.bf16.msra.mxu0 %v4367_v24 }
 0x7a1   :  { %4141 = vmatprep.subr.bf16.mxu0 %v4629_v62 }
 0x7a4   :  { %4142 = vmatpush3.bf16.msra.mxu0 %v4368_v33 }
 0x7a5   :  { %4143 = vmatprep.subr.bf16.mxu0 %v4629_v62 }
 0x7a8   :  { %4144 = vmatpush3.bf16.msra.mxu0 %v4369_v43 }
 0x7a9   :  { %4145 = vmatprep.subr.bf16.mxu0 %v4629_v62 }
 0x7ac   :  { %4146 = vmatpush3.bf16.msra.mxu0 %v4370_v52  ;;  %v4058_v52 = vld [vmem:[%s5838_s5] ss:$0 sm:$0xff] }
 0x7ad   :  { %4147 = vmatprep.subr.bf16.mxu0 %v4629_v62 }
 0x7b0   :  { %4148 = vmatpush3.bf16.msra.mxu0 %v4371_v7 }
 0x853   :  { %v3423_v32 = vpop.f32.mrf.mxu0  ;;  %v3466_v12 = vpop.f32.mrf.mxu1 }
 0x854   :  { %v3475_v11 = vadd.f32 %v3423_v32, %v5934_v3  ;;  %v3477_v28 = vadd.f32 %v3466_v12, %v5939_v4 }
 0x855   :  { %v3425_v25 = vpop.f32.mrf.mxu0  ;;  %v3468_v34 = vpop.f32.mrf.mxu1 }
 0x856   :  { %v4049_v31 = vmul.f32 -1.442695, %v3475_v11  ;;  %v3476_v27 = vadd.f32 %v3425_v25, %v5935_v21  ;;  %v3478_v2 = vadd.f32 %v3468_v34, %v5938_v0  ;;  %v4059_v21 = vld [vmem:[%s5839_s7] ss:$0 sm:$0xff] }
 0x857   :  { %v3427_v35 = vpop.f32.mrf.mxu0  ;;  %v3470_v9 = vpop.f32.mrf.mxu1 }
 0x858   :  { %4596 = vpow2.f32 %v4049_v31  ;;  %v4051_v6 = vmul.f32 -1.442695, %v3476_v27  ;;  %v3479_v26 = vadd.f32 %v3427_v35, %v5936_v20  ;;  %v4053_v18 = vmul.f32 -1.442695, %v3478_v2 }
 0x859   :  { %v3429_v30 = vpop.f32.mrf.mxu0  ;;  %v3472_v17 = vpop.f32.mrf.mxu1  ;;  %v3481_v22 = vadd.f32 %v3470_v9, %v5941_v23 }
 0x85a   :  { %4598 = vpow2.f32 %v4051_v6  ;;  %v4050_v19 = vmul.f32 -1.442695, %v3479_v26  ;;  %v3480_v1 = vadd.f32 %v3429_v30, %v5937_v63  ;;  %v3482_v16 = vadd.f32 %v3472_v17, %v5940_v10 }
 0x85c   :  { %4600 = vpow2.f32 %v4050_v19  ;;  %v4052_v15 = vmul.f32 -1.442695, %v3480_v1  ;;  %v4054_v37 = vmul.f32 -1.442695, %v3482_v16 }
 0x85e   :  { %4602 = vpow2.f32 %v4052_v15 }
 0x85f   :  { %4604 = vtanh.f32 %v3477_v28 }
 0x860   :  { %4606 = vpow2.f32 %v4053_v18 }
 0x865   :  { %v4597_v13 = vpop.eup %4596 }
 0x866   :  { %v3489_v14 = vadd.f32 1.0, %v4597_v13 }
 0x867   :  { %v4599_v36 = vpop.eup %4598 }
 0x868   :  { %4608 = vrcp.f32 %v3489_v14  ;;  %v3501_v38 = vadd.f32 1.0, %v4599_v36 }
 0x869   :  { %v4601_v39 = vpop.eup %4600  ;;  %4610 = vtanh.f32 %v3481_v22 }
 0x86a   :  { %4612 = vrcp.f32 %v3501_v38  ;;  %v3490_v40 = vadd.f32 1.0, %v4601_v39 }
 0x86b   :  { %v4603_v41 = vpop.eup %4602  ;;  %4614 = vpow2.f32 %v4054_v37 }
 0x86c   :  { %4616 = vrcp.f32 %v3490_v40  ;;  %v3502_v42 = vadd.f32 1.0, %v4603_v41  ;;  %v4605_v44 = vpop.eup %4604 }
 0x86d   :  { %v4607_v45 = vpop.eup %4606 }
 0x86e   :  { %4618 = vrcp.f32 %v3502_v42  ;;  %v3515_v51 = vadd.f32 1.0, %v4607_v45 }
 0x870   :  { %4620 = vrcp.f32 %v3515_v51 }
 0x875   :  { %v4609_v46 = vpop.eup %4608 }
 0x876   :  { %v4611_v48 = vpop.eup %4610  ;;  %v3523_v49 = vmul.f32 %v4609_v46, %v4605_v44 }
 0x877   :  { %v4613_v50 = vpop.eup %4612 }
 0x878   :  { %v4615_v54 = vpop.eup %4614  ;;  %v3521_v55 = vmul.f32 %v4613_v50, %v5776_v47 }
 0x879   :  { %v4617_v61 = vpop.eup %4616  ;;  %v3516_v59 = vadd.f32 1.0, %v4615_v54 }
 0x87a   :  { %v3525_v56 = vadd.f32 %v3523_v49, %v3521_v55  ;;  %v3524_v57 = vmul.f32 %v4617_v61, %v4611_v48 }
 0x87b   :  { %v4619_v58 = vpop.eup %4618 }
 0x87c   :  { %4622 = vtanh.f32 %v3525_v56  ;;  %v3522_v60 = vmul.f32 %v4619_v58, %v5780_v53 }
 0x87d   :  { %4624 = vrcp.f32 %v3516_v59  ;;  %v4621_v62 = vpop.eup %4620 }
 0x87e   :  { %v3526_v8 = vadd.f32 %v3524_v57, %v3522_v60 }
 0x880   :  { %4626 = vtanh.f32 %v3526_v8 }
 0x889   :  { %v4623_v29 = vpop.eup %4622 }
 0x88a   :  { %v3529_v24 = vmul.f32 %v4623_v29, %v4621_v62  ;;  %v4625_v47 = vpop.eup %4624 }
 0x88c   :  { %v3557_v33 = vmul.f32 %v4057_v5, %v3529_v24 }
 0x88d   :  { %v4627_v43 = vpop.eup %4626 }
 0x88e   :  { %v3530_v7 = vmul.f32 %v4627_v43, %v4625_v47  ;;  %v3566_v3 = vadd.f32 %v4058_v52, %v3557_v33 }
 0x890   :  { %v4122_v32 = vpack.c.bf16 %v3530_v7, %v3529_v24  ;;  %v3558_v53 = vmul.f32 %v4057_v5, %v3530_v7  ;;  %v3568_v12 = vmax.f32 %v3566_v3, 0.0 }
 0x892   :  { %4123 = vst [vmem:[#allocation3] sm:$0xff] %v4122_v32   ;;  %v3567_v11 = vadd.f32 %v4058_v52, %v3558_v53 }
 0x894   :  { %v3569_v25 = vmax.f32 %v3567_v11, 0.0 }
 0x896   :  { %v3570_v31 = vpack.c.bf16 %v3569_v25, %v3568_v12 }
 0x898   :  { %4150 = vmatmul.mubr.bf16.vlgmr.msra.gmra.mxu0 %v3570_v31 }
 0x958   :  { %v3676_v27 = vpop.f32.mrf.mxu0 }
 0x959   :  { %v3677_v35 = vadd.f32 %v4059_v21, %v3676_v27 }
 0x95a   :  { %v4151_v6 = vpop.f32.mrf.mxu0 }
 0x95b   :  { %3683 = vst [vmem:[%s5840_s8] sm:$0xff] %v3677_v35 }
 0x95c   :  { %v3679_v34 = vpop.f32.mrf.mxu0 }
 0x95d   :  { %v3680_v20 = vadd.f32 %v4059_v21, %v3679_v34 }
 0x95e   :  { %v4152_v26 = vpop.f32.mrf.mxu0 }
 0x95f   :  { %3684 = vst [vmem:[%s5840_s8 + $0x8] sm:$0xff] %v3680_v20 }

</bundles_post_ra>
